<compile_context>
chip_gen: v6e
topology: v6e:2x2x1
jax: 0.10.0
libtpu: 0.0.40
codegen_flags: <defaults>
</compile_context>

<pallas_src>
import functools
import numpy as np

import jax
import jax.numpy as jnp
from jax.experimental import pallas as pl
from jax.experimental.pallas import tpu as pltpu

EPS = 1e-5

# Phase decomposition of a stride-2, pad-1, k=4 ConvTranspose2d:
#   out[o] = sum_{i,k : o = 2*i - 1 + k} x[i] * w[k]
# For output parity r = o % 2 exactly two taps contribute; with a 1-pixel zero
# pad (padded index = i + 1) the contributing padded positions are q + off,
# q = o // 2:   r=0 : (off=0,k=3),(off=1,k=1)   r=1 : (off=1,k=2),(off=2,k=0)
_TAPS = (((0, 3), (1, 1)),
         ((1, 2), (2, 0)))

_C1, _C2 = 64, 32           # channel widths fixed by the module
_H1, _H2, _H3 = 4, 8, 16    # spatial sizes 1 -> 4 -> 8 -> 16
_HALF = 384                 # lane width of each tap "half" in the window bufs

# padded-w position -> column slot inside a half (real data first so every
# scatter store / matmul LHS slice is lane-aligned; pad columns at the end)
_LOC1 = {1: 0, 2: 1, 3: 2, 4: 3, 0: 4, 5: 5}                   # slots of 64
_LOC2 = {**{w: w - 1 for w in range(1, 9)}, 0: 8, 9: 9}        # slots of 32


def _tile_lanes(v, reps):
    # Tile a (1, C) row along lanes `reps` times (reps is a power of two).
    while reps > 1:
        v = jnp.concatenate([v, v], axis=1)
        reps //= 2
    return v


def _fold_lanes(v, c):
    # (1, k*c) -> (1, c): pairwise-tree sum of the k consecutive width-c
    # groups (k is a power of two).
    w = v.shape[1]
    while w > c:
        w //= 2
        v = v[:, :w] + v[:, w:]
    return v


# ----------------------------------------------------------------------------
# The fused kernel
# ----------------------------------------------------------------------------
def _generator_kernel(x_ref, w1_ref, w2a_ref, w2b_ref, w3a_ref, w3b_ref,
                      g1_ref, b1_ref, g2_ref, b2_ref,
                      out_ref, a1_ref, a2_ref, *, n):
    f32 = jnp.float32
    G = x_ref.shape[0]                      # batch rows, padded to mult. of 8
    w2 = (w2a_ref, w2b_ref)
    w3 = (w3a_ref, w3b_ref)

    # Zero ONLY the pad regions of the window buffers (everything else is
    # fully overwritten by the block scatters below).
    z1c = jnp.zeros((5 * G, 128), f32)
    a1_ref[:, 256:384] = z1c                       # w-pad cols, tap half 0
    a1_ref[:, 640:768] = z1c                       # w-pad cols, tap half 1
    a1_ref[0:G, 0:256] = jnp.zeros((G, 256), f32)          # h-pad row (top)
    a1_ref[4 * G:5 * G, 384:640] = jnp.zeros((G, 256), f32)  # h-pad row (bot)
    z2c = jnp.zeros((9 * G, 128), f32)
    a2_ref[:, 256:384] = z2c
    a2_ref[:, 640:768] = z2c
    a2_ref[0:G, 0:256] = jnp.zeros((G, 256), f32)
    a2_ref[8 * G:9 * G, 384:640] = jnp.zeros((G, 256), f32)

    # ----------------- layer 1: ConvT(latent, 64, 4, 1, 0) ------------------
    # 1x1 input -> dense matmul; y1 columns are (oh, ow, c), c fastest.
    y1 = jnp.dot(x_ref[...], w1_ref[...], preferred_element_type=f32)  # (G,1024)

    # train-mode BatchNorm over (n, 4, 4) per channel, biased variance.
    cnt1 = float(n * _H1 * _H1)
    s1 = _fold_lanes(jnp.sum(y1, axis=0, keepdims=True), _C1)
    q1 = _fold_lanes(jnp.sum(y1 * y1, axis=0, keepdims=True), _C1)
    mean1 = s1 / cnt1
    var1 = jnp.maximum(q1 / cnt1 - mean1 * mean1, 0.0)
    sc1 = g1_ref[...] * jax.lax.rsqrt(var1 + EPS)             # (1, 64)
    sh1 = b1_ref[...] - mean1 * sc1
    a1n = jnp.maximum(y1 * _tile_lanes(sc1, _H1 * _H1)
                      + _tile_lanes(sh1, _H1 * _H1), 0.0)     # (G, 1024)
    if n < G:
        # Batch-pad rows must stay exactly zero so they do not pollute the
        # layer-2 BatchNorm statistics.
        row = jax.lax.broadcasted_iota(jnp.int32, (G, 1), 0)
        a1n = a1n * (row < n).astype(f32)

    # Block-scatter into the window-layout a1: row group g holds
    # [padded row g | padded row g+1]; every store is an aligned (G,256) slab.
    for h in range(_H1):
        chunk = a1n[:, h * 256:(h + 1) * 256]                 # (G, 256)
        a1_ref[(h + 1) * G:(h + 2) * G, 0:256] = chunk        # half 0 of g=h+1
        a1_ref[h * G:(h + 1) * G, _HALF:_HALF + 256] = chunk  # half 1 of g=h

    # ----------------- layer 2: ConvT(64, 32, 4, 2, 1) ----------------------
    # One tap-fused matmul per output h-phase over the whole batch.
    v = []
    for r in range(2):
        lhs = a1_ref[r * G:(4 + r) * G, :]                    # (4G, 768)
        v.append(jnp.dot(lhs, w2[r][...], preferred_element_type=f32))  # (4G,256)

    cnt2 = float(n * _H2 * _H2)
    s2 = _fold_lanes(jnp.sum(v[0], axis=0, keepdims=True)
                     + jnp.sum(v[1], axis=0, keepdims=True), _C2)
    q2 = _fold_lanes(jnp.sum(v[0] * v[0], axis=0, keepdims=True)
                     + jnp.sum(v[1] * v[1], axis=0, keepdims=True), _C2)
    mean2 = s2 / cnt2
    var2 = jnp.maximum(q2 / cnt2 - mean2 * mean2, 0.0)
    sc2b = g2_ref[...] * jax.lax.rsqrt(var2 + EPS)            # (1, 32)
    sh2b = b2_ref[...] - mean2 * sc2b
    sc2 = _tile_lanes(sc2b, _H2)                              # (1, 256)
    sh2 = _tile_lanes(sh2b, _H2)

    # Normalize + ReLU and block-scatter into the window-layout a2.
    # (Batch-pad rows carry relu(shift); harmless: no BN follows layer 3 and
    #  the wrapper slices them off.)
    for r in range(2):
        z = jnp.maximum(v[r] * sc2 + sh2, 0.0)                # (4G, 256)
        for q in range(_H1):
            h2 = 2 * q + r
            chunk = z[q * G:(q + 1) * G, :]                   # (G, 256)
            a2_ref[(h2 + 1) * G:(h2 + 2) * G, 0:256] = chunk
            a2_ref[h2 * G:(h2 + 1) * G, _HALF:_HALF + 256] = chunk

    # ----------------- layer 3: ConvT(32, C_out, 4, 2, 1) + Tanh ------------
    # One tap-fused matmul per output h-phase; the result slab is lane-dense
    # (cols = (c_out, ow) zero-padded to 128) and stored whole.
    for r in range(2):
        lhs = a2_ref[r * G:(8 + r) * G, :]                    # (8G, 768)
        y3 = jnp.dot(lhs, w3[r][...], preferred_element_type=f32)  # (8G, 128)
        out_ref[r * 8 * G:(r + 1) * 8 * G, :] = jnp.tanh(y3)


# ----------------------------------------------------------------------------
# Host-side weight preprocessing (hoisted out of the jitted forward)
# ----------------------------------------------------------------------------
def _build_w1(w1):
    # (C_in, 64, 4, 4) -> (C_in, (oh, ow, c)) so the layer-1 matmul emits NHWC.
    c_in = w1.shape[0]
    return np.ascontiguousarray(
        np.transpose(w1, (0, 2, 3, 1)).reshape(c_in, _H1 * _H1 * _C1))


def _build_w2(w2):
    # Per output h-phase, h-tap-fused block-Toeplitz RHS.
    # rows = (tap half, padded-w slot, ci) = 2*384, cols = (ow2, co) = 256.
    out = np.zeros((2, 2 * _HALF, _H2 * _C2), np.float32)
    for r_h in range(2):
        for half, (_, kh) in enumerate(_TAPS[r_h]):
            for ow in range(_H2):
                r_w, q_w = ow % 2, ow // 2
                for woff, kw in _TAPS[r_w]:
                    wp = q_w + woff
                    rs = half * _HALF + _LOC1[wp] * _C1
                    cs = ow * _C2
                    out[r_h, rs:rs + _C1, cs:cs + _C2] += w2[:, :, kh, kw]
    return out


def _build_w3(w3, ncols=128):
    # Per output h-phase, h-tap-fused block-Toeplitz RHS.
    # rows = (tap half, padded-w slot, ci) = 2*384, cols = (co, ow3) padded
    # with zero columns up to `ncols` so the output slab is lane-dense.
    c_out = w3.shape[1]
    assert c_out * _H3 <= ncols
    out = np.zeros((2, 2 * _HALF, ncols), np.float32)
    for r_h in range(2):
        for half, (_, kh) in enumerate(_TAPS[r_h]):
            for ow in range(_H3):
                r_w, q_w = ow % 2, ow // 2
                for woff, kw in _TAPS[r_w]:
                    wp = q_w + woff
                    rs = half * _HALF + _LOC2[wp] * _C2
                    for co in range(c_out):
                        out[r_h, rs:rs + _C2, co * _H3 + ow] += w3[:, co, kh, kw]
    return out


def prepare_params(params):
    w1 = np.asarray(params["w1"], np.float32)
    w2 = np.asarray(params["w2"], np.float32)
    w3 = np.asarray(params["w3"], np.float32)
    w2f = _build_w2(w2)
    w3f = _build_w3(w3)
    return {
        "w1m": jnp.asarray(_build_w1(w1)),
        "w2f0": jnp.asarray(w2f[0]), "w2f1": jnp.asarray(w2f[1]),
        "w3f0": jnp.asarray(w3f[0]), "w3f1": jnp.asarray(w3f[1]),
        "g1": jnp.asarray(params["g1"], jnp.float32).reshape(1, _C1),
        "b1": jnp.asarray(params["b1"], jnp.float32).reshape(1, _C1),
        "g2": jnp.asarray(params["g2"], jnp.float32).reshape(1, _C2),
        "b2": jnp.asarray(params["b2"], jnp.float32).reshape(1, _C2),
    }


# ----------------------------------------------------------------------------
# Forward wrapper: a single pallas_call + a cheap layout fix-up
# ----------------------------------------------------------------------------
def unet_generator_v2_forward(x_nchw, prep, *, c_out):
    n, latent = x_nchw.shape[0], x_nchw.shape[1]
    G = max(8, -(-n // 8) * 8)           # batch rows padded to sublane multiple
    x2 = x_nchw.reshape(n, latent).astype(jnp.float32)
    if G > n:
        x2 = jnp.pad(x2, ((0, G - n), (0, 0)))

    vmem = pl.BlockSpec(memory_space=pltpu.MemorySpace.VMEM)
    ncols = prep["w3f0"].shape[-1]
    flops = 2 * (G * latent * _H1 * _H1 * _C1
                 + 2 * (4 * G) * (2 * _HALF) * (_H2 * _C2)
                 + 2 * (8 * G) * (2 * _HALF) * ncols)
    bytes_accessed = 4 * (x2.size + int(prep["w1m"].size)
                          + 2 * int(prep["w2f0"].size) + 2 * int(prep["w3f0"].size)
                          + 2 * (_C1 + _C2) + 2 * 8 * G * ncols)

    slab = pl.pallas_call(
        functools.partial(_generator_kernel, n=n),
        out_shape=jax.ShapeDtypeStruct((2 * 8 * G, ncols), jnp.float32),
        in_specs=[vmem] * 10,
        out_specs=vmem,
        scratch_shapes=[pltpu.VMEM((5 * G, 2 * _HALF), jnp.float32),
                        pltpu.VMEM((9 * G, 2 * _HALF), jnp.float32)],
        cost_estimate=pl.CostEstimate(
            flops=flops,
            transcendentals=2 * 8 * G * ncols + 2 * (_C1 + _C2),
            bytes_accessed=bytes_accessed),
    )(x2, prep["w1m"], prep["w2f0"], prep["w2f1"], prep["w3f0"], prep["w3f1"],
      prep["g1"], prep["b1"], prep["g2"], prep["b2"])

    # slab rows = (h-phase r, q_h, b), cols = (co, ow) padded to `ncols`.
    slab = slab.reshape(2, _H2, G, ncols)[:, :, :n, :c_out * _H3]
    slab = slab.reshape(2, _H2, n, c_out, _H3)
    # oh = 2*q + r  ->  (b, co, q, r, ow) then merge (q, r).
    return jnp.transpose(slab, (2, 3, 1, 0, 4)).reshape(n, c_out, _H3, _H3)


# ----------------------------------------------------------------------------
# Pure-JAX reference (for correctness checking) + deterministic init
# ----------------------------------------------------------------------------
def _reference_forward(x, params):
    def convt(h, w, stride, pad):
        k = w.shape[2]
        w_oihw = jnp.transpose(jnp.flip(w, (2, 3)), (1, 0, 2, 3))
        return jax.lax.conv_general_dilated(
            h, w_oihw, window_strides=(1, 1),
            padding=[(k - 1 - pad, k - 1 - pad)] * 2,
            lhs_dilation=(stride, stride),
            dimension_numbers=("NCHW", "OIHW", "NCHW"))

    def bn_relu(h, g, b):
        mu = jnp.mean(h, axis=(0, 2, 3), keepdims=True)
        var = jnp.mean(jnp.square(h - mu), axis=(0, 2, 3), keepdims=True)
        h = (h - mu) * jax.lax.rsqrt(var + EPS)
        h = h * g.reshape(1, -1, 1, 1) + b.reshape(1, -1, 1, 1)
        return jnp.maximum(h, 0.0)

    h = bn_relu(convt(x, params["w1"], 1, 0), params["g1"], params["b1"])
    h = bn_relu(convt(h, params["w2"], 2, 1), params["g2"], params["b2"])
    return jnp.tanh(convt(h, params["w3"], 2, 1))


def init_params(latent_dim, channels_out, key):
    k1, k2, k3 = jax.random.split(key, 3)
    return {
        "w1": 0.05 * jax.random.normal(k1, (latent_dim, _C1, 4, 4), jnp.float32),
        "g1": jnp.ones((_C1,), jnp.float32),
        "b1": jnp.zeros((_C1,), jnp.float32),
        "w2": 0.05 * jax.random.normal(k2, (_C1, _C2, 4, 4), jnp.float32),
        "g2": jnp.ones((_C2,), jnp.float32),
        "b2": jnp.zeros((_C2,), jnp.float32),
        "w3": 0.05 * jax.random.normal(k3, (_C2, channels_out, 4, 4), jnp.float32),
    }


if __name__ == "__main__":
    latent_dim, channels_out, batch = 16, 3, 2
    key = jax.random.PRNGKey(0)
    kp, kx = jax.random.split(key)
    params = init_params(latent_dim, channels_out, kp)
    # DCGAN-style latent input: (N, latent_dim, 1, 1), NCHW like PyTorch.
    x = jax.random.normal(kx, (batch, latent_dim, 1, 1), jnp.float32)

    prep = prepare_params(params)
    fwd = jax.jit(functools.partial(unet_generator_v2_forward,
                                    c_out=channels_out))
    out = jax.block_until_ready(fwd(x, prep))

    assert out.shape == (batch, channels_out, 16, 16), out.shape
    assert out.dtype == jnp.float32
    assert bool(jnp.all(jnp.isfinite(out)))
    assert bool(jnp.all(jnp.abs(out) <= 1.0))  # tanh output range

    ref = jax.jit(_reference_forward)(x, params)
    max_err = float(jnp.max(jnp.abs(out - ref)))
    assert max_err < 5e-2, f"mismatch vs reference: max abs err = {max_err}"

    print("KERNEL_OK")
</pallas_src>

<mosaic_0001>
module attributes {stable_mosaic.version = 11 : i64} {
  func.func @_generator_kernel(%arg0: memref<8x16xf32, #tpu.memory_space<vmem>>, %arg1: memref<16x1024xf32, #tpu.memory_space<vmem>>, %arg2: memref<768x256xf32, #tpu.memory_space<vmem>>, %arg3: memref<768x256xf32, #tpu.memory_space<vmem>>, %arg4: memref<768x128xf32, #tpu.memory_space<vmem>>, %arg5: memref<768x128xf32, #tpu.memory_space<vmem>>, %arg6: memref<1x64xf32, #tpu.memory_space<vmem>>, %arg7: memref<1x64xf32, #tpu.memory_space<vmem>>, %arg8: memref<1x32xf32, #tpu.memory_space<vmem>>, %arg9: memref<1x32xf32, #tpu.memory_space<vmem>>, %arg10: memref<128x128xf32, #tpu.memory_space<vmem>>, %arg11: memref<40x768xf32, #tpu.memory_space<vmem>>, %arg12: memref<72x768xf32, #tpu.memory_space<vmem>>) attributes {dimension_semantics = [], scalar_prefetch = 0 : i64, scratch_operands = 2 : i64, tpu.core_type = #tpu.core_type<tc>} {
    %cst = arith.constant 0.000000e+00 : f32
    %0 = vector.broadcast %cst : f32 to vector<40x128xf32>
    %c0 = arith.constant 0 : index
    %c256 = arith.constant 256 : index
    %1 = vector.load %arg11[%c0, %c256] : memref<40x768xf32, #tpu.memory_space<vmem>>, vector<40x128xf32>
    tpu.vector_store %arg11[%c0, %c256], %0 {strides = array<i32>} : memref<40x768xf32, #tpu.memory_space<vmem>>, vector<40x128xf32>,
    %c0_0 = arith.constant 0 : index
    %c640 = arith.constant 640 : index
    %2 = vector.load %arg11[%c0_0, %c640] : memref<40x768xf32, #tpu.memory_space<vmem>>, vector<40x128xf32>
    tpu.vector_store %arg11[%c0_0, %c640], %0 {strides = array<i32>} : memref<40x768xf32, #tpu.memory_space<vmem>>, vector<40x128xf32>,
    %cst_1 = arith.constant 0.000000e+00 : f32
    %3 = vector.broadcast %cst_1 : f32 to vector<8x256xf32>
    %c0_2 = arith.constant 0 : index
    %c0_3 = arith.constant 0 : index
    %4 = vector.load %arg11[%c0_2, %c0_3] : memref<40x768xf32, #tpu.memory_space<vmem>>, vector<8x256xf32>
    tpu.vector_store %arg11[%c0_2, %c0_3], %3 {strides = array<i32>} : memref<40x768xf32, #tpu.memory_space<vmem>>, vector<8x256xf32>,
    %cst_4 = arith.constant 0.000000e+00 : f32
    %5 = vector.broadcast %cst_4 : f32 to vector<8x256xf32>
    %c32 = arith.constant 32 : index
    %c384 = arith.constant 384 : index
    %6 = vector.load %arg11[%c32, %c384] : memref<40x768xf32, #tpu.memory_space<vmem>>, vector<8x256xf32>
    tpu.vector_store %arg11[%c32, %c384], %5 {strides = array<i32>} : memref<40x768xf32, #tpu.memory_space<vmem>>, vector<8x256xf32>,
    %cst_5 = arith.constant 0.000000e+00 : f32
    %7 = vector.broadcast %cst_5 : f32 to vector<72x128xf32>
    %c0_6 = arith.constant 0 : index
    %c256_7 = arith.constant 256 : index
    %8 = vector.load %arg12[%c0_6, %c256_7] : memref<72x768xf32, #tpu.memory_space<vmem>>, vector<72x128xf32>
    tpu.vector_store %arg12[%c0_6, %c256_7], %7 {strides = array<i32>} : memref<72x768xf32, #tpu.memory_space<vmem>>, vector<72x128xf32>,
    %c0_8 = arith.constant 0 : index
    %c640_9 = arith.constant 640 : index
    %9 = vector.load %arg12[%c0_8, %c640_9] : memref<72x768xf32, #tpu.memory_space<vmem>>, vector<72x128xf32>
    tpu.vector_store %arg12[%c0_8, %c640_9], %7 {strides = array<i32>} : memref<72x768xf32, #tpu.memory_space<vmem>>, vector<72x128xf32>,
    %cst_10 = arith.constant 0.000000e+00 : f32
    %10 = vector.broadcast %cst_10 : f32 to vector<8x256xf32>
    %c0_11 = arith.constant 0 : index
    %c0_12 = arith.constant 0 : index
    %11 = vector.load %arg12[%c0_11, %c0_12] : memref<72x768xf32, #tpu.memory_space<vmem>>, vector<8x256xf32>
    tpu.vector_store %arg12[%c0_11, %c0_12], %10 {strides = array<i32>} : memref<72x768xf32, #tpu.memory_space<vmem>>, vector<8x256xf32>,
    %cst_13 = arith.constant 0.000000e+00 : f32
    %12 = vector.broadcast %cst_13 : f32 to vector<8x256xf32>
    %c64 = arith.constant 64 : index
    %c384_14 = arith.constant 384 : index
    %13 = vector.load %arg12[%c64, %c384_14] : memref<72x768xf32, #tpu.memory_space<vmem>>, vector<8x256xf32>
    tpu.vector_store %arg12[%c64, %c384_14], %12 {strides = array<i32>} : memref<72x768xf32, #tpu.memory_space<vmem>>, vector<8x256xf32>,
    %c0_15 = arith.constant 0 : index
    %c0_16 = arith.constant 0 : index
    %14 = vector.load %arg0[%c0_15, %c0_16] : memref<8x16xf32, #tpu.memory_space<vmem>>, vector<8x16xf32>
    %c0_17 = arith.constant 0 : index
    %c0_18 = arith.constant 0 : index
    %15 = vector.load %arg1[%c0_17, %c0_18] : memref<16x1024xf32, #tpu.memory_space<vmem>>, vector<16x1024xf32>
    %cst_19 = arith.constant dense<0.000000e+00> : vector<8x1024xf32>
    %16 = tpu.matmul %14, %15, %cst_19 {dimension_numbers = #tpu.dot_dimension_numbers<[1], [0], [0], [1], [0, 0, 1, 1], [], []>} : vector<8x16xf32>, vector<16x1024xf32>, vector<8x1024xf32> -> vector<8x1024xf32>
    %cst_20 = arith.constant dense<0.000000e+00> : vector<1024xf32>
    %17 = vector.multi_reduction <add>, %16, %cst_20 [0] : vector<8x1024xf32> to vector<1024xf32>
    %18 = vector.shape_cast %17 : vector<1024xf32> to vector<1x1024xf32>
    %19 = vector.extract_strided_slice %18 {offsets = [0, 0], sizes = [1, 512], strides = [1, 1]} : vector<1x1024xf32> to vector<1x512xf32>
    %20 = vector.extract_strided_slice %18 {offsets = [0, 512], sizes = [1, 512], strides = [1, 1]} : vector<1x1024xf32> to vector<1x512xf32>
    %21 = arith.addf %19, %20 : vector<1x512xf32>
    %22 = vector.extract_strided_slice %21 {offsets = [0, 0], sizes = [1, 256], strides = [1, 1]} : vector<1x512xf32> to vector<1x256xf32>
    %23 = vector.extract_strided_slice %21 {offsets = [0, 256], sizes = [1, 256], strides = [1, 1]} : vector<1x512xf32> to vector<1x256xf32>
    %24 = arith.addf %22, %23 : vector<1x256xf32>
    %25 = vector.extract_strided_slice %24 {offsets = [0, 0], sizes = [1, 128], strides = [1, 1]} : vector<1x256xf32> to vector<1x128xf32>
    %26 = vector.extract_strided_slice %24 {offsets = [0, 128], sizes = [1, 128], strides = [1, 1]} : vector<1x256xf32> to vector<1x128xf32>
    %27 = arith.addf %25, %26 : vector<1x128xf32>
    %28 = vector.extract_strided_slice %27 {offsets = [0, 0], sizes = [1, 64], strides = [1, 1]} : vector<1x128xf32> to vector<1x64xf32>
    %29 = vector.extract_strided_slice %27 {offsets = [0, 64], sizes = [1, 64], strides = [1, 1]} : vector<1x128xf32> to vector<1x64xf32>
    %30 = arith.addf %28, %29 : vector<1x64xf32>
    %31 = arith.mulf %16, %16 : vector<8x1024xf32>
    %cst_21 = arith.constant dense<0.000000e+00> : vector<1024xf32>
    %32 = vector.multi_reduction <add>, %31, %cst_21 [0] : vector<8x1024xf32> to vector<1024xf32>
    %33 = vector.shape_cast %32 : vector<1024xf32> to vector<1x1024xf32>
    %34 = vector.extract_strided_slice %33 {offsets = [0, 0], sizes = [1, 512], strides = [1, 1]} : vector<1x1024xf32> to vector<1x512xf32>
    %35 = vector.extract_strided_slice %33 {offsets = [0, 512], sizes = [1, 512], strides = [1, 1]} : vector<1x1024xf32> to vector<1x512xf32>
    %36 = arith.addf %34, %35 : vector<1x512xf32>
    %37 = vector.extract_strided_slice %36 {offsets = [0, 0], sizes = [1, 256], strides = [1, 1]} : vector<1x512xf32> to vector<1x256xf32>
    %38 = vector.extract_strided_slice %36 {offsets = [0, 256], sizes = [1, 256], strides = [1, 1]} : vector<1x512xf32> to vector<1x256xf32>
    %39 = arith.addf %37, %38 : vector<1x256xf32>
    %40 = vector.extract_strided_slice %39 {offsets = [0, 0], sizes = [1, 128], strides = [1, 1]} : vector<1x256xf32> to vector<1x128xf32>
    %41 = vector.extract_strided_slice %39 {offsets = [0, 128], sizes = [1, 128], strides = [1, 1]} : vector<1x256xf32> to vector<1x128xf32>
    %42 = arith.addf %40, %41 : vector<1x128xf32>
    %43 = vector.extract_strided_slice %42 {offsets = [0, 0], sizes = [1, 64], strides = [1, 1]} : vector<1x128xf32> to vector<1x64xf32>
    %44 = vector.extract_strided_slice %42 {offsets = [0, 64], sizes = [1, 64], strides = [1, 1]} : vector<1x128xf32> to vector<1x64xf32>
    %45 = arith.addf %43, %44 : vector<1x64xf32>
    %cst_22 = arith.constant 3.200000e+01 : f32
    %46 = vector.broadcast %cst_22 : f32 to vector<1x64xf32>
    %47 = arith.divf %30, %46 : vector<1x64xf32>
    %cst_23 = arith.constant 3.200000e+01 : f32
    %48 = vector.broadcast %cst_23 : f32 to vector<1x64xf32>
    %49 = arith.divf %45, %48 : vector<1x64xf32>
    %50 = arith.mulf %47, %47 : vector<1x64xf32>
    %51 = arith.subf %49, %50 : vector<1x64xf32>
    %cst_24 = arith.constant 0.000000e+00 : f32
    %52 = vector.broadcast %cst_24 : f32 to vector<1x64xf32>
    %53 = arith.maximumf %51, %52 : vector<1x64xf32>
    %c0_25 = arith.constant 0 : index
    %c0_26 = arith.constant 0 : index
    %54 = vector.load %arg6[%c0_25, %c0_26] : memref<1x64xf32, #tpu.memory_space<vmem>>, vector<1x64xf32>
    %cst_27 = arith.constant 9.99999974E-6 : f32
    %55 = vector.broadcast %cst_27 : f32 to vector<1x64xf32>
    %56 = arith.addf %53, %55 : vector<1x64xf32>
    %57 = math.rsqrt %56 : vector<1x64xf32>
    %58 = arith.mulf %54, %57 : vector<1x64xf32>
    %c0_28 = arith.constant 0 : index
    %c0_29 = arith.constant 0 : index
    %59 = vector.load %arg7[%c0_28, %c0_29] : memref<1x64xf32, #tpu.memory_space<vmem>>, vector<1x64xf32>
    %60 = arith.mulf %47, %58 : vector<1x64xf32>
    %61 = arith.subf %59, %60 : vector<1x64xf32>
    %62 = tpu.concatenate %58, %58 in 1 : vector<1x64xf32>, vector<1x64xf32> -> vector<1x128xf32>
    %63 = tpu.concatenate %62, %62 in 1 : vector<1x128xf32>, vector<1x128xf32> -> vector<1x256xf32>
    %64 = tpu.concatenate %63, %63 in 1 : vector<1x256xf32>, vector<1x256xf32> -> vector<1x512xf32>
    %65 = tpu.concatenate %64, %64 in 1 : vector<1x512xf32>, vector<1x512xf32> -> vector<1x1024xf32>
    %66 = vector.broadcast %65 : vector<1x1024xf32> to vector<8x1024xf32>
    %67 = arith.mulf %16, %66 : vector<8x1024xf32>
    %68 = tpu.concatenate %61, %61 in 1 : vector<1x64xf32>, vector<1x64xf32> -> vector<1x128xf32>
    %69 = tpu.concatenate %68, %68 in 1 : vector<1x128xf32>, vector<1x128xf32> -> vector<1x256xf32>
    %70 = tpu.concatenate %69, %69 in 1 : vector<1x256xf32>, vector<1x256xf32> -> vector<1x512xf32>
    %71 = tpu.concatenate %70, %70 in 1 : vector<1x512xf32>, vector<1x512xf32> -> vector<1x1024xf32>
    %72 = vector.broadcast %71 : vector<1x1024xf32> to vector<8x1024xf32>
    %73 = arith.addf %67, %72 : vector<8x1024xf32>
    %cst_30 = arith.constant 0.000000e+00 : f32
    %74 = vector.broadcast %cst_30 : f32 to vector<8x1024xf32>
    %75 = arith.maximumf %73, %74 : vector<8x1024xf32>
    %76 = tpu.iota {dimensions = array<i32: 0>} : vector<8x1xi32>
    %c2_i32 = arith.constant 2 : i32
    %77 = vector.broadcast %c2_i32 : i32 to vector<8x1xi32>
    %78 = arith.cmpi slt, %76, %77 : vector<8x1xi32>
    %79 = arith.extui %78 : vector<8x1xi1> to vector<8x1xi32>
    %80 = arith.sitofp %79 : vector<8x1xi32> to vector<8x1xf32>
    %81 = vector.broadcast %80 : vector<8x1xf32> to vector<8x1024xf32>
    %82 = arith.mulf %75, %81 : vector<8x1024xf32>
    %83 = vector.extract_strided_slice %82 {offsets = [0, 0], sizes = [8, 256], strides = [1, 1]} : vector<8x1024xf32> to vector<8x256xf32>
    %c8 = arith.constant 8 : index
    %c0_31 = arith.constant 0 : index
    %84 = vector.load %arg11[%c8, %c0_31] : memref<40x768xf32, #tpu.memory_space<vmem>>, vector<8x256xf32>
    tpu.vector_store %arg11[%c8, %c0_31], %83 {strides = array<i32>} : memref<40x768xf32, #tpu.memory_space<vmem>>, vector<8x256xf32>,
    %c0_32 = arith.constant 0 : index
    %c384_33 = arith.constant 384 : index
    %85 = vector.load %arg11[%c0_32, %c384_33] : memref<40x768xf32, #tpu.memory_space<vmem>>, vector<8x256xf32>
    tpu.vector_store %arg11[%c0_32, %c384_33], %83 {strides = array<i32>} : memref<40x768xf32, #tpu.memory_space<vmem>>, vector<8x256xf32>,
    %86 = vector.extract_strided_slice %82 {offsets = [0, 256], sizes = [8, 256], strides = [1, 1]} : vector<8x1024xf32> to vector<8x256xf32>
    %c16 = arith.constant 16 : index
    %c0_34 = arith.constant 0 : index
    %87 = vector.load %arg11[%c16, %c0_34] : memref<40x768xf32, #tpu.memory_space<vmem>>, vector<8x256xf32>
    tpu.vector_store %arg11[%c16, %c0_34], %86 {strides = array<i32>} : memref<40x768xf32, #tpu.memory_space<vmem>>, vector<8x256xf32>,
    %c8_35 = arith.constant 8 : index
    %c384_36 = arith.constant 384 : index
    %88 = vector.load %arg11[%c8_35, %c384_36] : memref<40x768xf32, #tpu.memory_space<vmem>>, vector<8x256xf32>
    tpu.vector_store %arg11[%c8_35, %c384_36], %86 {strides = array<i32>} : memref<40x768xf32, #tpu.memory_space<vmem>>, vector<8x256xf32>,
    %89 = vector.extract_strided_slice %82 {offsets = [0, 512], sizes = [8, 256], strides = [1, 1]} : vector<8x1024xf32> to vector<8x256xf32>
    %c24 = arith.constant 24 : index
    %c0_37 = arith.constant 0 : index
    %90 = vector.load %arg11[%c24, %c0_37] : memref<40x768xf32, #tpu.memory_space<vmem>>, vector<8x256xf32>
    tpu.vector_store %arg11[%c24, %c0_37], %89 {strides = array<i32>} : memref<40x768xf32, #tpu.memory_space<vmem>>, vector<8x256xf32>,
    %c16_38 = arith.constant 16 : index
    %c384_39 = arith.constant 384 : index
    %91 = vector.load %arg11[%c16_38, %c384_39] : memref<40x768xf32, #tpu.memory_space<vmem>>, vector<8x256xf32>
    tpu.vector_store %arg11[%c16_38, %c384_39], %89 {strides = array<i32>} : memref<40x768xf32, #tpu.memory_space<vmem>>, vector<8x256xf32>,
    %92 = vector.extract_strided_slice %82 {offsets = [0, 768], sizes = [8, 256], strides = [1, 1]} : vector<8x1024xf32> to vector<8x256xf32>
    %c32_40 = arith.constant 32 : index
    %c0_41 = arith.constant 0 : index
    %93 = vector.load %arg11[%c32_40, %c0_41] : memref<40x768xf32, #tpu.memory_space<vmem>>, vector<8x256xf32>
    tpu.vector_store %arg11[%c32_40, %c0_41], %92 {strides = array<i32>} : memref<40x768xf32, #tpu.memory_space<vmem>>, vector<8x256xf32>,
    %c24_42 = arith.constant 24 : index
    %c384_43 = arith.constant 384 : index
    %94 = vector.load %arg11[%c24_42, %c384_43] : memref<40x768xf32, #tpu.memory_space<vmem>>, vector<8x256xf32>
    tpu.vector_store %arg11[%c24_42, %c384_43], %92 {strides = array<i32>} : memref<40x768xf32, #tpu.memory_space<vmem>>, vector<8x256xf32>,
    %c0_44 = arith.constant 0 : index
    %c0_45 = arith.constant 0 : index
    %95 = vector.load %arg11[%c0_44, %c0_45] : memref<40x768xf32, #tpu.memory_space<vmem>>, vector<32x768xf32>
    %c0_46 = arith.constant 0 : index
    %c0_47 = arith.constant 0 : index
    %96 = vector.load %arg2[%c0_46, %c0_47] : memref<768x256xf32, #tpu.memory_space<vmem>>, vector<768x256xf32>
    %cst_48 = arith.constant dense<0.000000e+00> : vector<32x256xf32>
    %97 = tpu.matmul %95, %96, %cst_48 {dimension_numbers = #tpu.dot_dimension_numbers<[1], [0], [0], [1], [0, 0, 1, 1], [], []>} : vector<32x768xf32>, vector<768x256xf32>, vector<32x256xf32> -> vector<32x256xf32>
    %c8_49 = arith.constant 8 : index
    %c0_50 = arith.constant 0 : index
    %98 = vector.load %arg11[%c8_49, %c0_50] : memref<40x768xf32, #tpu.memory_space<vmem>>, vector<32x768xf32>
    %c0_51 = arith.constant 0 : index
    %c0_52 = arith.constant 0 : index
    %99 = vector.load %arg3[%c0_51, %c0_52] : memref<768x256xf32, #tpu.memory_space<vmem>>, vector<768x256xf32>
    %cst_53 = arith.constant dense<0.000000e+00> : vector<32x256xf32>
    %100 = tpu.matmul %98, %99, %cst_53 {dimension_numbers = #tpu.dot_dimension_numbers<[1], [0], [0], [1], [0, 0, 1, 1], [], []>} : vector<32x768xf32>, vector<768x256xf32>, vector<32x256xf32> -> vector<32x256xf32>
    %cst_54 = arith.constant dense<0.000000e+00> : vector<256xf32>
    %101 = vector.multi_reduction <add>, %97, %cst_54 [0] : vector<32x256xf32> to vector<256xf32>
    %102 = vector.shape_cast %101 : vector<256xf32> to vector<1x256xf32>
    %cst_55 = arith.constant dense<0.000000e+00> : vector<256xf32>
    %103 = vector.multi_reduction <add>, %100, %cst_55 [0] : vector<32x256xf32> to vector<256xf32>
    %104 = vector.shape_cast %103 : vector<256xf32> to vector<1x256xf32>
    %105 = arith.addf %102, %104 : vector<1x256xf32>
    %106 = vector.extract_strided_slice %105 {offsets = [0, 0], sizes = [1, 128], strides = [1, 1]} : vector<1x256xf32> to vector<1x128xf32>
    %107 = vector.extract_strided_slice %105 {offsets = [0, 128], sizes = [1, 128], strides = [1, 1]} : vector<1x256xf32> to vector<1x128xf32>
    %108 = arith.addf %106, %107 : vector<1x128xf32>
    %109 = vector.extract_strided_slice %108 {offsets = [0, 0], sizes = [1, 64], strides = [1, 1]} : vector<1x128xf32> to vector<1x64xf32>
    %110 = vector.extract_strided_slice %108 {offsets = [0, 64], sizes = [1, 64], strides = [1, 1]} : vector<1x128xf32> to vector<1x64xf32>
    %111 = arith.addf %109, %110 : vector<1x64xf32>
    %112 = vector.extract_strided_slice %111 {offsets = [0, 0], sizes = [1, 32], strides = [1, 1]} : vector<1x64xf32> to vector<1x32xf32>
    %113 = vector.extract_strided_slice %111 {offsets = [0, 32], sizes = [1, 32], strides = [1, 1]} : vector<1x64xf32> to vector<1x32xf32>
    %114 = arith.addf %112, %113 : vector<1x32xf32>
    %115 = arith.mulf %97, %97 : vector<32x256xf32>
    %cst_56 = arith.constant dense<0.000000e+00> : vector<256xf32>
    %116 = vector.multi_reduction <add>, %115, %cst_56 [0] : vector<32x256xf32> to vector<256xf32>
    %117 = vector.shape_cast %116 : vector<256xf32> to vector<1x256xf32>
    %118 = arith.mulf %100, %100 : vector<32x256xf32>
    %cst_57 = arith.constant dense<0.000000e+00> : vector<256xf32>
    %119 = vector.multi_reduction <add>, %118, %cst_57 [0] : vector<32x256xf32> to vector<256xf32>
    %120 = vector.shape_cast %119 : vector<256xf32> to vector<1x256xf32>
    %121 = arith.addf %117, %120 : vector<1x256xf32>
    %122 = vector.extract_strided_slice %121 {offsets = [0, 0], sizes = [1, 128], strides = [1, 1]} : vector<1x256xf32> to vector<1x128xf32>
    %123 = vector.extract_strided_slice %121 {offsets = [0, 128], sizes = [1, 128], strides = [1, 1]} : vector<1x256xf32> to vector<1x128xf32>
    %124 = arith.addf %122, %123 : vector<1x128xf32>
    %125 = vector.extract_strided_slice %124 {offsets = [0, 0], sizes = [1, 64], strides = [1, 1]} : vector<1x128xf32> to vector<1x64xf32>
    %126 = vector.extract_strided_slice %124 {offsets = [0, 64], sizes = [1, 64], strides = [1, 1]} : vector<1x128xf32> to vector<1x64xf32>
    %127 = arith.addf %125, %126 : vector<1x64xf32>
    %128 = vector.extract_strided_slice %127 {offsets = [0, 0], sizes = [1, 32], strides = [1, 1]} : vector<1x64xf32> to vector<1x32xf32>
    %129 = vector.extract_strided_slice %127 {offsets = [0, 32], sizes = [1, 32], strides = [1, 1]} : vector<1x64xf32> to vector<1x32xf32>
    %130 = arith.addf %128, %129 : vector<1x32xf32>
    %cst_58 = arith.constant 1.280000e+02 : f32
    %131 = vector.broadcast %cst_58 : f32 to vector<1x32xf32>
    %132 = arith.divf %114, %131 : vector<1x32xf32>
    %cst_59 = arith.constant 1.280000e+02 : f32
    %133 = vector.broadcast %cst_59 : f32 to vector<1x32xf32>
    %134 = arith.divf %130, %133 : vector<1x32xf32>
    %135 = arith.mulf %132, %132 : vector<1x32xf32>
    %136 = arith.subf %134, %135 : vector<1x32xf32>
    %cst_60 = arith.constant 0.000000e+00 : f32
    %137 = vector.broadcast %cst_60 : f32 to vector<1x32xf32>
    %138 = arith.maximumf %136, %137 : vector<1x32xf32>
    %c0_61 = arith.constant 0 : index
    %c0_62 = arith.constant 0 : index
    %139 = vector.load %arg8[%c0_61, %c0_62] : memref<1x32xf32, #tpu.memory_space<vmem>>, vector<1x32xf32>
    %cst_63 = arith.constant 9.99999974E-6 : f32
    %140 = vector.broadcast %cst_63 : f32 to vector<1x32xf32>
    %141 = arith.addf %138, %140 : vector<1x32xf32>
    %142 = math.rsqrt %141 : vector<1x32xf32>
    %143 = arith.mulf %139, %142 : vector<1x32xf32>
    %c0_64 = arith.constant 0 : index
    %c0_65 = arith.constant 0 : index
    %144 = vector.load %arg9[%c0_64, %c0_65] : memref<1x32xf32, #tpu.memory_space<vmem>>, vector<1x32xf32>
    %145 = arith.mulf %132, %143 : vector<1x32xf32>
    %146 = arith.subf %144, %145 : vector<1x32xf32>
    %147 = tpu.concatenate %143, %143 in 1 : vector<1x32xf32>, vector<1x32xf32> -> vector<1x64xf32>
    %148 = tpu.concatenate %147, %147 in 1 : vector<1x64xf32>, vector<1x64xf32> -> vector<1x128xf32>
    %149 = tpu.concatenate %148, %148 in 1 : vector<1x128xf32>, vector<1x128xf32> -> vector<1x256xf32>
    %150 = tpu.concatenate %146, %146 in 1 : vector<1x32xf32>, vector<1x32xf32> -> vector<1x64xf32>
    %151 = tpu.concatenate %150, %150 in 1 : vector<1x64xf32>, vector<1x64xf32> -> vector<1x128xf32>
    %152 = tpu.concatenate %151, %151 in 1 : vector<1x128xf32>, vector<1x128xf32> -> vector<1x256xf32>
    %153 = vector.broadcast %149 : vector<1x256xf32> to vector<32x256xf32>
    %154 = arith.mulf %97, %153 : vector<32x256xf32>
    %155 = vector.broadcast %152 : vector<1x256xf32> to vector<32x256xf32>
    %156 = arith.addf %154, %155 : vector<32x256xf32>
    %cst_66 = arith.constant 0.000000e+00 : f32
    %157 = vector.broadcast %cst_66 : f32 to vector<32x256xf32>
    %158 = arith.maximumf %156, %157 : vector<32x256xf32>
    %159 = vector.extract_strided_slice %158 {offsets = [0, 0], sizes = [8, 256], strides = [1, 1]} : vector<32x256xf32> to vector<8x256xf32>
    %c8_67 = arith.constant 8 : index
    %c0_68 = arith.constant 0 : index
    %160 = vector.load %arg12[%c8_67, %c0_68] : memref<72x768xf32, #tpu.memory_space<vmem>>, vector<8x256xf32>
    tpu.vector_store %arg12[%c8_67, %c0_68], %159 {strides = array<i32>} : memref<72x768xf32, #tpu.memory_space<vmem>>, vector<8x256xf32>,
    %c0_69 = arith.constant 0 : index
    %c384_70 = arith.constant 384 : index
    %161 = vector.load %arg12[%c0_69, %c384_70] : memref<72x768xf32, #tpu.memory_space<vmem>>, vector<8x256xf32>
    tpu.vector_store %arg12[%c0_69, %c384_70], %159 {strides = array<i32>} : memref<72x768xf32, #tpu.memory_space<vmem>>, vector<8x256xf32>,
    %162 = vector.extract_strided_slice %158 {offsets = [8, 0], sizes = [8, 256], strides = [1, 1]} : vector<32x256xf32> to vector<8x256xf32>
    %c24_71 = arith.constant 24 : index
    %c0_72 = arith.constant 0 : index
    %163 = vector.load %arg12[%c24_71, %c0_72] : memref<72x768xf32, #tpu.memory_space<vmem>>, vector<8x256xf32>
    tpu.vector_store %arg12[%c24_71, %c0_72], %162 {strides = array<i32>} : memref<72x768xf32, #tpu.memory_space<vmem>>, vector<8x256xf32>,
    %c16_73 = arith.constant 16 : index
    %c384_74 = arith.constant 384 : index
    %164 = vector.load %arg12[%c16_73, %c384_74] : memref<72x768xf32, #tpu.memory_space<vmem>>, vector<8x256xf32>
    tpu.vector_store %arg12[%c16_73, %c384_74], %162 {strides = array<i32>} : memref<72x768xf32, #tpu.memory_space<vmem>>, vector<8x256xf32>,
    %165 = vector.extract_strided_slice %158 {offsets = [16, 0], sizes = [8, 256], strides = [1, 1]} : vector<32x256xf32> to vector<8x256xf32>
    %c40 = arith.constant 40 : index
    %c0_75 = arith.constant 0 : index
    %166 = vector.load %arg12[%c40, %c0_75] : memref<72x768xf32, #tpu.memory_space<vmem>>, vector<8x256xf32>
    tpu.vector_store %arg12[%c40, %c0_75], %165 {strides = array<i32>} : memref<72x768xf32, #tpu.memory_space<vmem>>, vector<8x256xf32>,
    %c32_76 = arith.constant 32 : index
    %c384_77 = arith.constant 384 : index
    %167 = vector.load %arg12[%c32_76, %c384_77] : memref<72x768xf32, #tpu.memory_space<vmem>>, vector<8x256xf32>
    tpu.vector_store %arg12[%c32_76, %c384_77], %165 {strides = array<i32>} : memref<72x768xf32, #tpu.memory_space<vmem>>, vector<8x256xf32>,
    %168 = vector.extract_strided_slice %158 {offsets = [24, 0], sizes = [8, 256], strides = [1, 1]} : vector<32x256xf32> to vector<8x256xf32>
    %c56 = arith.constant 56 : index
    %c0_78 = arith.constant 0 : index
    %169 = vector.load %arg12[%c56, %c0_78] : memref<72x768xf32, #tpu.memory_space<vmem>>, vector<8x256xf32>
    tpu.vector_store %arg12[%c56, %c0_78], %168 {strides = array<i32>} : memref<72x768xf32, #tpu.memory_space<vmem>>, vector<8x256xf32>,
    %c48 = arith.constant 48 : index
    %c384_79 = arith.constant 384 : index
    %170 = vector.load %arg12[%c48, %c384_79] : memref<72x768xf32, #tpu.memory_space<vmem>>, vector<8x256xf32>
    tpu.vector_store %arg12[%c48, %c384_79], %168 {strides = array<i32>} : memref<72x768xf32, #tpu.memory_space<vmem>>, vector<8x256xf32>,
    %171 = vector.broadcast %149 : vector<1x256xf32> to vector<32x256xf32>
    %172 = arith.mulf %100, %171 : vector<32x256xf32>
    %173 = vector.broadcast %152 : vector<1x256xf32> to vector<32x256xf32>
    %174 = arith.addf %172, %173 : vector<32x256xf32>
    %cst_80 = arith.constant 0.000000e+00 : f32
    %175 = vector.broadcast %cst_80 : f32 to vector<32x256xf32>
    %176 = arith.maximumf %174, %175 : vector<32x256xf32>
    %177 = vector.extract_strided_slice %176 {offsets = [0, 0], sizes = [8, 256], strides = [1, 1]} : vector<32x256xf32> to vector<8x256xf32>
    %c16_81 = arith.constant 16 : index
    %c0_82 = arith.constant 0 : index
    %178 = vector.load %arg12[%c16_81, %c0_82] : memref<72x768xf32, #tpu.memory_space<vmem>>, vector<8x256xf32>
    tpu.vector_store %arg12[%c16_81, %c0_82], %177 {strides = array<i32>} : memref<72x768xf32, #tpu.memory_space<vmem>>, vector<8x256xf32>,
    %c8_83 = arith.constant 8 : index
    %c384_84 = arith.constant 384 : index
    %179 = vector.load %arg12[%c8_83, %c384_84] : memref<72x768xf32, #tpu.memory_space<vmem>>, vector<8x256xf32>
    tpu.vector_store %arg12[%c8_83, %c384_84], %177 {strides = array<i32>} : memref<72x768xf32, #tpu.memory_space<vmem>>, vector<8x256xf32>,
    %180 = vector.extract_strided_slice %176 {offsets = [8, 0], sizes = [8, 256], strides = [1, 1]} : vector<32x256xf32> to vector<8x256xf32>
    %c32_85 = arith.constant 32 : index
    %c0_86 = arith.constant 0 : index
    %181 = vector.load %arg12[%c32_85, %c0_86] : memref<72x768xf32, #tpu.memory_space<vmem>>, vector<8x256xf32>
    tpu.vector_store %arg12[%c32_85, %c0_86], %180 {strides = array<i32>} : memref<72x768xf32, #tpu.memory_space<vmem>>, vector<8x256xf32>,
    %c24_87 = arith.constant 24 : index
    %c384_88 = arith.constant 384 : index
    %182 = vector.load %arg12[%c24_87, %c384_88] : memref<72x768xf32, #tpu.memory_space<vmem>>, vector<8x256xf32>
    tpu.vector_store %arg12[%c24_87, %c384_88], %180 {strides = array<i32>} : memref<72x768xf32, #tpu.memory_space<vmem>>, vector<8x256xf32>,
    %183 = vector.extract_strided_slice %176 {offsets = [16, 0], sizes = [8, 256], strides = [1, 1]} : vector<32x256xf32> to vector<8x256xf32>
    %c48_89 = arith.constant 48 : index
    %c0_90 = arith.constant 0 : index
    %184 = vector.load %arg12[%c48_89, %c0_90] : memref<72x768xf32, #tpu.memory_space<vmem>>, vector<8x256xf32>
    tpu.vector_store %arg12[%c48_89, %c0_90], %183 {strides = array<i32>} : memref<72x768xf32, #tpu.memory_space<vmem>>, vector<8x256xf32>,
    %c40_91 = arith.constant 40 : index
    %c384_92 = arith.constant 384 : index
    %185 = vector.load %arg12[%c40_91, %c384_92] : memref<72x768xf32, #tpu.memory_space<vmem>>, vector<8x256xf32>
    tpu.vector_store %arg12[%c40_91, %c384_92], %183 {strides = array<i32>} : memref<72x768xf32, #tpu.memory_space<vmem>>, vector<8x256xf32>,
    %186 = vector.extract_strided_slice %176 {offsets = [24, 0], sizes = [8, 256], strides = [1, 1]} : vector<32x256xf32> to vector<8x256xf32>
    %c64_93 = arith.constant 64 : index
    %c0_94 = arith.constant 0 : index
    %187 = vector.load %arg12[%c64_93, %c0_94] : memref<72x768xf32, #tpu.memory_space<vmem>>, vector<8x256xf32>
    tpu.vector_store %arg12[%c64_93, %c0_94], %186 {strides = array<i32>} : memref<72x768xf32, #tpu.memory_space<vmem>>, vector<8x256xf32>,
    %c56_95 = arith.constant 56 : index
    %c384_96 = arith.constant 384 : index
    %188 = vector.load %arg12[%c56_95, %c384_96] : memref<72x768xf32, #tpu.memory_space<vmem>>, vector<8x256xf32>
    tpu.vector_store %arg12[%c56_95, %c384_96], %186 {strides = array<i32>} : memref<72x768xf32, #tpu.memory_space<vmem>>, vector<8x256xf32>,
    %c0_97 = arith.constant 0 : index
    %c0_98 = arith.constant 0 : index
    %189 = vector.load %arg12[%c0_97, %c0_98] : memref<72x768xf32, #tpu.memory_space<vmem>>, vector<64x768xf32>
    %c0_99 = arith.constant 0 : index
    %c0_100 = arith.constant 0 : index
    %190 = vector.load %arg4[%c0_99, %c0_100] : memref<768x128xf32, #tpu.memory_space<vmem>>, vector<768x128xf32>
    %cst_101 = arith.constant dense<0.000000e+00> : vector<64x128xf32>
    %191 = tpu.matmul %189, %190, %cst_101 {dimension_numbers = #tpu.dot_dimension_numbers<[1], [0], [0], [1], [0, 0, 1, 1], [], []>} : vector<64x768xf32>, vector<768x128xf32>, vector<64x128xf32> -> vector<64x128xf32>
    %192 = math.tanh %191 : vector<64x128xf32>
    %c0_102 = arith.constant 0 : index
    %c0_103 = arith.constant 0 : index
    %193 = vector.load %arg10[%c0_102, %c0_103] : memref<128x128xf32, #tpu.memory_space<vmem>>, vector<64x128xf32>
    tpu.vector_store %arg10[%c0_102, %c0_103], %192 {strides = array<i32>} : memref<128x128xf32, #tpu.memory_space<vmem>>, vector<64x128xf32>,
    %c8_104 = arith.constant 8 : index
    %c0_105 = arith.constant 0 : index
    %194 = vector.load %arg12[%c8_104, %c0_105] : memref<72x768xf32, #tpu.memory_space<vmem>>, vector<64x768xf32>
    %c0_106 = arith.constant 0 : index
    %c0_107 = arith.constant 0 : index
    %195 = vector.load %arg5[%c0_106, %c0_107] : memref<768x128xf32, #tpu.memory_space<vmem>>, vector<768x128xf32>
    %cst_108 = arith.constant dense<0.000000e+00> : vector<64x128xf32>
    %196 = tpu.matmul %194, %195, %cst_108 {dimension_numbers = #tpu.dot_dimension_numbers<[1], [0], [0], [1], [0, 0, 1, 1], [], []>} : vector<64x768xf32>, vector<768x128xf32>, vector<64x128xf32> -> vector<64x128xf32>
    %197 = math.tanh %196 : vector<64x128xf32>
    %c64_109 = arith.constant 64 : index
    %c0_110 = arith.constant 0 : index
    %198 = vector.load %arg10[%c64_109, %c0_110] : memref<128x128xf32, #tpu.memory_space<vmem>>, vector<64x128xf32>
    tpu.vector_store %arg10[%c64_109, %c0_110], %197 {strides = array<i32>} : memref<128x128xf32, #tpu.memory_space<vmem>>, vector<64x128xf32>,
    return
  }
}

</mosaic_0001>

<bundles_post_ra>
// kernel: unet_generator_v2_forward.1
= control target key start
LH: loop header
LB: loop body
LE: loop exit
PB: predicated region body
PF: predicated region fallthrough
CT: control target
= control target key end

     0   :  { %15 = vsyncpa [#allocation5], 0  ;;  %s4041_s0 = inlined_call_operand.vmem [shape: f32[8,16], index: 0, kind: input, shape index: {}]   ;;  %s4042_s1 = inlined_call_operand.hbm [shape: f32[16,1024], index: 1, kind: input, shape index: {}]   ;;  %s4043_s2 = inlined_call_operand.hbm [shape: f32[768,256], index: 2, kind: input, shape index: {}]   ;;  %s4044_s3 = inlined_call_operand.hbm [shape: f32[768,256], index: 3, kind: input, shape index: {}]   ;;  %s4045_s4 = inlined_call_operand.hbm [shape: f32[768,128], index: 4, kind: input, shape index: {}]   ;;  %s4046_s5 = inlined_call_operand.hbm [shape: f32[768,128], index: 5, kind: input, shape index: {}]   ;;  %s4047_s6 = inlined_call_operand.vmem [shape: f32[1,64], index: 6, kind: input, shape index: {}]   ;;  %s4048_s7 = inlined_call_operand.vmem [shape: f32[1,64], index: 7, kind: input, shape index: {}]   ;;  %s4049_s8 = inlined_call_operand.vmem [shape: f32[1,32], index: 8, kind: input, shape index: {}]   ;;  %s4050_s9 = inlined_call_operand.vmem [shape: f32[1,32], index: 9, kind: input, shape index: {}]   ;;  %s4051_s10 = inlined_call_operand.vmem [shape: f32[128,128], index: 10, kind: output, shape index: {}]  }
   0x1   :  { %16 = vsyncpa [#allocation7], 0 }
   0x2   :  { %17 = vsyncpa [#allocation10], 0  ;;  %s3329_s13 = smov [#allocation6]  }
   0x3   :  { %s37_s14 = sshll.u32 %s3329_s13, 4  ;;  %s38_s14 = int_to_ptr.vmem [resolvable:$true] %s37_s14 }
   0x4   :  { %s3231_s15 = scalar_lea.vmem %s38_s14, 24576  ;;  %p3236_p1 = scmp.lt.s32.totalorder %s38_s14, %s38_s14 }
   0x5   :  { %p3232_p0 = scmp.ne.s32.totalorder %s38_s14, %s3231_s15  ;;  %p3237_p2 = scmp.lt.s32.totalorder %s3231_s15, %s3231_s15 }
   0x7   :  { %p3238_p3 = por %p3237_p2, %p3236_p1 }
   0x9   :  { %p3239_p4 = pnand %p3238_p3, %p3232_p0 }
   0xb   :  { %3242 = shalt.err (!%p3239_p4)
}
   0xc   :  { %s3330_s16 = smov 256   ;;  %s3331_s17 = smov 16  }
   0xd   :  { %43 = dma.hbm_to_vmem [thread:$0]  %s4043_s2, 24576, %s38_s14, [#allocation7], %s3330_s16, %s3330_s16, %s3331_s17  }
   0xe   :  { %s3332_s20 = smov [#allocation9]  }
   0xf   :  { %s61_s21 = sshll.u32 %s3332_s20, 4  ;;  %s62_s21 = int_to_ptr.vmem [resolvable:$true] %s61_s21 }
  0x10   :  { %s3251_s22 = scalar_lea.vmem %s62_s21, 12288  ;;  %p3256_p6 = scmp.lt.s32.totalorder %s62_s21, %s62_s21 }
  0x11   :  { %p3252_p5 = scmp.ne.s32.totalorder %s62_s21, %s3251_s22  ;;  %p3257_p7 = scmp.lt.s32.totalorder %s3251_s22, %s3251_s22 }
  0x13   :  { %p3258_p8 = por %p3257_p7, %p3256_p6 }
  0x15   :  { %p3259_p9 = pnand %p3258_p8, %p3252_p5 }
  0x17   :  { %3262 = shalt.err (!%p3259_p9)
}
  0x18   :  { %s3333_s23 = smov 128   ;;  %s3334_s24 = smov 8  }
  0x19   :  { %67 = dma.hbm_to_vmem [thread:$0]  %s4045_s4, 12288, %s62_s21, [#allocation10], %s3333_s23, %s3333_s23, %s3334_s24  }
  0x1a   :  { %s3335_s2 = smov [#allocation4]  }
  0x1b   :  { %s25_s27 = sshll.u32 %s3335_s2, 4  ;;  %s26_s27 = int_to_ptr.vmem [resolvable:$true] %s25_s27 }
  0x1c   :  { %s3271_s28 = scalar_lea.vmem %s26_s27, 2048  ;;  %p3276_p11 = scmp.lt.s32.totalorder %s26_s27, %s26_s27 }
  0x1d   :  { %p3272_p10 = scmp.ne.s32.totalorder %s26_s27, %s3271_s28  ;;  %p3277_p12 = scmp.lt.s32.totalorder %s3271_s28, %s3271_s28 }
  0x1f   :  { %p3278_p13 = por %p3277_p12, %p3276_p11 }
  0x21   :  { %p3279_p0 = pnand %p3278_p13, %p3272_p10 }
  0x23   :  { %3282 = shalt.err (!%p3279_p0)
}
  0x24   :  { %s3336_s29 = smov 1024   ;;  %s3337_s30 = smov 64  }
  0x25   :  { %31 = dma.hbm_to_vmem [thread:$0]  %s4042_s1, 2048, %s26_s27, [#allocation5], %s3336_s29, %s3336_s29, %s3337_s30  }
  0x26   :  { %s3338_s13 = smov [#allocation8]   ;;  %s3339_s4 = smov [#allocation11]  }
  0x27   :  { %s49_s14 = sshll.u32 %s3338_s13, 4  ;;  %s73_s15 = sshll.u32 %s3339_s4, 4  ;;  %s50_s14 = int_to_ptr.vmem [resolvable:$true] %s49_s14  ;;  %s74_s15 = int_to_ptr.vmem [resolvable:$true] %s73_s15 }
  0x28   :  { %s3291_s18 = scalar_lea.vmem %s50_s14, 24576  ;;  %p3296_p2 = scmp.lt.s32.totalorder %s50_s14, %s50_s14 }
  0x29   :  { %p3292_p1 = scmp.ne.s32.totalorder %s50_s14, %s3291_s18  ;;  %p3297_p3 = scmp.lt.s32.totalorder %s3291_s18, %s3291_s18 }
  0x2b   :  { %p3298_p4 = por %p3297_p3, %p3296_p2 }
  0x2d   :  { %p3299_p5 = pnand %p3298_p4, %p3292_p1 }
  0x2f   :  { %3302 = shalt.err (!%p3299_p5)
}
  0x30   :  { %55 = dma.hbm_to_vmem [thread:$0]  %s4044_s3, 24576, %s50_s14, [#allocation7], %s3330_s16, %s3330_s16, %s3331_s17  }
  0x31   :  { %s3311_s1 = scalar_lea.vmem %s74_s15, 12288  ;;  %p3316_p7 = scmp.lt.s32.totalorder %s74_s15, %s74_s15 }
  0x32   :  { %p3312_p6 = scmp.ne.s32.totalorder %s74_s15, %s3311_s1  ;;  %p3317_p8 = scmp.lt.s32.totalorder %s3311_s1, %s3311_s1 }
  0x34   :  { %p3318_p9 = por %p3317_p8, %p3316_p7 }
  0x36   :  { %p3319_p10 = pnand %p3318_p9, %p3312_p6 }
  0x38   :  { %3322 = shalt.err (!%p3319_p10)
}
  0x39   :  { %79 = dma.hbm_to_vmem [thread:$0]  %s4046_s5, 12288, %s74_s15, [#allocation10], %s3333_s23, %s3333_s23, %s3334_s24  }
  0x3a   :  { %3323 = dma.done.wait [#allocation5], 2048  }
  0x3b   :  { %3324 = vsyncadd [#allocation5], 4294965248 }
  0x3c   :  { %3325 = dma.done.wait [#allocation7], 49152  }
  0x3d   :  { %3326 = vsyncadd [#allocation7], 4294918144 }
  0x3e   :  { %3327 = dma.done.wait [#allocation10], 24576  }
  0x3f   :  { %3328 = vsyncadd [#allocation10], 4294942720  ;;  %v3340_v0 = vmov 0.0   ;;  %v149_v1 = vld [vmem:[#allocation4 + $0x48] sm:$0xff]  ;;  %v151_v2 = vld [vmem:[#allocation4 + $0x58] sm:$0xff]  ;;  %vm156_vm0 = vcmask 130048  }
  0x40   :  { %224 = vmatprep.mubr.f32.mxu0 %v3340_v0  ;;  %295 = vmatprep.mubr.f32.mxu1 %v3340_v0  ;;  %v148_v3 = vld [vmem:[#allocation4 + $0x40] sm:$0xff]  ;;  %v150_v4 = vld [vmem:[#allocation4 + $0x50] sm:$0xff]  ;;  %v141_v5 = vld [vmem:[#allocation4 + $0x8] sm:$0xff]  ;;  %vm593_vm1 = vcmask 523264   ;;  %s3342_s26 = smov 32   ;;  %vm1766_vm3 = vcmask 261120  }
  0x41   :  { %188 = vmatprep.subr.mxu0 %v149_v1  ;;  %259 = vmatprep.subr.mxu1 %v151_v2  ;;  %v143_v6 = vld [vmem:[#allocation4 + $0x18] sm:$0xff]  ;;  %v140_v7 = vld [vmem:[#allocation4] sm:$0xff]  ;;  %v142_v8 = vld [vmem:[#allocation4 + $0x10] sm:$0xff] }
  0x42   :  { %189 = vmatpush1.msra.mxu0 %v148_v3  ;;  %260 = vmatpush1.msra.mxu1 %v150_v4  ;;  %v139_v9 = vld [vmem:[%s4041_s0] sm:$0xff]  ;;  %v153_v10 = vld [vmem:[#allocation4 + $0x68] sm:$0xff]  ;;  %v155_v11 = vld [vmem:[#allocation4 + $0x78] sm:$0xff] }
  0x43   :  { %190 = vmatprep.subr.mxu0 %v141_v5  ;;  %261 = vmatprep.subr.mxu1 %v143_v6  ;;  %v152_v12 = vld [vmem:[#allocation4 + $0x60] sm:$0xff]  ;;  %v154_v13 = vld [vmem:[#allocation4 + $0x70] sm:$0xff]  ;;  %v145_v14 = vld [vmem:[#allocation4 + $0x28] sm:$0xff] }
  0x44   :  { %191 = vmatpush1.msra.mxu0 %v140_v7  ;;  %262 = vmatpush1.msra.mxu1 %v142_v8  ;;  %v147_v15 = vld [vmem:[#allocation4 + $0x38] sm:$0xff]  ;;  %v144_v16 = vld [vmem:[#allocation4 + $0x20] sm:$0xff]  ;;  %v146_v17 = vld [vmem:[#allocation4 + $0x30] sm:$0xff] }
  0x45   :  { %2832 = vmatmul.mubr.msk.f32.vlgmr.msra.gmra.mxu0 %vm156_vm0, %v139_v9  ;;  %2833 = vmatmul.mubr.msk.f32.vlgmr.msra.gmra.mxu1 %vm156_vm0, %v139_v9 }
  0x46   :  { %330 = vmatprep.subr.mxu0 %v153_v10  ;;  %401 = vmatprep.subr.mxu1 %v155_v11 }
  0x47   :  { %331 = vmatpush1.msra.mxu0 %v152_v12  ;;  %402 = vmatpush1.msra.mxu1 %v154_v13 }
  0x48   :  { %332 = vmatprep.subr.mxu0 %v145_v14  ;;  %403 = vmatprep.subr.mxu1 %v147_v15 }
  0x49   :  { %333 = vmatpush1.msra.mxu0 %v144_v16  ;;  %366 = vmatprep.mubr.f32.mxu0 %v3340_v0 }
  0x4a   :  { %404 = vmatpush1.msra.mxu1 %v146_v17  ;;  %437 = vmatprep.mubr.f32.mxu1 %v3340_v0 }
  0x4b   :  { %2834 = vmatmul.mubr.msk.f32.vlgmr.msra.gmra.mxu0 %vm156_vm0, %v139_v9  ;;  %2835 = vmatmul.mubr.msk.f32.vlgmr.msra.gmra.mxu1 %vm156_vm0, %v139_v9 }
  0x4c   :  { %945 = vmatprep.mubr.f32.mxu0 %v3340_v0 }
 0x105   :  { %v3438_v18 = vpop.f32.mrf.mxu0  ;;  %v3440_v19 = vpop.f32.mrf.mxu1 }
 0x106   :  { %v444_v20 = vrot.slane %v3438_v18, 4  ;;  %v504_v21 = vmul.f32 %v3438_v18, %v3438_v18  ;;  %v456_v22 = vrot.slane %v3440_v19, 4  ;;  %v506_v23 = vmul.f32 %v3440_v19, %v3440_v19 }
 0x107   :  { %v3448_v24 = vpop.f32.mrf.mxu0  ;;  %v3450_v25 = vpop.f32.mrf.mxu1 }
 0x108   :  { %v445_v26 = vadd.f32 %v444_v20, %v3438_v18  ;;  %v512_v27 = vrot.slane %v504_v21, 4  ;;  %v457_v28 = vadd.f32 %v456_v22, %v3440_v19  ;;  %v524_v29 = vrot.slane %v506_v23, 4 }
 0x109   :  { %v450_v30 = vrot.slane %v3448_v24, 4  ;;  %v505_v31 = vmul.f32 %v3448_v24, %v3448_v24  ;;  %v462_v32 = vrot.slane %v3450_v25, 4  ;;  %v507_v33 = vmul.f32 %v3450_v25, %v3450_v25 }
 0x10a   :  { %v446_v34 = vrot.slane %v445_v26, 2  ;;  %v3460_v35 = vadd.f32 %v512_v27, %v504_v21  ;;  %v458_v36 = vrot.slane %v457_v28, 2  ;;  %v3462_v37 = vadd.f32 %v524_v29, %v506_v23 }
 0x10b   :  { %v451_v38 = vadd.f32 %v450_v30, %v3448_v24  ;;  %v518_v39 = vrot.slane %v505_v31, 4  ;;  %v463_v40 = vadd.f32 %v462_v32, %v3450_v25  ;;  %v530_v41 = vrot.slane %v507_v33, 4  ;;  %v3466_v42 = vpop.f32.mrf.mxu0  ;;  %v3468_v43 = vpop.f32.mrf.mxu1 }
 0x10c   :  { %v447_v44 = vadd.f32 %v446_v34, %v445_v26  ;;  %v514_v45 = vrot.slane %v3460_v35, 2  ;;  %v468_v48 = vrot.slane %v3466_v42, 4  ;;  %v508_v49 = vmul.f32 %v3466_v42, %v3466_v42 }
 0x10d   :  { %v452_v46 = vrot.slane %v451_v38, 2  ;;  %v464_v47 = vrot.slane %v463_v40, 2  ;;  %v480_v50 = vrot.slane %v3468_v43, 4  ;;  %v510_v51 = vmul.f32 %v3468_v43, %v3468_v43  ;;  %v3477_v52 = vpop.f32.mrf.mxu0  ;;  %v3479_v53 = vpop.f32.mrf.mxu1 }
 0x10e   :  { %v459_v54 = vadd.f32 %v458_v36, %v457_v28  ;;  %v526_v55 = vrot.slane %v3462_v37, 2  ;;  %v519_v56 = vadd.f32 %v518_v39, %v505_v31  ;;  %v531_v57 = vadd.f32 %v530_v41, %v507_v33 }
 0x10f   :  { %v453_v58 = vadd.f32 %v452_v46, %v451_v38  ;;  %v469_v59 = vadd.f32 %v468_v48, %v3466_v42  ;;  %v536_v60 = vrot.slane %v508_v49, 4  ;;  %v481_v61 = vadd.f32 %v480_v50, %v3468_v43 }
 0x110   :  { %v474_v62 = vrot.slane %v3477_v52, 4  ;;  %v509_v63 = vmul.f32 %v3477_v52, %v3477_v52  ;;  %v486_v1 = vrot.slane %v3479_v53, 4  ;;  %v511_v2 = vmul.f32 %v3479_v53, %v3479_v53 }
 0x111   :  { %v465_v3 = vadd.f32 %v464_v47, %v463_v40  ;;  %v470_v4 = vrot.slane %v469_v59, 2  ;;  %v482_v5 = vrot.slane %v481_v61, 2  ;;  %v548_v6 = vrot.slane %v510_v51, 4 }
 0x112   :  { %v537_v7 = vadd.f32 %v536_v60, %v508_v49  ;;  %v475_v8 = vadd.f32 %v474_v62, %v3477_v52  ;;  %v542_v9 = vrot.slane %v509_v63, 4  ;;  %v487_v10 = vadd.f32 %v486_v1, %v3479_v53 }
 0x113   :  { %v520_v11 = vrot.slane %v519_v56, 2  ;;  %v532_v12 = vrot.slane %v531_v57, 2  ;;  %v471_v13 = vadd.f32 %v470_v4, %v469_v59  ;;  %v554_v14 = vrot.slane %v511_v2, 4 }
 0x114   :  { %v483_v15 = vadd.f32 %v482_v5, %v481_v61  ;;  %v476_v16 = vrot.slane %v475_v8, 2  ;;  %v543_v17 = vadd.f32 %v542_v9, %v509_v63  ;;  %v488_v20 = vrot.slane %v487_v10, 2 }
 0x115   :  { %v448_v21 = vrot.slane %v447_v44, 1  ;;  %v454_v22 = vrot.slane %v453_v58, 1  ;;  %v460_v23 = vrot.slane %v459_v54, 1  ;;  %v466_v26 = vrot.slane %v465_v3, 1 }
 0x116   :  { %v538_v27 = vrot.slane %v537_v7, 2  ;;  %v549_v28 = vadd.f32 %v548_v6, %v510_v51  ;;  %v477_v29 = vadd.f32 %v476_v16, %v475_v8  ;;  %v489_v30 = vadd.f32 %v488_v20, %v487_v10 }
 0x117   :  { %v544_v31 = vrot.slane %v543_v17, 2  ;;  %v555_v32 = vadd.f32 %v554_v14, %v511_v2  ;;  %v449_v33 = vadd.f32 %v448_v21, %v447_v44  ;;  %v455_v34 = vadd.f32 %v454_v22, %v453_v58 }
 0x118   :  { %v472_v36 = vrot.slane %v471_v13, 1  ;;  %v478_v38 = vrot.slane %v477_v29, 1  ;;  %v484_v39 = vrot.slane %v483_v15, 1  ;;  %v490_v40 = vrot.slane %v489_v30, 1 }
 0x119   :  { %v461_v41 = vadd.f32 %v460_v23, %v459_v54  ;;  %v467_v46 = vadd.f32 %v466_v26, %v465_v3  ;;  %v515_v47 = vadd.f32 %v514_v45, %v3460_v35  ;;  %v521_v48 = vadd.f32 %v520_v11, %v519_v56 }
 0x11a   :  { %v473_v49 = vadd.f32 %v472_v36, %v471_v13  ;;  %v479_v50 = vadd.f32 %v478_v38, %v477_v29  ;;  %v485_v59 = vadd.f32 %v484_v39, %v483_v15  ;;  %v491_v60 = vadd.f32 %v490_v40, %v489_v30  ;;  %v720_v30 = vld [vmem:[#allocation6 + $0xf8] sm:$0xff]  ;;  %v715_v36 = vld [vmem:[#allocation6 + $0xd0] sm:$0xff]  ;;  %v714_v38 = vld [vmem:[#allocation6 + $0xc8] sm:$0xff] }
 0x11b   :  { %v550_v51 = vrot.slane %v549_v28, 2  ;;  %v556_v61 = vrot.slane %v555_v32, 2  ;;  %v527_v62 = vadd.f32 %v526_v55, %v3462_v37  ;;  %v533_v63 = vadd.f32 %v532_v12, %v531_v57  ;;  %881 = vmatprep.subr.mxu0 %v720_v30  ;;  %v713_v39 = vld [vmem:[#allocation6 + $0xc0] sm:$0xff]  ;;  %v712_v40 = vld [vmem:[#allocation6 + $0xb8] sm:$0xff] }
 0x11c   :  { %v492_v44 = vadd.f32 %v473_v49, %v449_v33  ;;  %v493_v58 = vadd.f32 %v479_v50, %v455_v34  ;;  %v494_v1 = vadd.f32 %v485_v59, %v461_v41  ;;  %v495_v2 = vadd.f32 %v491_v60, %v467_v46  ;;  %v717_v33 = vld [vmem:[#allocation6 + $0xe0] sm:$0xff]  ;;  %v716_v34 = vld [vmem:[#allocation6 + $0xd8] sm:$0xff]  ;;  %v711_v41 = vld [vmem:[#allocation6 + $0xb0] sm:$0xff] }
 0x11d   :  { %v516_v4 = vrot.slane %v515_v47, 1  ;;  %v522_v5 = vrot.slane %v521_v48, 1  ;;  %v539_v6 = vadd.f32 %v538_v27, %v537_v7  ;;  %v545_v35 = vadd.f32 %v544_v31, %v543_v17  ;;  %v719_v31 = vld [vmem:[#allocation6 + $0xf0] sm:$0xff]  ;;  %v710_v46 = vld [vmem:[#allocation6 + $0xa8] sm:$0xff]  ;;  %v705_v59 = vld [vmem:[#allocation6 + $0x80] sm:$0xff] }
 0x11e   :  { %v496_v54 = vadd.f32 %v494_v1, %v492_v44  ;;  %v497_v3 = vadd.f32 %v495_v2, %v493_v58  ;;  %v528_v45 = vrot.slane %v527_v62, 1  ;;  %v534_v56 = vrot.slane %v533_v63, 1  ;;  %882 = vmatpush1.msra.mxu0 %v719_v31  ;;  %v707_v49 = vld [vmem:[#allocation6 + $0x90] sm:$0xff]  ;;  %v706_v50 = vld [vmem:[#allocation6 + $0x88] sm:$0xff]  ;;  %v704_v60 = vld [vmem:[#allocation6 + $0x78] sm:$0xff] }
 0x11f   :  { %v551_v8 = vadd.f32 %v550_v51, %v549_v28  ;;  %v557_v9 = vadd.f32 %v556_v61, %v555_v32  ;;  %v540_v11 = vrot.slane %v539_v6, 1  ;;  %v546_v13 = vrot.slane %v545_v35, 1  ;;  %v718_v32 = vld [vmem:[#allocation6 + $0xe8] sm:$0xff]  ;;  %v703_v51 = vld [vmem:[#allocation6 + $0x70] sm:$0xff]  ;;  %v700_v44 = vld [vmem:[#allocation6 + $0x58] sm:$0xff] }
 0x120   :  { %v3494_v10 = vadd.f32 %v497_v3, %v496_v54  ;;  %v517_v57 = vadd.f32 %v516_v4, %v515_v47  ;;  %v523_v12 = vadd.f32 %v522_v5, %v521_v48  ;;  %v529_v16 = vadd.f32 %v528_v45, %v527_v62  ;;  %883 = vmatprep.subr.mxu0 %v718_v32  ;;  %v709_v47 = vld [vmem:[#allocation6 + $0xa0] sm:$0xff]  ;;  %v708_v48 = vld [vmem:[#allocation6 + $0x98] sm:$0xff]  ;;  %v702_v61 = vld [vmem:[#allocation6 + $0x68] sm:$0xff] }
 0x121   :  { %v552_v37 = vrot.slane %v551_v8, 1  ;;  %v558_v55 = vrot.slane %v557_v9, 1  ;;  %v541_v14 = vadd.f32 %v540_v11, %v539_v6  ;;  %v547_v15 = vadd.f32 %v546_v13, %v545_v35  ;;  %884 = vmatpush1.msra.mxu0 %v717_v33  ;;  %v701_v62 = vld [vmem:[#allocation6 + $0x60] sm:$0xff]  ;;  %v783_v58 = vld [vmem:[#allocation6 + $0x2f0] sm:$0xff]  ;;  %v782_v2 = vld [vmem:[#allocation6 + $0x2e8] sm:$0xff] }
 0x122   :  { %500 = vrot.lane.b32.xlu0 %v3494_v10, %s3337_s30  ;;  %v535_v7 = vadd.f32 %v534_v56, %v533_v63  ;;  %885 = vmatprep.subr.mxu0 %v716_v34  ;;  %v784_v63 = vld [vmem:[#allocation6 + $0x2f8] sm:$0xff]  ;;  %v699_v1 = vld [vmem:[#allocation6 + $0x50] sm:$0xff]  ;;  %v781_v4 = vld [vmem:[#allocation6 + $0x2e0] sm:$0xff] }
 0x123   :  { %v553_v17 = vadd.f32 %v552_v37, %v551_v8  ;;  %v559_v20 = vadd.f32 %v558_v55, %v557_v9  ;;  %v560_v21 = vadd.f32 %v541_v14, %v517_v57  ;;  %v561_v22 = vadd.f32 %v547_v15, %v523_v12  ;;  %886 = vmatpush1.msra.mxu0 %v715_v36  ;;  %v698_v5 = vld [vmem:[#allocation6 + $0x48] sm:$0xff]  ;;  %v780_v54 = vld [vmem:[#allocation6 + $0x2d8] sm:$0xff]  ;;  %v697_v3 = vld [vmem:[#allocation6 + $0x40] sm:$0xff] }
 0x124   :  { %887 = vmatprep.subr.mxu0 %v714_v38  ;;  %970 = vmatprep.subr.mxu1 %v784_v63  ;;  %v779_v6 = vld [vmem:[#allocation6 + $0x2d0] sm:$0xff]  ;;  %v778_v35 = vld [vmem:[#allocation6 + $0x2c8] sm:$0xff]  ;;  %v696_v45 = vld [vmem:[#allocation6 + $0x38] sm:$0xff] }
 0x125   :  { %v562_v23 = vadd.f32 %v553_v17, %v529_v16  ;;  %v563_v26 = vadd.f32 %v559_v20, %v535_v7  ;;  %888 = vmatpush1.msra.mxu0 %v713_v39  ;;  %971 = vmatpush1.msra.mxu1 %v783_v58  ;;  %v777_v56 = vld [vmem:[#allocation6 + $0x2c0] sm:$0xff]  ;;  %v695_v8 = vld [vmem:[#allocation6 + $0x30] sm:$0xff]  ;;  %v776_v9 = vld [vmem:[#allocation6 + $0x2b8] sm:$0xff] }
 0x126   :  { %889 = vmatprep.subr.mxu0 %v712_v40  ;;  %972 = vmatprep.subr.mxu1 %v782_v2  ;;  %v694_v11 = vld [vmem:[#allocation6 + $0x28] sm:$0xff]  ;;  %v775_v13 = vld [vmem:[#allocation6 + $0x2b0] sm:$0xff]  ;;  %v693_v37 = vld [vmem:[#allocation6 + $0x20] sm:$0xff] }
 0x127   :  { %v564_v27 = vadd.f32 %v562_v23, %v560_v21  ;;  %v565_v28 = vadd.f32 %v563_v26, %v561_v22  ;;  %890 = vmatpush1.msra.mxu0 %v711_v41  ;;  %973 = vmatpush1.msra.mxu1 %v781_v4  ;;  %v774_v55 = vld [vmem:[#allocation6 + $0x2a8] sm:$0xff]  ;;  %v692_v57 = vld [vmem:[#allocation6 + $0x18] sm:$0xff]  ;;  %v773_v12 = vld [vmem:[#allocation6 + $0x2a0] sm:$0xff] }
 0x128   :  { %891 = vmatprep.subr.mxu0 %v710_v46  ;;  %974 = vmatprep.subr.mxu1 %v780_v54  ;;  %v691_v14 = vld [vmem:[#allocation6 + $0x10] sm:$0xff]  ;;  %v772_v15 = vld [vmem:[#allocation6 + $0x298] sm:$0xff]  ;;  %v690_v16 = vld [vmem:[#allocation6 + $0x8] sm:$0xff] }
 0x129   :  { %v3498_v29 = vadd.f32 %v565_v28, %v564_v27  ;;  %892 = vmatpush1.msra.mxu0 %v709_v47  ;;  %975 = vmatpush1.msra.mxu1 %v779_v6  ;;  %v771_v7 = vld [vmem:[#allocation6 + $0x290] sm:$0xff]  ;;  %v689_v17 = vld [vmem:[#allocation6] sm:$0xff]  ;;  %v770_v20 = vld [vmem:[#allocation6 + $0x288] sm:$0xff] }
 0x12a   :  { %893 = vmatprep.subr.mxu0 %v708_v48  ;;  %976 = vmatprep.subr.mxu1 %v778_v35  ;;  %v752_v21 = vld [vmem:[#allocation6 + $0x1f8] sm:$0xff]  ;;  %v769_v22 = vld [vmem:[#allocation6 + $0x280] sm:$0xff]  ;;  %v751_v23 = vld [vmem:[#allocation6 + $0x1f0] sm:$0xff] }
 0x12b   :  { %568 = vrot.lane.b32.xlu0 %v3498_v29, %s3337_s30  ;;  %894 = vmatpush1.msra.mxu0 %v707_v49  ;;  %v768_v26 = vld [vmem:[#allocation6 + $0x278] sm:$0xff]  ;;  %v750_v27 = vld [vmem:[#allocation6 + $0x1e8] sm:$0xff]  ;;  %v767_v28 = vld [vmem:[#allocation6 + $0x270] sm:$0xff] }
 0x12c   :  { %895 = vmatprep.subr.mxu0 %v706_v50  ;;  %977 = vmatpush1.msra.mxu1 %v777_v56  ;;  %v749_v30 = vld [vmem:[#allocation6 + $0x1e0] sm:$0xff]  ;;  %v766_v31 = vld [vmem:[#allocation6 + $0x268] sm:$0xff]  ;;  %v748_v32 = vld [vmem:[#allocation6 + $0x1d8] sm:$0xff] }
 0x12d   :  { %896 = vmatpush1.msra.mxu0 %v705_v59  ;;  %978 = vmatprep.subr.mxu1 %v776_v9  ;;  %v765_v33 = vld [vmem:[#allocation6 + $0x260] sm:$0xff]  ;;  %v747_v34 = vld [vmem:[#allocation6 + $0x1d0] sm:$0xff]  ;;  %v764_v36 = vld [vmem:[#allocation6 + $0x258] sm:$0xff] }
 0x12e   :  { %897 = vmatprep.subr.mxu0 %v704_v60  ;;  %979 = vmatpush1.msra.mxu1 %v775_v13  ;;  %v746_v38 = vld [vmem:[#allocation6 + $0x1c8] sm:$0xff]  ;;  %v763_v39 = vld [vmem:[#allocation6 + $0x250] sm:$0xff]  ;;  %v745_v40 = vld [vmem:[#allocation6 + $0x1c0] sm:$0xff] }
 0x12f   :  { %898 = vmatpush1.msra.mxu0 %v703_v51  ;;  %980 = vmatprep.subr.mxu1 %v774_v55  ;;  %v762_v41 = vld [vmem:[#allocation6 + $0x248] sm:$0xff]  ;;  %v744_v46 = vld [vmem:[#allocation6 + $0x1b8] sm:$0xff]  ;;  %v761_v47 = vld [vmem:[#allocation6 + $0x240] sm:$0xff] }
 0x130   :  { %899 = vmatprep.subr.mxu0 %v702_v61  ;;  %981 = vmatpush1.msra.mxu1 %v773_v12  ;;  %v743_v48 = vld [vmem:[#allocation6 + $0x1b0] sm:$0xff]  ;;  %v760_v49 = vld [vmem:[#allocation6 + $0x238] sm:$0xff]  ;;  %v742_v50 = vld [vmem:[#allocation6 + $0x1a8] sm:$0xff] }
 0x131   :  { %900 = vmatpush1.msra.mxu0 %v701_v62  ;;  %982 = vmatprep.subr.mxu1 %v772_v15  ;;  %v759_v59 = vld [vmem:[#allocation6 + $0x230] sm:$0xff]  ;;  %v741_v60 = vld [vmem:[#allocation6 + $0x1a0] sm:$0xff]  ;;  %v758_v51 = vld [vmem:[#allocation6 + $0x228] sm:$0xff] }
 0x132   :  { %901 = vmatprep.subr.mxu0 %v700_v44  ;;  %983 = vmatpush1.msra.mxu1 %v771_v7  ;;  %v740_v61 = vld [vmem:[#allocation6 + $0x198] sm:$0xff]  ;;  %v757_v62 = vld [vmem:[#allocation6 + $0x220] sm:$0xff]  ;;  %v739_v63 = vld [vmem:[#allocation6 + $0x190] sm:$0xff] }
 0x133   :  { %902 = vmatpush1.msra.mxu0 %v699_v1  ;;  %984 = vmatprep.subr.mxu1 %v770_v20  ;;  %v756_v44 = vld [vmem:[#allocation6 + $0x218] sm:$0xff]  ;;  %v738_v58 = vld [vmem:[#allocation6 + $0x188] sm:$0xff]  ;;  %v755_v1 = vld [vmem:[#allocation6 + $0x210] sm:$0xff] }
 0x134   :  { %903 = vmatprep.subr.mxu0 %v698_v5  ;;  %985 = vmatpush1.msra.mxu1 %v769_v22  ;;  %v737_v2 = vld [vmem:[#allocation6 + $0x180] sm:$0xff]  ;;  %v754_v4 = vld [vmem:[#allocation6 + $0x208] sm:$0xff]  ;;  %v736_v5 = vld [vmem:[#allocation6 + $0x178] sm:$0xff] }
 0x135   :  { %904 = vmatpush1.msra.mxu0 %v697_v3  ;;  %986 = vmatprep.subr.mxu1 %v768_v26  ;;  %v753_v54 = vld [vmem:[#allocation6 + $0x200] sm:$0xff]  ;;  %v735_v3 = vld [vmem:[#allocation6 + $0x170] sm:$0xff]  ;;  %v816_v6 = vld [vmem:[#allocation6 + $0x3f8] sm:$0xff] }
 0x136   :  { %905 = vmatprep.subr.mxu0 %v696_v45  ;;  %987 = vmatpush1.msra.mxu1 %v767_v28  ;;  %v734_v35 = vld [vmem:[#allocation6 + $0x168] sm:$0xff]  ;;  %v815_v45 = vld [vmem:[#allocation6 + $0x3f0] sm:$0xff]  ;;  %v733_v56 = vld [vmem:[#allocation6 + $0x160] sm:$0xff] }
 0x137   :  { %906 = vmatpush1.msra.mxu0 %v695_v8  ;;  %988 = vmatprep.subr.mxu1 %v766_v31  ;;  %v814_v8 = vld [vmem:[#allocation6 + $0x3e8] sm:$0xff]  ;;  %v732_v9 = vld [vmem:[#allocation6 + $0x158] sm:$0xff]  ;;  %v731_v13 = vld [vmem:[#allocation6 + $0x150] sm:$0xff] }
 0x138   :  { %907 = vmatprep.subr.mxu0 %v694_v11  ;;  %989 = vmatpush1.msra.mxu1 %v765_v33  ;;  %v813_v11 = vld [vmem:[#allocation6 + $0x3e0] sm:$0xff]  ;;  %v730_v55 = vld [vmem:[#allocation6 + $0x148] sm:$0xff]  ;;  %v728_v15 = vld [vmem:[#allocation6 + $0x138] sm:$0xff] }
 0x139   :  { %908 = vmatpush1.msra.mxu0 %v693_v37  ;;  %990 = vmatprep.subr.mxu1 %v764_v36  ;;  %v812_v37 = vld [vmem:[#allocation6 + $0x3d8] sm:$0xff]  ;;  %v729_v12 = vld [vmem:[#allocation6 + $0x140] sm:$0xff]  ;;  %v727_v7 = vld [vmem:[#allocation6 + $0x130] sm:$0xff] }
 0x13a   :  { %909 = vmatprep.subr.mxu0 %v692_v57  ;;  %991 = vmatpush1.msra.mxu1 %v763_v39  ;;  %v811_v57 = vld [vmem:[#allocation6 + $0x3d0] sm:$0xff]  ;;  %v726_v20 = vld [vmem:[#allocation6 + $0x128] sm:$0xff]  ;;  %v725_v22 = vld [vmem:[#allocation6 + $0x120] sm:$0xff] }
 0x13b   :  { %910 = vmatpush1.msra.mxu0 %v691_v14  ;;  %992 = vmatprep.subr.mxu1 %v762_v41  ;;  %v810_v14 = vld [vmem:[#allocation6 + $0x3c8] sm:$0xff]  ;;  %v724_v26 = vld [vmem:[#allocation6 + $0x118] sm:$0xff]  ;;  %v723_v28 = vld [vmem:[#allocation6 + $0x110] sm:$0xff] }
 0x13c   :  { %911 = vmatprep.subr.mxu0 %v690_v16  ;;  %993 = vmatpush1.msra.mxu1 %v761_v47  ;;  %v809_v16 = vld [vmem:[#allocation6 + $0x3c0] sm:$0xff]  ;;  %v722_v31 = vld [vmem:[#allocation6 + $0x108] sm:$0xff]  ;;  %v848_v36 = vld [vmem:[#allocation6 + $0x4f8] sm:$0xff] }
 0x13d   :  { %912 = vmatpush1.msra.mxu0 %v689_v17  ;;  %994 = vmatprep.subr.mxu1 %v760_v49  ;;  %v808_v17 = vld [vmem:[#allocation6 + $0x3b8] sm:$0xff]  ;;  %v721_v33 = vld [vmem:[#allocation6 + $0x100] sm:$0xff]  ;;  %v799_v47 = vld [vmem:[#allocation6 + $0x370] sm:$0xff] }
 0x13e   :  { %913 = vmatprep.subr.mxu0 %v752_v21  ;;  %995 = vmatpush1.msra.mxu1 %v759_v59  ;;  %v807_v21 = vld [vmem:[#allocation6 + $0x3b0] sm:$0xff]  ;;  %v801_v39 = vld [vmem:[#allocation6 + $0x380] sm:$0xff]  ;;  %v800_v41 = vld [vmem:[#allocation6 + $0x378] sm:$0xff] }
 0x13f   :  { %914 = vmatpush2.msra.mxu0 %v751_v23  ;;  %996 = vmatprep.subr.mxu1 %v758_v51  ;;  %v806_v23 = vld [vmem:[#allocation6 + $0x3a8] sm:$0xff]  ;;  %v840_v51 = vld [vmem:[#allocation6 + $0x4b8] sm:$0xff] }
 0x140   :  { %915 = vmatprep.subr.mxu0 %v750_v27  ;;  %997 = vmatpush1.msra.mxu1 %v757_v62  ;;  %v805_v27 = vld [vmem:[#allocation6 + $0x3a0] sm:$0xff]  ;;  %v798_v49 = vld [vmem:[#allocation6 + $0x368] sm:$0xff] }
 0x141   :  { %916 = vmatpush2.msra.mxu0 %v749_v30  ;;  %998 = vmatprep.subr.mxu1 %v756_v44  ;;  %v804_v30 = vld [vmem:[#allocation6 + $0x398] sm:$0xff]  ;;  %v842_v59 = vld [vmem:[#allocation6 + $0x4c8] sm:$0xff] }
 0x142   :  { %917 = vmatprep.subr.mxu0 %v748_v32  ;;  %999 = vmatpush1.msra.mxu1 %v755_v1  ;;  %v803_v32 = vld [vmem:[#allocation6 + $0x390] sm:$0xff]  ;;  %v838_v62 = vld [vmem:[#allocation6 + $0x4a8] sm:$0xff]  ;;  %v836_v44 = vld [vmem:[#allocation6 + $0x498] sm:$0xff] }
 0x143   :  { %918 = vmatpush2.msra.mxu0 %v747_v34  ;;  %1000 = vmatprep.subr.mxu1 %v754_v4  ;;  %v802_v34 = vld [vmem:[#allocation6 + $0x388] sm:$0xff]  ;;  %v832_v4 = vld [vmem:[#allocation6 + $0x478] sm:$0xff] }
 0x144   :  { %919 = vmatprep.subr.mxu0 %v746_v38  ;;  %1001 = vmatpush1.msra.mxu1 %v753_v54  ;;  %v847_v38 = vld [vmem:[#allocation6 + $0x4f0] sm:$0xff]  ;;  %v834_v1 = vld [vmem:[#allocation6 + $0x488] sm:$0xff] }
 0x145   :  { %920 = vmatpush2.msra.mxu0 %v745_v40  ;;  %1002 = vmatprep.subr.mxu1 %v816_v6  ;;  %v846_v40 = vld [vmem:[#allocation6 + $0x4e8] sm:$0xff]  ;;  %v828_v6 = vld [vmem:[#allocation6 + $0x458] sm:$0xff] }
 0x146   :  { %921 = vmatprep.subr.mxu0 %v744_v46  ;;  %1003 = vmatpush2.msra.mxu1 %v815_v45  ;;  %v845_v46 = vld [vmem:[#allocation6 + $0x4e0] sm:$0xff]  ;;  %v830_v54 = vld [vmem:[#allocation6 + $0x468] sm:$0xff] }
 0x147   :  { %922 = vmatpush2.msra.mxu0 %v743_v48  ;;  %1004 = vmatprep.subr.mxu1 %v814_v8  ;;  %v844_v48 = vld [vmem:[#allocation6 + $0x4d8] sm:$0xff]  ;;  %v826_v45 = vld [vmem:[#allocation6 + $0x448] sm:$0xff] }
 0x148   :  { %923 = vmatprep.subr.mxu0 %v742_v50  ;;  %1005 = vmatpush2.msra.mxu1 %v813_v11  ;;  %v843_v50 = vld [vmem:[#allocation6 + $0x4d0] sm:$0xff]  ;;  %v824_v8 = vld [vmem:[#allocation6 + $0x438] sm:$0xff] }
 0x149   :  { %924 = vmatpush2.msra.mxu0 %v741_v60  ;;  %1006 = vmatprep.subr.mxu1 %v812_v37  ;;  %v841_v60 = vld [vmem:[#allocation6 + $0x4c0] sm:$0xff]  ;;  %v823_v11 = vld [vmem:[#allocation6 + $0x430] sm:$0xff] }
 0x14a   :  { %925 = vmatprep.subr.mxu0 %v740_v61  ;;  %1007 = vmatpush2.msra.mxu1 %v811_v57  ;;  %v839_v61 = vld [vmem:[#allocation6 + $0x4b0] sm:$0xff]  ;;  %v821_v37 = vld [vmem:[#allocation6 + $0x420] sm:$0xff]  ;;  %v820_v57 = vld [vmem:[#allocation6 + $0x418] sm:$0xff] }
 0x14b   :  { %926 = vmatpush2.msra.mxu0 %v739_v63  ;;  %1008 = vmatprep.subr.mxu1 %v810_v14  ;;  %v837_v63 = vld [vmem:[#allocation6 + $0x4a0] sm:$0xff]  ;;  %v818_v14 = vld [vmem:[#allocation6 + $0x408] sm:$0xff] }
 0x14c   :  { %927 = vmatprep.subr.mxu0 %v738_v58  ;;  %1009 = vmatpush2.msra.mxu1 %v809_v16  ;;  %v835_v58 = vld [vmem:[#allocation6 + $0x490] sm:$0xff] }
 0x14d   :  { %928 = vmatpush2.msra.mxu0 %v737_v2  ;;  %1010 = vmatprep.subr.mxu1 %v808_v17  ;;  %v833_v2 = vld [vmem:[#allocation6 + $0x480] sm:$0xff] }
 0x14e   :  { %929 = vmatprep.subr.mxu0 %v736_v5  ;;  %1011 = vmatpush2.msra.mxu1 %v807_v21  ;;  %v831_v5 = vld [vmem:[#allocation6 + $0x470] sm:$0xff] }
 0x14f   :  { %930 = vmatpush2.msra.mxu0 %v735_v3  ;;  %1012 = vmatprep.subr.mxu1 %v806_v23  ;;  %v829_v3 = vld [vmem:[#allocation6 + $0x460] sm:$0xff] }
 0x150   :  { %931 = vmatprep.subr.mxu0 %v734_v35  ;;  %1013 = vmatpush2.msra.mxu1 %v805_v27  ;;  %v827_v35 = vld [vmem:[#allocation6 + $0x450] sm:$0xff]  ;;  %v876_v27 = vld [vmem:[#allocation6 + $0x5d8] sm:$0xff] }
 0x151   :  { %932 = vmatpush2.msra.mxu0 %v733_v56  ;;  %1014 = vmatprep.subr.mxu1 %v804_v30  ;;  %v825_v56 = vld [vmem:[#allocation6 + $0x440] sm:$0xff] }
 0x152   :  { %933 = vmatprep.subr.mxu0 %v732_v9  ;;  %1015 = vmatpush2.msra.mxu1 %v803_v32 }
 0x153   :  { %934 = vmatpush2.msra.mxu0 %v731_v13  ;;  %1016 = vmatprep.subr.mxu1 %v802_v34  ;;  %v822_v13 = vld [vmem:[#allocation6 + $0x428] sm:$0xff]  ;;  %v797_v34 = vld [vmem:[#allocation6 + $0x360] sm:$0xff] }
 0x154   :  { %935 = vmatprep.subr.mxu0 %v730_v55  ;;  %1017 = vmatpush2.msra.mxu1 %v801_v39  ;;  %v872_v39 = vld [vmem:[#allocation6 + $0x5b8] sm:$0xff] }
 0x155   :  { %936 = vmatpush2.msra.mxu0 %v729_v12  ;;  %1018 = vmatprep.subr.mxu1 %v800_v41  ;;  %v819_v12 = vld [vmem:[#allocation6 + $0x410] sm:$0xff] }
 0x156   :  { %937 = vmatprep.subr.mxu0 %v728_v15  ;;  %1019 = vmatpush2.msra.mxu1 %v799_v47  ;;  %v817_v15 = vld [vmem:[#allocation6 + $0x400] sm:$0xff]  ;;  %v871_v41 = vld [vmem:[#allocation6 + $0x5b0] sm:$0xff]  ;;  %v794_v47 = vld [vmem:[#allocation6 + $0x348] sm:$0xff] }
 0x157   :  { %938 = vmatpush2.msra.mxu0 %v727_v7  ;;  %1020 = vmatprep.subr.mxu1 %v798_v49  ;;  %v880_v7 = vld [vmem:[#allocation6 + $0x5f8] sm:$0xff]  ;;  %v578_v49 = vld [vmem:[%s4047_s6] sm:$0x1] }
 0x158   :  { %939 = vmatprep.subr.mxu0 %v726_v20  ;;  %v879_v20 = vld [vmem:[#allocation6 + $0x5f0] sm:$0xff]  ;;  %1021 = vmatpush2.msra.mxu1 %v797_v34 }
 0x159   :  { %940 = vmatpush2.msra.mxu0 %v725_v22  ;;  %v878_v22 = vld [vmem:[#allocation6 + $0x5e8] sm:$0xff] }
 0x15a   :  { %941 = vmatprep.subr.mxu0 %v724_v26 }
 0x15b   :  { %942 = vmatpush2.msra.mxu0 %v723_v28  ;;  %v875_v28 = vld [vmem:[#allocation6 + $0x5d0] sm:$0xff] }
 0x15c   :  { %943 = vmatprep.subr.mxu0 %v722_v31  ;;  %v874_v31 = vld [vmem:[#allocation6 + $0x5c8] sm:$0xff] }
 0x15d   :  { %944 = vmatpush2.msra.mxu0 %v721_v33  ;;  %v586_v33 = vlaneseq }
 0x15e   :  { %1059 = vmatprep.subr.mxu0 %v848_v36  ;;  %946 = vmatmul.mubr.f32.vlgmr.msra.gmra.mxu0 %v3340_v0  ;;  %v873_v36 = vld [vmem:[#allocation6 + $0x5c0] sm:$0xff] }
 0x15f   :  { %1060 = vmatpush1.msra.mxu0 %v847_v38  ;;  %v796_v38 = vld [vmem:[#allocation6 + $0x358] sm:$0xff] }
 0x160   :  { %1061 = vmatprep.subr.mxu0 %v846_v40  ;;  %v795_v40 = vld [vmem:[#allocation6 + $0x350] sm:$0xff]  ;;  %1022 = vmatprep.subr.mxu1 %v796_v38 }
 0x161   :  { %1062 = vmatpush1.msra.mxu0 %v845_v46  ;;  %v3509_v46 = vshrl.u32 %v586_v33, 7  ;;  %1023 = vmatpush2.msra.mxu1 %v795_v40 }
 0x162   :  { %1063 = vmatprep.subr.mxu0 %v844_v48  ;;  %v870_v48 = vld [vmem:[#allocation6 + $0x5a8] sm:$0xff]  ;;  %1024 = vmatprep.subr.mxu1 %v794_v47 }
 0x163   :  { %1064 = vmatpush1.msra.mxu0 %v843_v50  ;;  %v793_v50 = vld [vmem:[#allocation6 + $0x340] sm:$0xff]  ;;  %vm638_vm2 = vcmp.lt.s32.totalorder %v3509_v46, 2 }
 0x164   :  { %1065 = vmatprep.subr.mxu0 %v842_v59  ;;  %v869_v59 = vld [vmem:[#allocation6 + $0x5a0] sm:$0xff]  ;;  %1025 = vmatpush2.msra.mxu1 %v793_v50 }
 0x165   :  { %1066 = vmatpush1.msra.mxu0 %v841_v60  ;;  %v792_v60 = vld [vmem:[#allocation6 + $0x338] sm:$0xff] }
 0x166   :  { %1067 = vmatprep.subr.mxu0 %v840_v51  ;;  %v868_v51 = vld [vmem:[#allocation6 + $0x598] sm:$0xff]  ;;  %1026 = vmatprep.subr.mxu1 %v792_v60 }
 0x167   :  { %1068 = vmatpush1.msra.mxu0 %v839_v61  ;;  %v791_v61 = vld [vmem:[#allocation6 + $0x330] sm:$0xff] }
 0x168   :  { %1069 = vmatprep.subr.mxu0 %v838_v62  ;;  %v867_v62 = vld [vmem:[#allocation6 + $0x590] sm:$0xff]  ;;  %1027 = vmatpush2.msra.mxu1 %v791_v61 }
 0x169   :  { %1070 = vmatpush1.msra.mxu0 %v837_v63  ;;  %v3515_v63 = vsub.s32 0, %v3509_v46 }
 0x16a   :  { %1071 = vmatprep.subr.mxu0 %v836_v44  ;;  %v790_v44 = vld [vmem:[#allocation6 + $0x328] sm:$0xff] }
 0x16b   :  { %1072 = vmatpush1.msra.mxu0 %v835_v58  ;;  %v866_v58 = vld [vmem:[#allocation6 + $0x588] sm:$0xff]  ;;  %1028 = vmatprep.subr.mxu1 %v790_v44 }
 0x16c   :  { %1073 = vmatprep.subr.mxu0 %v834_v1  ;;  %v789_v1 = vld [vmem:[#allocation6 + $0x320] sm:$0xff] }
 0x16d   :  { %1074 = vmatpush1.msra.mxu0 %v833_v2  ;;  %1029 = vmatpush2.msra.mxu1 %v789_v1 }
 0x16e   :  { %1075 = vmatprep.subr.mxu0 %v832_v4  ;;  %v865_v4 = vld [vmem:[#allocation6 + $0x580] sm:$0xff] }
 0x16f   :  { %1076 = vmatpush1.msra.mxu0 %v831_v5  ;;  %v788_v5 = vld [vmem:[#allocation6 + $0x318] sm:$0xff] }
 0x170   :  { %1077 = vmatprep.subr.mxu0 %v830_v54  ;;  %v864_v54 = vld [vmem:[#allocation6 + $0x578] sm:$0xff]  ;;  %1030 = vmatprep.subr.mxu1 %v788_v5 }
 0x171   :  { %1078 = vmatpush1.msra.mxu0 %v829_v3 }
 0x172   :  { %1079 = vmatprep.subr.mxu0 %v828_v6  ;;  %v787_v6 = vld [vmem:[#allocation6 + $0x310] sm:$0xff] }
 0x173   :  { %1080 = vmatpush1.msra.mxu0 %v827_v35  ;;  %v863_v35 = vld [vmem:[#allocation6 + $0x570] sm:$0xff]  ;;  %1031 = vmatpush2.msra.mxu1 %v787_v6 }
 0x174   :  { %1081 = vmatprep.subr.mxu0 %v826_v45  ;;  %v582_v45 = vld [vmem:[%s4048_s7] sm:$0x1]  ;;  %s3341_s7 = smov 96  }
 0x175   :  { %1082 = vmatpush1.msra.mxu0 %v825_v56  ;;  %v786_v56 = vld [vmem:[#allocation6 + $0x308] sm:$0xff] }
 0x176   :  { %1083 = vmatprep.subr.mxu0 %v824_v8  ;;  %1032 = vmatprep.subr.mxu1 %v786_v56 }
 0x177   :  { %1084 = vmatpush1.msra.mxu0 %v823_v11  ;;  %v862_v11 = vld [vmem:[#allocation6 + $0x568] sm:$0xff] }
 0x178   :  { %1085 = vmatprep.subr.mxu0 %v822_v13  ;;  %v785_v13 = vld [vmem:[#allocation6 + $0x300] sm:$0xff] }
 0x179   :  { %1086 = vmatpush1.msra.mxu0 %v821_v37  ;;  %v861_v37 = vld [vmem:[#allocation6 + $0x560] sm:$0xff]  ;;  %1033 = vmatpush2.msra.mxu1 %v785_v13 }
 0x17a   :  { %1087 = vmatprep.subr.mxu0 %v820_v57  ;;  %v860_v57 = vld [vmem:[#allocation6 + $0x558] sm:$0xff] }
 0x17b   :  { %1088 = vmatpush1.msra.mxu0 %v819_v12  ;;  %v1203_v12 = vld [vmem:[#allocation8 + $0xf8] sm:$0xff] }
 0x17c   :  { %1089 = vmatprep.subr.mxu0 %v818_v14  ;;  %v859_v14 = vld [vmem:[#allocation6 + $0x550] sm:$0xff]  ;;  %1364 = vmatprep.subr.mxu1 %v1203_v12 }
 0x17d   :  { %1090 = vmatpush1.msra.mxu0 %v817_v15  ;;  %v1190_v12 = vld [vmem:[#allocation8 + $0x90] sm:$0xff] }
 0x17e   :  { %1091 = vmatprep.subr.mxu0 %v880_v7  ;;  %v857_v7 = vld [vmem:[#allocation6 + $0x540] sm:$0xff] }
 0x17f   :  { %1092 = vmatpush2.msra.mxu0 %v879_v20  ;;  %v855_v20 = vld [vmem:[#allocation6 + $0x530] sm:$0xff] }
 0x180   :  { %1093 = vmatprep.subr.mxu0 %v878_v22  ;;  %v853_v22 = vld [vmem:[#allocation6 + $0x520] sm:$0xff] }
 0x194   :  { %v501_v9 = vpop.permute.xlu0 %500 }
 0x195   :  { %v503_v55 = vadd.f32 %v501_v9, %v3494_v10  ;;  %v877_v10 = vld [vmem:[#allocation6 + $0x5e0] sm:$0xff] }
 0x196   :  { %1094 = vmatpush2.msra.mxu0 %v877_v10  ;;  %v852_v10 = vld [vmem:[#allocation6 + $0x518] sm:$0xff] }
 0x197   :  { %v3504_v16 = vmul.f32 0.03125, %v503_v55  ;;  %1095 = vmatprep.subr.mxu0 %v876_v27  ;;  %v849_v27 = vld [vmem:[#allocation6 + $0x500] sm:$0xff] }
 0x198   :  { %1096 = vmatpush2.msra.mxu0 %v875_v28  ;;  %v1267_v28 = vld [vmem:[#allocation8 + $0x2f8] sm:$0xff] }
 0x199   :  { %v575_v23 = vmul.f32 %v3504_v16, %v3504_v16  ;;  %1097 = vmatprep.subr.mxu0 %v874_v31 }
 0x19a   :  { %1098 = vmatpush2.msra.mxu0 %v873_v36 }
 0x19b   :  { %1099 = vmatprep.subr.mxu0 %v872_v39 }
 0x19c   :  { %1100 = vmatpush2.msra.mxu0 %v871_v41 }
 0x19d   :  { %v569_v17 = vpop.permute.xlu0 %568  ;;  %1101 = vmatprep.subr.mxu0 %v870_v48 }
 0x19e   :  { %v571_v21 = vadd.f32 %v569_v17, %v3498_v29  ;;  %1102 = vmatpush2.msra.mxu0 %v869_v59  ;;  %v856_v17 = vld [vmem:[#allocation6 + $0x538] sm:$0xff] }
 0x19f   :  { %1103 = vmatprep.subr.mxu0 %v868_v51 }
 0x1a0   :  { %v574_v26 = vmul.f32 0.03125, %v571_v21  ;;  %1104 = vmatpush2.msra.mxu0 %v867_v62  ;;  %v854_v21 = vld [vmem:[#allocation6 + $0x528] sm:$0xff]  ;;  %v1202_v62 = vld [vmem:[#allocation8 + $0xf0] sm:$0xff] }
 0x1a1   :  { %1105 = vmatprep.subr.mxu0 %v866_v58  ;;  %v1201_v58 = vld [vmem:[#allocation8 + $0xe8] sm:$0xff] }
 0x1a2   :  { %v576_v30 = vsub.f32 %v574_v26, %v575_v23  ;;  %1106 = vmatpush2.msra.mxu0 %v865_v4  ;;  %v851_v23 = vld [vmem:[#allocation6 + $0x510] sm:$0xff]  ;;  %v850_v26 = vld [vmem:[#allocation6 + $0x508] sm:$0xff]  ;;  %v1200_v4 = vld [vmem:[#allocation8 + $0xe0] sm:$0xff] }
 0x1a3   :  { %1107 = vmatprep.subr.mxu0 %v864_v54 }
 0x1a4   :  { %v577_v32 = vmax.f32 %v576_v30, 0.0  ;;  %1108 = vmatpush2.msra.mxu0 %v863_v35 }
 0x1a5   :  { %1109 = vmatprep.subr.mxu0 %v862_v11  ;;  %v1194_v11 = vld [vmem:[#allocation8 + $0xb0] sm:$0xff] }
 0x1a6   :  { %v579_v29 = vadd.f32 1e-05, %v577_v32  ;;  %1110 = vmatpush2.msra.mxu0 %v861_v37  ;;  %v1193_v37 = vld [vmem:[#allocation8 + $0xa8] sm:$0xff] }
 0x1a7   :  { %1111 = vmatprep.subr.mxu0 %v860_v57  ;;  %v1191_v57 = vld [vmem:[#allocation8 + $0x98] sm:$0xff] }
 0x1a8   :  { %3187 = vrsqrt.f32 %v579_v29  ;;  %1112 = vmatpush2.msra.mxu0 %v859_v14  ;;  %v1266_v14 = vld [vmem:[#allocation8 + $0x2f0] sm:$0xff] }
 0x1b5   :  { %v3188_v2 = vpop.eup %3187 }
 0x1b6   :  { %v581_v3 = vmul.f32 %v3188_v2, %v578_v49  ;;  %v3549_v49 = vsel %vm638_vm2, 1.0, %v3340_v0 }
 0x1b8   :  { %v589_v8 = vrot.slane %v581_v3, %v3515_v63  ;;  %v583_v9 = vmul.f32 %v581_v3, %v3504_v16  ;;  %v858_v16 = vld [vmem:[#allocation6 + $0x548] sm:$0xff] }
 0x1b9   :  { %1113 = vmatprep.subr.mxu0 %v858_v16  ;;  %v1265_v16 = vld [vmem:[#allocation8 + $0x2e8] sm:$0xff] }
 0x1ba   :  { %590 = vrot.lane.b32.xlu1 %v589_v8, %s3337_s30  ;;  %v584_v55 = vsub.f32 %v582_v45, %v583_v9  ;;  %1114 = vmatpush2.msra.mxu0 %v857_v7  ;;  %v1197_v45 = vld [vmem:[#allocation8 + $0xc8] sm:$0xff]  ;;  %v1196_v8 = vld [vmem:[#allocation8 + $0xc0] sm:$0xff]  ;;  %v1195_v9 = vld [vmem:[#allocation8 + $0xb8] sm:$0xff] }
 0x1bb   :  { %1115 = vmatprep.subr.mxu0 %v856_v17  ;;  %v1188_v7 = vld [vmem:[#allocation8 + $0x80] sm:$0xff] }
 0x1bc   :  { %v611_v15 = vrot.slane %v584_v55, %v3515_v63  ;;  %1116 = vmatpush2.msra.mxu0 %v855_v20  ;;  %v1264_v17 = vld [vmem:[#allocation8 + $0x2e0] sm:$0xff]  ;;  %v1187_v20 = vld [vmem:[#allocation8 + $0x78] sm:$0xff] }
 0x1bd   :  { %1117 = vmatprep.subr.mxu0 %v854_v21  ;;  %v1263_v21 = vld [vmem:[#allocation8 + $0x2d8] sm:$0xff] }
 0x1be   :  { %612 = vrot.lane.b32.xlu1 %v611_v15, %s3337_s30  ;;  %1118 = vmatpush2.msra.mxu0 %v853_v22  ;;  %v1189_v15 = vld [vmem:[#allocation8 + $0x88] sm:$0xff]  ;;  %v1186_v22 = vld [vmem:[#allocation8 + $0x70] sm:$0xff] }
 0x1bf   :  { %1119 = vmatprep.subr.mxu0 %v852_v10  ;;  %v1262_v10 = vld [vmem:[#allocation8 + $0x2d0] sm:$0xff] }
 0x1c0   :  { %1120 = vmatpush2.msra.mxu0 %v851_v23  ;;  %v1185_v23 = vld [vmem:[#allocation8 + $0x68] sm:$0xff] }
 0x1c1   :  { %1121 = vmatprep.subr.mxu0 %v850_v26 }
 0x1c2   :  { %1122 = vmatpush2.msra.mxu0 %v849_v27  ;;  %v1261_v27 = vld [vmem:[#allocation8 + $0x2c8] sm:$0xff] }
 0x1c3   :  { %1453 = vmatprep.subr.mxu0 %v1267_v28  ;;  %v1184_v28 = vld [vmem:[#allocation8 + $0x60] sm:$0xff] }
 0x22c   :  { %v591_v30 = vpop.permute.xlu1 %590 }
 0x22d   :  { %v594_v31 = vsel %vm593_vm1, %v581_v3, %v591_v30  ;;  %v1198_v3 = vld [vmem:[#allocation8 + $0xd0] sm:$0xff]  ;;  %v1260_v30 = vld [vmem:[#allocation8 + $0x2c0] sm:$0xff] }
 0x22e   :  { %v3527_v32 = vrot.slane %v594_v31, %v3515_v63 }
 0x230   :  { %v613_v29 = vpop.permute.xlu1 %612  ;;  %v600_v34 = vmul.f32 %v3527_v32, %v3448_v24  ;;  %v599_v38 = vmul.f32 %v3527_v32, %v3438_v18  ;;  %v602_v39 = vmul.f32 %v3527_v32, %v3450_v25  ;;  %v601_v40 = vmul.f32 %v3527_v32, %v3440_v19 }
 0x231   :  { %v615_v33 = vsel %vm593_vm1, %v584_v55, %v613_v29  ;;  %v604_v41 = vmul.f32 %v3527_v32, %v3477_v52  ;;  %v603_v18 = vmul.f32 %v3527_v32, %v3466_v42  ;;  %v605_v44 = vmul.f32 %v3527_v32, %v3468_v43  ;;  %v1199_v43 = vld [vmem:[#allocation8 + $0xd8] sm:$0xff]  ;;  %v1192_v55 = vld [vmem:[#allocation8 + $0xa0] sm:$0xff] }
 0x232   :  { %v3534_v36 = vrot.slane %v615_v33, %v3515_v63  ;;  %v606_v26 = vmul.f32 %v3527_v32, %v3479_v53  ;;  %v1183_v29 = vld [vmem:[#allocation8 + $0x58] sm:$0xff]  ;;  %v1258_v53 = vld [vmem:[#allocation8 + $0x2b0] sm:$0xff]  ;;  %v1181_v32 = vld [vmem:[#allocation8 + $0x48] sm:$0xff] }
 0x233   :  { %v1259_v33 = vld [vmem:[#allocation8 + $0x2b8] sm:$0xff] }
 0x234   :  { %v621_v47 = vadd.f32 %v3534_v36, %v600_v34  ;;  %v620_v24 = vadd.f32 %v3534_v36, %v599_v38  ;;  %v623_v46 = vadd.f32 %v3534_v36, %v602_v39  ;;  %v622_v48 = vadd.f32 %v3534_v36, %v601_v40  ;;  %v1182_v34 = vld [vmem:[#allocation8 + $0x50] sm:$0xff]  ;;  %v1257_v38 = vld [vmem:[#allocation8 + $0x2a8] sm:$0xff]  ;;  %v1180_v39 = vld [vmem:[#allocation8 + $0x40] sm:$0xff] }
 0x235   :  { %v625_v59 = vadd.f32 %v3534_v36, %v604_v41  ;;  %v624_v60 = vadd.f32 %v3534_v36, %v603_v18  ;;  %v626_v54 = vadd.f32 %v3534_v36, %v605_v44  ;;  %v627_v31 = vadd.f32 %v3534_v36, %v606_v26  ;;  %v1256_v36 = vld [vmem:[#allocation8 + $0x2a0] sm:$0xff]  ;;  %v1179_v41 = vld [vmem:[#allocation8 + $0x38] sm:$0xff]  ;;  %v1177_v18 = vld [vmem:[#allocation8 + $0x28] sm:$0xff] }
 0x236   :  { %v629_v25 = vmax.f32 %v621_v47, 0.0  ;;  %v628_v50 = vmax.f32 %v620_v24, 0.0  ;;  %v631_v19 = vmax.f32 %v623_v46, 0.0  ;;  %v630_v52 = vmax.f32 %v622_v48, 0.0  ;;  %v1255_v47 = vld [vmem:[#allocation8 + $0x298] sm:$0xff]  ;;  %v1178_v24 = vld [vmem:[#allocation8 + $0x30] sm:$0xff] }
 0x237   :  { %v633_v1 = vmax.f32 %v625_v59, 0.0  ;;  %v632_v5 = vmax.f32 %v624_v60, 0.0  ;;  %v634_v56 = vmax.f32 %v626_v54, 0.0  ;;  %v635_v40 = vmax.f32 %v627_v31, 0.0  ;;  %v1254_v48 = vld [vmem:[#allocation8 + $0x290] sm:$0xff]  ;;  %v1175_v59 = vld [vmem:[#allocation8 + $0x18] sm:$0xff] }
 0x238   :  { %v642_v51 = vmul.f32 %v3549_v49, %v629_v25  ;;  %v3557_v61 = vmul.f32 %v3549_v49, %v628_v50  ;;  %v3563_v42 = vmul.f32 %v3549_v49, %v631_v19  ;;  %v3568_v2 = vmul.f32 %v3549_v49, %v630_v52  ;;  %v1253_v25 = vld [vmem:[#allocation8 + $0x288] sm:$0xff]  ;;  %v1176_v50 = vld [vmem:[#allocation8 + $0x20] sm:$0xff]  ;;  %v1251_v52 = vld [vmem:[#allocation8 + $0x278] sm:$0xff] }
 0x239   :  { %v3574_v6 = vmul.f32 %v3549_v49, %v633_v1  ;;  %v3578_v35 = vmul.f32 %v3549_v49, %v632_v5  ;;  %v3585_v13 = vmul.f32 %v3549_v49, %v634_v56  ;;  %v3600_v46 = vmul.f32 %v3549_v49, %v635_v40  ;;  %v1252_v19 = vld [vmem:[#allocation8 + $0x280] sm:$0xff]  ;;  %v1174_v60 = vld [vmem:[#allocation8 + $0x10] sm:$0xff]  ;;  %v1235_v1 = vld [vmem:[#allocation8 + $0x1f8] sm:$0xff] }
 0x23a   :  { %951 = vmatprep.mubr.f32.mxu0 %v642_v51  ;;  %1034 = vmatprep.mubr.f32.mxu1 %v3557_v61  ;;  %v1250_v49 = vld [vmem:[#allocation8 + $0x270] sm:$0xff]  ;;  %v1172_v44 = vld [vmem:[#allocation8] sm:$0xff]  ;;  %v1299_v26 = vld [vmem:[#allocation8 + $0x3f8] sm:$0xff] }
 0x23b   :  { %952 = vmatmul.mubr.f32.gmra.mxu0 %v3557_v61  ;;  %1035 = vmatmul.mubr.f32.vlgmr.msra.gmra.mxu1 %v3340_v0  ;;  %v1234_v5 = vld [vmem:[#allocation8 + $0x1f0] sm:$0xff]  ;;  %v1244_v56 = vld [vmem:[#allocation8 + $0x240] sm:$0xff]  ;;  %v1297_v31 = vld [vmem:[#allocation8 + $0x3e8] sm:$0xff] }
 0x23c   :  { %1365 = vmatpush1.msra.mxu1 %v1202_v62  ;;  %957 = vmatprep.mubr.f32.mxu0 %v3563_v42  ;;  %v1249_v62 = vld [vmem:[#allocation8 + $0x268] sm:$0xff]  ;;  %v1246_v54 = vld [vmem:[#allocation8 + $0x250] sm:$0xff] }
 0x23d   :  { %1040 = vmatprep.mubr.f32.mxu1 %v3568_v2  ;;  %1366 = vmatprep.subr.mxu1 %v1201_v58  ;;  %v1248_v58 = vld [vmem:[#allocation8 + $0x260] sm:$0xff]  ;;  %v1293_v40 = vld [vmem:[#allocation8 + $0x3c8] sm:$0xff] }
 0x23e   :  { %1367 = vmatpush1.msra.mxu1 %v1200_v4  ;;  %v1247_v4 = vld [vmem:[#allocation8 + $0x258] sm:$0xff] }
 0x23f   :  { %1368 = vmatprep.subr.mxu1 %v1199_v43  ;;  %958 = vmatmul.mubr.f32.gmra.mxu0 %v3568_v2  ;;  %v1233_v43 = vld [vmem:[#allocation8 + $0x1e8] sm:$0xff] }
 0x240   :  { %1041 = vmatmul.mubr.f32.gmra.mxu1 %v3340_v0  ;;  %963 = vmatprep.mubr.f32.mxu0 %v3574_v6 }
 0x241   :  { %1369 = vmatpush1.msra.mxu1 %v1198_v3  ;;  %1046 = vmatprep.mubr.f32.mxu1 %v3578_v35  ;;  %v1245_v3 = vld [vmem:[#allocation8 + $0x248] sm:$0xff] }
 0x242   :  { %1370 = vmatprep.subr.mxu1 %v1197_v45  ;;  %v1232_v45 = vld [vmem:[#allocation8 + $0x1e0] sm:$0xff] }
 0x243   :  { %1371 = vmatpush1.msra.mxu1 %v1196_v8  ;;  %964 = vmatmul.mubr.f32.gmra.mxu0 %v3578_v35  ;;  %v1231_v8 = vld [vmem:[#allocation8 + $0x1d8] sm:$0xff] }
 0x244   :  { %1372 = vmatprep.subr.mxu1 %v1195_v9  ;;  %1047 = vmatmul.mubr.f32.gmra.mxu1 %v3340_v0  ;;  %v1243_v9 = vld [vmem:[#allocation8 + $0x238] sm:$0xff] }
 0x245   :  { %1373 = vmatpush1.msra.mxu1 %v1194_v11  ;;  %1052 = vmatprep.mubr.f32.mxu1 %v3585_v13  ;;  %v1230_v11 = vld [vmem:[#allocation8 + $0x1d0] sm:$0xff] }
 0x246   :  { %1374 = vmatprep.subr.mxu1 %v1193_v37  ;;  %1123 = vmatprep.mubr.f32.mxu0 %v3340_v0  ;;  %v1242_v37 = vld [vmem:[#allocation8 + $0x230] sm:$0xff] }
 0x247   :  { %1375 = vmatpush1.msra.mxu1 %v1192_v55  ;;  %1124 = vmatmul.mubr.f32.vlgmr.msra.gmra.mxu0 %v642_v51  ;;  %v1229_v55 = vld [vmem:[#allocation8 + $0x1c8] sm:$0xff] }
 0x248   :  { %1376 = vmatprep.subr.mxu1 %v1191_v57  ;;  %1053 = vmatmul.mubr.f32.gmra.mxu1 %v3340_v0  ;;  %v1241_v57 = vld [vmem:[#allocation8 + $0x228] sm:$0xff] }
 0x249   :  { %1377 = vmatpush1.msra.mxu1 %v1190_v12  ;;  %1454 = vmatpush1.msra.mxu0 %v1266_v14  ;;  %v1228_v12 = vld [vmem:[#allocation8 + $0x1c0] sm:$0xff] }
 0x24a   :  { %1378 = vmatprep.subr.mxu1 %v1189_v15  ;;  %1428 = vmatprep.mubr.f32.mxu1 %v642_v51  ;;  %v1173_v51 = vld [vmem:[#allocation8 + $0x8] sm:$0xff]  ;;  %v1240_v14 = vld [vmem:[#allocation8 + $0x220] sm:$0xff]  ;;  %v1227_v15 = vld [vmem:[#allocation8 + $0x1b8] sm:$0xff] }
 0x24b   :  { %1455 = vmatprep.subr.mxu0 %v1265_v16  ;;  %1379 = vmatpush1.msra.mxu1 %v1188_v7  ;;  %v1239_v16 = vld [vmem:[#allocation8 + $0x218] sm:$0xff]  ;;  %v1226_v7 = vld [vmem:[#allocation8 + $0x1b0] sm:$0xff] }
 0x24c   :  { %1456 = vmatpush1.msra.mxu0 %v1264_v17  ;;  %1129 = vmatprep.mubr.f32.mxu0 %v3340_v0  ;;  %v1238_v17 = vld [vmem:[#allocation8 + $0x210] sm:$0xff] }
 0x24d   :  { %1380 = vmatprep.subr.mxu1 %v1187_v20  ;;  %1457 = vmatprep.subr.mxu0 %v1263_v21  ;;  %v1225_v20 = vld [vmem:[#allocation8 + $0x1a8] sm:$0xff] }
 0x24e   :  { %1130 = vmatmul.mubr.f32.gmra.mxu0 %v3563_v42  ;;  %1381 = vmatpush1.msra.mxu1 %v1186_v22  ;;  %v1237_v21 = vld [vmem:[#allocation8 + $0x208] sm:$0xff]  ;;  %v1224_v22 = vld [vmem:[#allocation8 + $0x1a0] sm:$0xff] }
 0x24f   :  { %1458 = vmatpush1.msra.mxu0 %v1262_v10  ;;  %1382 = vmatprep.subr.mxu1 %v1185_v23  ;;  %v1236_v10 = vld [vmem:[#allocation8 + $0x200] sm:$0xff]  ;;  %v1223_v23 = vld [vmem:[#allocation8 + $0x198] sm:$0xff] }
 0x250   :  { %1459 = vmatprep.subr.mxu0 %v1261_v27  ;;  %1383 = vmatpush1.msra.mxu1 %v1184_v28  ;;  %v1222_v27 = vld [vmem:[#allocation8 + $0x190] sm:$0xff] }
 0x251   :  { %1460 = vmatpush1.msra.mxu0 %v1260_v30  ;;  %1135 = vmatprep.mubr.f32.mxu0 %v3340_v0  ;;  %v1298_v28 = vld [vmem:[#allocation8 + $0x3f0] sm:$0xff]  ;;  %v1221_v30 = vld [vmem:[#allocation8 + $0x188] sm:$0xff] }
 0x252   :  { %1384 = vmatprep.subr.mxu1 %v1183_v29  ;;  %1461 = vmatprep.subr.mxu0 %v1259_v33  ;;  %v1220_v29 = vld [vmem:[#allocation8 + $0x180] sm:$0xff] }
 0x253   :  { %1136 = vmatmul.mubr.f32.gmra.mxu0 %v3574_v6  ;;  %1385 = vmatpush1.msra.mxu1 %v1182_v34  ;;  %v1296_v33 = vld [vmem:[#allocation8 + $0x3e0] sm:$0xff]  ;;  %v1219_v34 = vld [vmem:[#allocation8 + $0x178] sm:$0xff] }
 0x254   :  { %1462 = vmatpush1.msra.mxu0 %v1258_v53  ;;  %1386 = vmatprep.subr.mxu1 %v1181_v32  ;;  %v1295_v53 = vld [vmem:[#allocation8 + $0x3d8] sm:$0xff]  ;;  %v1218_v32 = vld [vmem:[#allocation8 + $0x170] sm:$0xff] }
 0x255   :  { %1463 = vmatprep.subr.mxu0 %v1257_v38  ;;  %1387 = vmatpush1.msra.mxu1 %v1180_v39  ;;  %v1294_v38 = vld [vmem:[#allocation8 + $0x3d0] sm:$0xff]  ;;  %v1217_v39 = vld [vmem:[#allocation8 + $0x168] sm:$0xff] }
 0x256   :  { %1464 = vmatpush1.msra.mxu0 %v1256_v36  ;;  %1141 = vmatprep.mubr.f32.mxu0 %v3340_v0  ;;  %v1216_v36 = vld [vmem:[#allocation8 + $0x160] sm:$0xff] }
 0x257   :  { %1388 = vmatprep.subr.mxu1 %v1179_v41  ;;  %1465 = vmatprep.subr.mxu0 %v1255_v47  ;;  %v1292_v41 = vld [vmem:[#allocation8 + $0x3c0] sm:$0xff]  ;;  %v1215_v47 = vld [vmem:[#allocation8 + $0x158] sm:$0xff] }
 0x258   :  { %1142 = vmatmul.mubr.f32.gmra.mxu0 %v3600_v46  ;;  %1389 = vmatpush1.msra.mxu1 %v1178_v24  ;;  %v1291_v24 = vld [vmem:[#allocation8 + $0x3b8] sm:$0xff] }
 0x259   :  { %1466 = vmatpush1.msra.mxu0 %v1254_v48  ;;  %1390 = vmatprep.subr.mxu1 %v1177_v18  ;;  %v1214_v48 = vld [vmem:[#allocation8 + $0x150] sm:$0xff] }
 0x25a   :  { %1467 = vmatprep.subr.mxu0 %v1253_v25  ;;  %1517 = vmatprep.mubr.f32.mxu0 %v3568_v2  ;;  %v1290_v18 = vld [vmem:[#allocation8 + $0x3b0] sm:$0xff]  ;;  %v1213_v25 = vld [vmem:[#allocation8 + $0x148] sm:$0xff] }
 0x25b   :  { %1391 = vmatpush1.msra.mxu1 %v1176_v50  ;;  %1468 = vmatpush1.msra.mxu0 %v1252_v19  ;;  %v1289_v50 = vld [vmem:[#allocation8 + $0x3a8] sm:$0xff]  ;;  %v1212_v19 = vld [vmem:[#allocation8 + $0x140] sm:$0xff] }
 0x25c   :  { %1392 = vmatprep.subr.mxu1 %v1175_v59  ;;  %1469 = vmatprep.subr.mxu0 %v1251_v52  ;;  %v1288_v59 = vld [vmem:[#allocation8 + $0x3a0] sm:$0xff]  ;;  %v1211_v52 = vld [vmem:[#allocation8 + $0x138] sm:$0xff] }
 0x25d   :  { %1393 = vmatpush1.msra.mxu1 %v1174_v60  ;;  %1470 = vmatpush1.msra.mxu0 %v1250_v49  ;;  %v1287_v60 = vld [vmem:[#allocation8 + $0x398] sm:$0xff]  ;;  %v1210_v49 = vld [vmem:[#allocation8 + $0x130] sm:$0xff] }
 0x25e   :  { %1394 = vmatprep.subr.mxu1 %v1173_v51  ;;  %1471 = vmatprep.subr.mxu0 %v1249_v62  ;;  %v1286_v51 = vld [vmem:[#allocation8 + $0x390] sm:$0xff]  ;;  %v1209_v62 = vld [vmem:[#allocation8 + $0x128] sm:$0xff] }
 0x25f   :  { %1395 = vmatpush1.msra.mxu1 %v1172_v44  ;;  %1472 = vmatpush1.msra.mxu0 %v1248_v58  ;;  %v1285_v44 = vld [vmem:[#allocation8 + $0x388] sm:$0xff]  ;;  %v1208_v58 = vld [vmem:[#allocation8 + $0x120] sm:$0xff] }
 0x260   :  { %1396 = vmatprep.subr.mxu1 %v1235_v1  ;;  %1473 = vmatprep.subr.mxu0 %v1247_v4  ;;  %v1284_v1 = vld [vmem:[#allocation8 + $0x380] sm:$0xff]  ;;  %v1207_v4 = vld [vmem:[#allocation8 + $0x118] sm:$0xff] }
 0x261   :  { %1397 = vmatpush2.msra.mxu1 %v1234_v5  ;;  %1474 = vmatpush1.msra.mxu0 %v1246_v54  ;;  %v1283_v5 = vld [vmem:[#allocation8 + $0x378] sm:$0xff]  ;;  %v1206_v54 = vld [vmem:[#allocation8 + $0x110] sm:$0xff] }
 0x262   :  { %1398 = vmatprep.subr.mxu1 %v1233_v43  ;;  %1475 = vmatprep.subr.mxu0 %v1245_v3  ;;  %v1282_v43 = vld [vmem:[#allocation8 + $0x370] sm:$0xff]  ;;  %v1205_v3 = vld [vmem:[#allocation8 + $0x108] sm:$0xff] }
 0x263   :  { %1399 = vmatpush2.msra.mxu1 %v1232_v45  ;;  %1476 = vmatpush1.msra.mxu0 %v1244_v56  ;;  %v1281_v45 = vld [vmem:[#allocation8 + $0x368] sm:$0xff]  ;;  %v1204_v56 = vld [vmem:[#allocation8 + $0x100] sm:$0xff] }
 0x264   :  { %1400 = vmatprep.subr.mxu1 %v1231_v8  ;;  %1477 = vmatprep.subr.mxu0 %v1243_v9  ;;  %v1280_v8 = vld [vmem:[#allocation8 + $0x360] sm:$0xff]  ;;  %v1279_v9 = vld [vmem:[#allocation8 + $0x358] sm:$0xff] }
 0x265   :  { %1401 = vmatpush2.msra.mxu1 %v1230_v11  ;;  %1478 = vmatpush1.msra.mxu0 %v1242_v37  ;;  %v1331_v11 = vld [vmem:[#allocation8 + $0x4f8] sm:$0xff]  ;;  %v1278_v37 = vld [vmem:[#allocation8 + $0x350] sm:$0xff] }
 0x266   :  { %1402 = vmatprep.subr.mxu1 %v1229_v55  ;;  %1479 = vmatprep.subr.mxu0 %v1241_v57  ;;  %v1330_v55 = vld [vmem:[#allocation8 + $0x4f0] sm:$0xff]  ;;  %v1277_v57 = vld [vmem:[#allocation8 + $0x348] sm:$0xff] }
 0x267   :  { %1403 = vmatpush2.msra.mxu1 %v1228_v12  ;;  %1480 = vmatpush1.msra.mxu0 %v1240_v14  ;;  %v1329_v12 = vld [vmem:[#allocation8 + $0x4e8] sm:$0xff]  ;;  %v1276_v14 = vld [vmem:[#allocation8 + $0x340] sm:$0xff] }
 0x268   :  { %1404 = vmatprep.subr.mxu1 %v1227_v15  ;;  %1481 = vmatprep.subr.mxu0 %v1239_v16  ;;  %v1328_v15 = vld [vmem:[#allocation8 + $0x4e0] sm:$0xff]  ;;  %v1275_v16 = vld [vmem:[#allocation8 + $0x338] sm:$0xff] }
 0x269   :  { %1405 = vmatpush2.msra.mxu1 %v1226_v7  ;;  %1482 = vmatpush1.msra.mxu0 %v1238_v17  ;;  %v1327_v7 = vld [vmem:[#allocation8 + $0x4d8] sm:$0xff]  ;;  %v1274_v17 = vld [vmem:[#allocation8 + $0x330] sm:$0xff] }
 0x26a   :  { %1406 = vmatprep.subr.mxu1 %v1225_v20  ;;  %1483 = vmatprep.subr.mxu0 %v1237_v21  ;;  %v1326_v20 = vld [vmem:[#allocation8 + $0x4d0] sm:$0xff]  ;;  %v1325_v21 = vld [vmem:[#allocation8 + $0x4c8] sm:$0xff] }
 0x26b   :  { %1407 = vmatpush2.msra.mxu1 %v1224_v22  ;;  %1484 = vmatpush1.msra.mxu0 %v1236_v10  ;;  %v1272_v22 = vld [vmem:[#allocation8 + $0x320] sm:$0xff] }
 0x26c   :  { %1408 = vmatprep.subr.mxu1 %v1223_v23  ;;  %1485 = vmatprep.subr.mxu0 %v1299_v26  ;;  %v1324_v10 = vld [vmem:[#allocation8 + $0x4c0] sm:$0xff]  ;;  %v1271_v23 = vld [vmem:[#allocation8 + $0x318] sm:$0xff] }
 0x26d   :  { %1409 = vmatpush2.msra.mxu1 %v1222_v27  ;;  %1486 = vmatpush2.msra.mxu0 %v1298_v28  ;;  %v1323_v26 = vld [vmem:[#allocation8 + $0x4b8] sm:$0xff]  ;;  %v1270_v27 = vld [vmem:[#allocation8 + $0x310] sm:$0xff] }
 0x26e   :  { %1410 = vmatprep.subr.mxu1 %v1221_v30  ;;  %1487 = vmatprep.subr.mxu0 %v1297_v31  ;;  %v1322_v28 = vld [vmem:[#allocation8 + $0x4b0] sm:$0xff]  ;;  %v1321_v30 = vld [vmem:[#allocation8 + $0x4a8] sm:$0xff]  ;;  %v1268_v31 = vld [vmem:[#allocation8 + $0x300] sm:$0xff] }
 0x26f   :  { %1411 = vmatpush2.msra.mxu1 %v1220_v29  ;;  %1488 = vmatpush2.msra.mxu0 %v1296_v33  ;;  %v1320_v29 = vld [vmem:[#allocation8 + $0x4a0] sm:$0xff]  ;;  %v1319_v33 = vld [vmem:[#allocation8 + $0x498] sm:$0xff] }
 0x270   :  { %1412 = vmatprep.subr.mxu1 %v1219_v34  ;;  %1489 = vmatprep.subr.mxu0 %v1295_v53  ;;  %v1318_v34 = vld [vmem:[#allocation8 + $0x490] sm:$0xff]  ;;  %v1317_v53 = vld [vmem:[#allocation8 + $0x488] sm:$0xff] }
 0x271   :  { %1413 = vmatpush2.msra.mxu1 %v1218_v32  ;;  %1490 = vmatpush2.msra.mxu0 %v1294_v38  ;;  %v1316_v32 = vld [vmem:[#allocation8 + $0x480] sm:$0xff]  ;;  %v1315_v38 = vld [vmem:[#allocation8 + $0x478] sm:$0xff] }
 0x272   :  { %1414 = vmatprep.subr.mxu1 %v1217_v39  ;;  %1491 = vmatprep.subr.mxu0 %v1293_v40  ;;  %v1314_v39 = vld [vmem:[#allocation8 + $0x470] sm:$0xff]  ;;  %v1313_v40 = vld [vmem:[#allocation8 + $0x468] sm:$0xff] }
 0x273   :  { %1415 = vmatpush2.msra.mxu1 %v1216_v36  ;;  %1492 = vmatpush2.msra.mxu0 %v1292_v41  ;;  %v1312_v36 = vld [vmem:[#allocation8 + $0x460] sm:$0xff]  ;;  %v1311_v41 = vld [vmem:[#allocation8 + $0x458] sm:$0xff] }
 0x274   :  { %1416 = vmatprep.subr.mxu1 %v1215_v47  ;;  %1493 = vmatprep.subr.mxu0 %v1291_v24  ;;  %v1310_v47 = vld [vmem:[#allocation8 + $0x450] sm:$0xff]  ;;  %v1308_v24 = vld [vmem:[#allocation8 + $0x440] sm:$0xff] }
 0x275   :  { %1417 = vmatpush2.msra.mxu1 %v1214_v48  ;;  %1494 = vmatpush2.msra.mxu0 %v1290_v18  ;;  %v1307_v48 = vld [vmem:[#allocation8 + $0x438] sm:$0xff]  ;;  %v1306_v18 = vld [vmem:[#allocation8 + $0x430] sm:$0xff] }
 0x276   :  { %1418 = vmatprep.subr.mxu1 %v1213_v25  ;;  %1495 = vmatprep.subr.mxu0 %v1289_v50  ;;  %v1304_v25 = vld [vmem:[#allocation8 + $0x420] sm:$0xff]  ;;  %v1303_v50 = vld [vmem:[#allocation8 + $0x418] sm:$0xff] }
 0x277   :  { %1419 = vmatpush2.msra.mxu1 %v1212_v19  ;;  %1496 = vmatpush2.msra.mxu0 %v1288_v59  ;;  %v1302_v19 = vld [vmem:[#allocation8 + $0x410] sm:$0xff]  ;;  %v1301_v59 = vld [vmem:[#allocation8 + $0x408] sm:$0xff] }
 0x278   :  { %1420 = vmatprep.subr.mxu1 %v1211_v52  ;;  %1497 = vmatprep.subr.mxu0 %v1287_v60  ;;  %v1300_v52 = vld [vmem:[#allocation8 + $0x400] sm:$0xff]  ;;  %v1363_v60 = vld [vmem:[#allocation8 + $0x5f8] sm:$0xff] }
 0x279   :  { %1421 = vmatpush2.msra.mxu1 %v1210_v49  ;;  %1498 = vmatpush2.msra.mxu0 %v1286_v51  ;;  %v1362_v49 = vld [vmem:[#allocation8 + $0x5f0] sm:$0xff]  ;;  %v1361_v51 = vld [vmem:[#allocation8 + $0x5e8] sm:$0xff] }
 0x27a   :  { %1422 = vmatprep.subr.mxu1 %v1209_v62  ;;  %1499 = vmatprep.subr.mxu0 %v1285_v44  ;;  %v1360_v62 = vld [vmem:[#allocation8 + $0x5e0] sm:$0xff]  ;;  %v1359_v44 = vld [vmem:[#allocation8 + $0x5d8] sm:$0xff] }
 0x27b   :  { %1423 = vmatpush2.msra.mxu1 %v1208_v58  ;;  %1500 = vmatpush2.msra.mxu0 %v1284_v1  ;;  %v1358_v58 = vld [vmem:[#allocation8 + $0x5d0] sm:$0xff]  ;;  %v1357_v1 = vld [vmem:[#allocation8 + $0x5c8] sm:$0xff] }
 0x27c   :  { %1424 = vmatprep.subr.mxu1 %v1207_v4  ;;  %1501 = vmatprep.subr.mxu0 %v1283_v5  ;;  %v1356_v4 = vld [vmem:[#allocation8 + $0x5c0] sm:$0xff]  ;;  %v1355_v5 = vld [vmem:[#allocation8 + $0x5b8] sm:$0xff] }
 0x27d   :  { %1425 = vmatpush2.msra.mxu1 %v1206_v54  ;;  %1502 = vmatpush2.msra.mxu0 %v1282_v43  ;;  %v1354_v54 = vld [vmem:[#allocation8 + $0x5b0] sm:$0xff]  ;;  %v1353_v43 = vld [vmem:[#allocation8 + $0x5a8] sm:$0xff] }
 0x27e   :  { %1426 = vmatprep.subr.mxu1 %v1205_v3  ;;  %1503 = vmatprep.subr.mxu0 %v1281_v45  ;;  %v1352_v3 = vld [vmem:[#allocation8 + $0x5a0] sm:$0xff]  ;;  %v1351_v45 = vld [vmem:[#allocation8 + $0x598] sm:$0xff] }
 0x27f   :  { %1427 = vmatpush2.msra.mxu1 %v1204_v56  ;;  %1504 = vmatpush2.msra.mxu0 %v1280_v8  ;;  %v1350_v56 = vld [vmem:[#allocation8 + $0x590] sm:$0xff]  ;;  %v1349_v8 = vld [vmem:[#allocation8 + $0x588] sm:$0xff] }
 0x280   :  { %1429 = vmatmul.mubr.f32.vlgmr.msra.gmra.mxu1 %v3557_v61  ;;  %1505 = vmatprep.subr.mxu0 %v1279_v9  ;;  %v1273_v61 = vld [vmem:[#allocation8 + $0x328] sm:$0xff]  ;;  %v1348_v9 = vld [vmem:[#allocation8 + $0x580] sm:$0xff] }
 0x281   :  { %1542 = vmatprep.subr.mxu1 %v1331_v11  ;;  %1434 = vmatprep.mubr.f32.mxu1 %v3563_v42  ;;  %v1347_v11 = vld [vmem:[#allocation8 + $0x578] sm:$0xff] }
 0x282   :  { %1506 = vmatpush2.msra.mxu0 %v1278_v37  ;;  %1543 = vmatpush1.msra.mxu1 %v1330_v55  ;;  %v1346_v37 = vld [vmem:[#allocation8 + $0x570] sm:$0xff]  ;;  %v1345_v55 = vld [vmem:[#allocation8 + $0x568] sm:$0xff] }
 0x283   :  { %1507 = vmatprep.subr.mxu0 %v1277_v57  ;;  %1544 = vmatprep.subr.mxu1 %v1329_v12  ;;  %v1344_v57 = vld [vmem:[#allocation8 + $0x560] sm:$0xff]  ;;  %v1343_v12 = vld [vmem:[#allocation8 + $0x558] sm:$0xff] }
 0x284   :  { %1508 = vmatpush2.msra.mxu0 %v1276_v14  ;;  %1545 = vmatpush1.msra.mxu1 %v1328_v15  ;;  %v1342_v14 = vld [vmem:[#allocation8 + $0x550] sm:$0xff]  ;;  %v1341_v15 = vld [vmem:[#allocation8 + $0x548] sm:$0xff] }
 0x285   :  { %1435 = vmatmul.mubr.f32.gmra.mxu1 %v3568_v2  ;;  %1509 = vmatprep.subr.mxu0 %v1275_v16  ;;  %v1269_v2 = vld [vmem:[#allocation8 + $0x308] sm:$0xff]  ;;  %v1340_v16 = vld [vmem:[#allocation8 + $0x540] sm:$0xff] }
 0x286   :  { %1546 = vmatprep.subr.mxu1 %v1327_v7  ;;  %1440 = vmatprep.mubr.f32.mxu1 %v3574_v6  ;;  %v1339_v7 = vld [vmem:[#allocation8 + $0x538] sm:$0xff] }
 0x287   :  { %1510 = vmatpush2.msra.mxu0 %v1274_v17  ;;  %1547 = vmatpush1.msra.mxu1 %v1326_v20  ;;  %v1338_v17 = vld [vmem:[#allocation8 + $0x530] sm:$0xff]  ;;  %v1337_v20 = vld [vmem:[#allocation8 + $0x528] sm:$0xff] }
 0x288   :  { %1511 = vmatprep.subr.mxu0 %v1273_v61  ;;  %1548 = vmatprep.subr.mxu1 %v1325_v21  ;;  %v1336_v61 = vld [vmem:[#allocation8 + $0x520] sm:$0xff]  ;;  %v1335_v21 = vld [vmem:[#allocation8 + $0x518] sm:$0xff] }
 0x289   :  { %1512 = vmatpush2.msra.mxu0 %v1272_v22  ;;  %1549 = vmatpush1.msra.mxu1 %v1324_v10  ;;  %v1334_v22 = vld [vmem:[#allocation8 + $0x510] sm:$0xff]  ;;  %v1333_v10 = vld [vmem:[#allocation8 + $0x508] sm:$0xff] }
 0x28a   :  { %1441 = vmatmul.mubr.f32.gmra.mxu1 %v3578_v35  ;;  %1513 = vmatprep.subr.mxu0 %v1271_v23  ;;  %v1332_v23 = vld [vmem:[#allocation8 + $0x500] sm:$0xff] }
 0x28b   :  { %1550 = vmatprep.subr.mxu1 %v1323_v26  ;;  %1446 = vmatprep.mubr.f32.mxu1 %v3600_v46  ;;  %v947_v26 = vpop.f32.mrf.mxu0 }
 0x28c   :  { %1514 = vmatpush2.msra.mxu0 %v1270_v27  ;;  %1551 = vmatpush1.msra.mxu1 %v1322_v28 }
 0x28d   :  { %1515 = vmatprep.subr.mxu0 %v1269_v2  ;;  %1552 = vmatprep.subr.mxu1 %v1321_v30  ;;  %v949_v27 = vpop.f32.mrf.mxu0 }
 0x28e   :  { %1516 = vmatpush2.msra.mxu0 %v1268_v31  ;;  %1553 = vmatpush1.msra.mxu1 %v1320_v29 }
 0x28f   :  { %1447 = vmatmul.mubr.f32.gmra.mxu1 %v3585_v13  ;;  %1518 = vmatmul.mubr.f32.vlgmr.msra.gmra.mxu0 %v3340_v0 }
 0x290   :  { %1554 = vmatprep.subr.mxu1 %v1319_v33  ;;  %1523 = vmatprep.mubr.f32.mxu0 %v3578_v35  ;;  %v1309_v35 = vld [vmem:[#allocation8 + $0x448] sm:$0xff] }
 0x291   :  { %1555 = vmatpush1.msra.mxu1 %v1318_v34  ;;  %1606 = vmatprep.mubr.f32.mxu1 %v3340_v0 }
 0x292   :  { %1556 = vmatprep.subr.mxu1 %v1317_v53 }
 0x293   :  { %1557 = vmatpush1.msra.mxu1 %v1316_v32  ;;  %1524 = vmatmul.mubr.f32.gmra.mxu0 %v3340_v0 }
 0x294   :  { %1558 = vmatprep.subr.mxu1 %v1315_v38  ;;  %1529 = vmatprep.mubr.f32.mxu0 %v3585_v13  ;;  %v1305_v13 = vld [vmem:[#allocation8 + $0x428] sm:$0xff] }
 0x295   :  { %1559 = vmatpush1.msra.mxu1 %v1314_v39 }
 0x296   :  { %1560 = vmatprep.subr.mxu1 %v1313_v40 }
 0x297   :  { %1561 = vmatpush1.msra.mxu1 %v1312_v36  ;;  %1530 = vmatmul.mubr.f32.gmra.mxu0 %v3340_v0 }
 0x298   :  { %1562 = vmatprep.subr.mxu1 %v1311_v41  ;;  %1535 = vmatprep.mubr.f32.mxu0 %v3340_v0 }
 0x299   :  { %1563 = vmatpush1.msra.mxu1 %v1310_v47 }
 0x29a   :  { %1564 = vmatprep.subr.mxu1 %v1309_v35 }
 0x29b   :  { %1565 = vmatpush1.msra.mxu1 %v1308_v24  ;;  %1536 = vmatmul.mubr.f32.gmra.mxu0 %v3340_v0 }
 0x29c   :  { %1566 = vmatprep.subr.mxu1 %v1307_v48  ;;  %2083 = vmatprep.mubr.f32.mxu0 %v3340_v0 }
 0x29d   :  { %1567 = vmatpush1.msra.mxu1 %v1306_v18 }
 0x29e   :  { %1568 = vmatprep.subr.mxu1 %v1305_v13 }
 0x29f   :  { %1569 = vmatpush1.msra.mxu1 %v1304_v25 }
 0x2a0   :  { %1570 = vmatprep.subr.mxu1 %v1303_v50 }
 0x2a1   :  { %1571 = vmatpush1.msra.mxu1 %v1302_v19 }
 0x2a2   :  { %1572 = vmatprep.subr.mxu1 %v1301_v59 }
 0x2a3   :  { %1573 = vmatpush1.msra.mxu1 %v1300_v52 }
 0x2a4   :  { %1574 = vmatprep.subr.mxu1 %v1363_v60 }
 0x2a5   :  { %1575 = vmatpush2.msra.mxu1 %v1362_v49 }
 0x2a6   :  { %1576 = vmatprep.subr.mxu1 %v1361_v51 }
 0x2a7   :  { %1577 = vmatpush2.msra.mxu1 %v1360_v62 }
 0x2a8   :  { %1578 = vmatprep.subr.mxu1 %v1359_v44 }
 0x2a9   :  { %1579 = vmatpush2.msra.mxu1 %v1358_v58 }
 0x2aa   :  { %1580 = vmatprep.subr.mxu1 %v1357_v1 }
 0x2ab   :  { %1581 = vmatpush2.msra.mxu1 %v1356_v4 }
 0x2ac   :  { %1582 = vmatprep.subr.mxu1 %v1355_v5 }
 0x2ad   :  { %1583 = vmatpush2.msra.mxu1 %v1354_v54 }
 0x2ae   :  { %1584 = vmatprep.subr.mxu1 %v1353_v43 }
 0x2af   :  { %1585 = vmatpush2.msra.mxu1 %v1352_v3 }
 0x2b0   :  { %1586 = vmatprep.subr.mxu1 %v1351_v45 }
 0x2b1   :  { %1587 = vmatpush2.msra.mxu1 %v1350_v56 }
 0x2b2   :  { %1588 = vmatprep.subr.mxu1 %v1349_v8 }
 0x2b3   :  { %1589 = vmatpush2.msra.mxu1 %v1348_v9 }
 0x2b4   :  { %1590 = vmatprep.subr.mxu1 %v1347_v11 }
 0x2b5   :  { %1591 = vmatpush2.msra.mxu1 %v1346_v37 }
 0x2b6   :  { %1592 = vmatprep.subr.mxu1 %v1345_v55 }
 0x2b7   :  { %1593 = vmatpush2.msra.mxu1 %v1344_v57 }
 0x2b8   :  { %1594 = vmatprep.subr.mxu1 %v1343_v12 }
 0x2b9   :  { %1595 = vmatpush2.msra.mxu1 %v1342_v14 }
 0x2ba   :  { %1596 = vmatprep.subr.mxu1 %v1341_v15 }
 0x2bb   :  { %1597 = vmatpush2.msra.mxu1 %v1340_v16 }
 0x2bc   :  { %1598 = vmatprep.subr.mxu1 %v1339_v7 }
 0x2bd   :  { %1599 = vmatpush2.msra.mxu1 %v1338_v17 }
 0x2be   :  { %1600 = vmatprep.subr.mxu1 %v1337_v20 }
 0x2bf   :  { %1601 = vmatpush2.msra.mxu1 %v1336_v61 }
 0x2c0   :  { %1602 = vmatprep.subr.mxu1 %v1335_v21 }
 0x2c1   :  { %1603 = vmatpush2.msra.mxu1 %v1334_v22 }
 0x2c2   :  { %1604 = vmatprep.subr.mxu1 %v1333_v10 }
 0x2c3   :  { %1605 = vmatpush2.msra.mxu1 %v1332_v23 }
 0x2c4   :  { %1607 = vmatmul.mubr.f32.vlgmr.msra.gmra.mxu1 %v3563_v42 }
 0x2c5   :  { %1612 = vmatprep.mubr.f32.mxu1 %v3340_v0 }
 0x2c8   :  { %1613 = vmatmul.mubr.f32.gmra.mxu1 %v3574_v6 }
 0x2c9   :  { %1618 = vmatprep.mubr.f32.mxu1 %v3340_v0 }
 0x2cc   :  { %1619 = vmatmul.mubr.f32.gmra.mxu1 %v3600_v46 }
 0x2cd   :  { %1624 = vmatprep.mubr.f32.mxu1 %v3340_v0 }
 0x2d0   :  { %1625 = vmatmul.mubr.f32.gmra.mxu1 %v3340_v0 }
 0x2fb   :  { %v953_v28 = vpop.f32.mrf.mxu0  ;;  %v1036_v29 = vpop.f32.mrf.mxu1 }
 0x2fc   :  { %v1037_v58 = vadd.f32 %v1036_v29, %v947_v26 }
 0x2fd   :  { %v955_v2 = vpop.f32.mrf.mxu0  ;;  %v1038_v33 = vpop.f32.mrf.mxu1 }
 0x2fe   :  { %v1039_v54 = vadd.f32 %v1038_v33, %v949_v27 }
 0x2ff   :  { %v959_v30 = vpop.f32.mrf.mxu0 }
 0x300   :  { %v1042_v53 = vpop.f32.mrf.mxu1 }
 0x301   :  { %v961_v31 = vpop.f32.mrf.mxu0  ;;  %v1043_v62 = vadd.f32 %v1042_v53, %v953_v28 }
 0x302   :  { %v1044_v32 = vpop.f32.mrf.mxu1 }
 0x303   :  { %v965_v42 = vpop.f32.mrf.mxu0  ;;  %v1045_v44 = vadd.f32 %v1044_v32, %v955_v2 }
 0x304   :  { %v1048_v39 = vpop.f32.mrf.mxu1 }
 0x305   :  { %v967_v34 = vpop.f32.mrf.mxu0  ;;  %v1049_v1 = vadd.f32 %v1048_v39, %v959_v30 }
 0x306   :  { %v1050_v40 = vpop.f32.mrf.mxu1 }
 0x307   :  { %v1125_v6 = vpop.f32.mrf.mxu0  ;;  %v1051_v43 = vadd.f32 %v1050_v40, %v961_v31 }
 0x308   :  { %v1054_v41 = vpop.f32.mrf.mxu1  ;;  %v3631_v8 = vadd.f32 %v1125_v6, %v1037_v58 }
 0x309   :  { %v1127_v38 = vpop.f32.mrf.mxu0  ;;  %v1055_v56 = vadd.f32 %v1054_v41, %v965_v42 }
 0x30a   :  { %v1056_v35 = vpop.f32.mrf.mxu1  ;;  %v3635_v37 = vadd.f32 %v1127_v38, %v1039_v54  ;;  %v1680_v20 = vmul.f32 %v3631_v8, %v3631_v8 }
 0x30b   :  { %v1057_v11 = vadd.f32 %v1056_v35, %v967_v34 }
 0x30c   :  { %v1681_v21 = vmul.f32 %v3635_v37, %v3635_v37 }
 0x30e   :  { %v1131_v46 = vpop.f32.mrf.mxu0 }
 0x30f   :  { %v3627_v4 = vadd.f32 %v1131_v46, %v1043_v62 }
 0x310   :  { %v1133_v36 = vpop.f32.mrf.mxu0 }
 0x311   :  { %v3629_v3 = vadd.f32 %v1133_v36, %v1045_v44  ;;  %v1631_v57 = vadd.f32 %v3627_v4, %v3631_v8  ;;  %v1682_v12 = vmul.f32 %v3627_v4, %v3627_v4 }
 0x313   :  { %v1137_v47 = vpop.f32.mrf.mxu0  ;;  %v1683_v16 = vmul.f32 %v3629_v3, %v3629_v3  ;;  %v1640_v22 = vadd.f32 %v3629_v3, %v3635_v37  ;;  %v1688_v27 = vadd.f32 %v1682_v12, %v1680_v20 }
 0x314   :  { %v3633_v9 = vadd.f32 %v1137_v47, %v1049_v1 }
 0x315   :  { %v1139_v48 = vpop.f32.mrf.mxu0  ;;  %v1697_v30 = vadd.f32 %v1683_v16, %v1681_v21 }
 0x316   :  { %v3637_v55 = vadd.f32 %v1139_v48, %v1051_v43  ;;  %v1632_v61 = vadd.f32 %v1631_v57, %v3633_v9  ;;  %v1684_v10 = vmul.f32 %v3633_v9, %v3633_v9 }
 0x318   :  { %v1143_v13 = vpop.f32.mrf.mxu0  ;;  %v1685_v23 = vmul.f32 %v3637_v55, %v3637_v55  ;;  %v1641_v31 = vadd.f32 %v1640_v22, %v3637_v55  ;;  %v1689_v53 = vadd.f32 %v1688_v27, %v1684_v10 }
 0x319   :  { %v3643_v14 = vadd.f32 %v1143_v13, %v1055_v56 }
 0x31a   :  { %v1145_v50 = vpop.f32.mrf.mxu0  ;;  %v1698_v6 = vadd.f32 %v1697_v30, %v1685_v23 }
 0x31b   :  { %v3647_v7 = vadd.f32 %v1145_v50, %v1057_v11  ;;  %v1633_v28 = vadd.f32 %v1632_v61, %v3643_v14  ;;  %v1686_v29 = vmul.f32 %v3643_v14, %v3643_v14 }
 0x31d   :  { %v1687_v42 = vmul.f32 %v3647_v7, %v3647_v7  ;;  %v1642_v32 = vadd.f32 %v1641_v31, %v3647_v7  ;;  %v1634_v46 = vrot.slane %v1633_v28, 4  ;;  %v1690_v47 = vadd.f32 %v1689_v53, %v1686_v29 }
 0x31f   :  { %v1699_v35 = vadd.f32 %v1698_v6, %v1687_v42  ;;  %v1691_v54 = vrot.slane %v1690_v47, 4 }
 0x321   :  { %v1692_v23 = vadd.f32 %v1691_v54, %v1690_v47 }
 0x340   :  { %v1430_v24 = vpop.f32.mrf.mxu1 }
 0x342   :  { %v1432_v18 = vpop.f32.mrf.mxu1 }
 0x345   :  { %v1436_v25 = vpop.f32.mrf.mxu1 }
 0x347   :  { %v1438_v59 = vpop.f32.mrf.mxu1 }
 0x34a   :  { %v1442_v60 = vpop.f32.mrf.mxu1 }
 0x34c   :  { %v1444_v51 = vpop.f32.mrf.mxu1 }
 0x34f   :  { %v1519_v19 = vpop.f32.mrf.mxu0  ;;  %v1448_v45 = vpop.f32.mrf.mxu1 }
 0x350   :  { %v1520_v38 = vadd.f32 %v1519_v19, %v1430_v24 }
 0x351   :  { %v1521_v52 = vpop.f32.mrf.mxu0  ;;  %v1450_v17 = vpop.f32.mrf.mxu1 }
 0x352   :  { %v1522_v48 = vadd.f32 %v1521_v52, %v1432_v18  ;;  %v1700_v18 = vrot.slane %v1699_v35, 4 }
 0x353   :  { %v1525_v49 = vpop.f32.mrf.mxu0 }
 0x354   :  { %v1526_v34 = vadd.f32 %v1525_v49, %v1436_v25  ;;  %v1643_v25 = vrot.slane %v1642_v32, 4 }
 0x355   :  { %v1527_v5 = vpop.f32.mrf.mxu0 }
 0x356   :  { %v1528_v40 = vadd.f32 %v1527_v5, %v1438_v59  ;;  %v1635_v59 = vadd.f32 %v1634_v46, %v1633_v28  ;;  %v1644_v12 = vadd.f32 %v1643_v25, %v1642_v32 }
 0x357   :  { %v1531_v15 = vpop.f32.mrf.mxu0 }
 0x358   :  { %v1532_v62 = vadd.f32 %v1531_v15, %v1442_v60  ;;  %v1636_v42 = vrot.slane %v1635_v59, 2 }
 0x359   :  { %v1533_v2 = vpop.f32.mrf.mxu0 }
 0x35a   :  { %v1534_v58 = vadd.f32 %v1533_v2, %v1444_v51 }
 0x35b   :  { %v1537_v36 = vpop.f32.mrf.mxu0 }
 0x35c   :  { %v1538_v56 = vadd.f32 %v1537_v36, %v1448_v45 }
 0x35d   :  { %v1539_v1 = vpop.f32.mrf.mxu0 }
 0x35e   :  { %v1540_v15 = vadd.f32 %v1539_v1, %v1450_v17 }
 0x384   :  { %v1608_v26 = vpop.f32.mrf.mxu1 }
 0x385   :  { %v3669_v13 = vadd.f32 %v1608_v26, %v1520_v38  ;;  %v1701_v26 = vadd.f32 %v1700_v18, %v1699_v35 }
 0x386   :  { %v1610_v33 = vpop.f32.mrf.mxu1 }
 0x387   :  { %v3673_v49 = vadd.f32 %v1610_v33, %v1522_v48  ;;  %v1706_v52 = vmul.f32 %v3669_v13, %v3669_v13  ;;  %v1645_v33 = vrot.slane %v1644_v12, 2  ;;  %v1702_v46 = vrot.slane %v1701_v26, 2 }
 0x388   :  { %v1614_v39 = vpop.f32.mrf.mxu1  ;;  %v1637_v48 = vadd.f32 %v1636_v42, %v1635_v59 }
 0x389   :  { %v3667_v41 = vadd.f32 %v1614_v39, %v1526_v34  ;;  %v1707_v16 = vmul.f32 %v3673_v49, %v3673_v49  ;;  %v1693_v39 = vrot.slane %v1692_v23, 2  ;;  %v1703_v1 = vadd.f32 %v1702_v46, %v1701_v26 }
 0x38a   :  { %v1616_v50 = vpop.f32.mrf.mxu1 }
 0x38b   :  { %v3671_v44 = vadd.f32 %v1616_v50, %v1528_v40  ;;  %v1708_v24 = vmul.f32 %v3667_v41, %v3667_v41  ;;  %v1649_v11 = vadd.f32 %v3667_v41, %v3669_v13  ;;  %v1646_v50 = vadd.f32 %v1645_v33, %v1644_v12 }
 0x38c   :  { %v1620_v19 = vpop.f32.mrf.mxu1 }
 0x38d   :  { %v3677_v5 = vadd.f32 %v1620_v19, %v1532_v62  ;;  %v1709_v60 = vmul.f32 %v3671_v44, %v3671_v44  ;;  %v1714_v20 = vadd.f32 %v1708_v24, %v1706_v52  ;;  %v1658_v21 = vadd.f32 %v3671_v44, %v3673_v49 }
 0x38e   :  { %v1622_v43 = vpop.f32.mrf.mxu1 }
 0x38f   :  { %v1710_v57 = vmul.f32 %v3677_v5, %v3677_v5  ;;  %v3687_v51 = vadd.f32 %v1622_v43, %v1534_v58  ;;  %v1650_v45 = vadd.f32 %v1649_v11, %v3677_v5  ;;  %v1723_v27 = vadd.f32 %v1709_v60, %v1707_v16 }
 0x390   :  { %v1626_v61 = vpop.f32.mrf.mxu1  ;;  %v1694_v58 = vadd.f32 %v1693_v39, %v1692_v23  ;;  %v1638_v43 = vrot.slane %v1637_v48, 1 }
 0x391   :  { %v1711_v22 = vmul.f32 %v3687_v51, %v3687_v51  ;;  %v3696_v10 = vadd.f32 %v1626_v61, %v1538_v56  ;;  %v1715_v28 = vadd.f32 %v1714_v20, %v1710_v57  ;;  %v1659_v2 = vadd.f32 %v1658_v21, %v3687_v51 }
 0x392   :  { %v1628_v17 = vpop.f32.mrf.mxu1  ;;  %v1647_v56 = vrot.slane %v1646_v50, 1  ;;  %v1695_v20 = vrot.slane %v1694_v58, 1  ;;  %v1704_v61 = vrot.slane %v1703_v1, 1 }
 0x393   :  { %v1651_v30 = vadd.f32 %v1650_v45, %v3696_v10  ;;  %v1712_v31 = vmul.f32 %v3696_v10, %v3696_v10  ;;  %v3702_v29 = vadd.f32 %v1628_v17, %v1540_v15  ;;  %v1724_v34 = vadd.f32 %v1723_v27, %v1711_v22 }
 0x394   :  { %v1639_v22 = vadd.f32 %v1638_v43, %v1637_v48  ;;  %v1648_v27 = vadd.f32 %v1647_v56, %v1646_v50  ;;  %v1696_v17 = vadd.f32 %v1695_v20, %v1694_v58  ;;  %v1954_v58 = vld [vmem:[#allocation9 + $0xf8] sm:$0xff]  ;;  %v1952_v43 = vld [vmem:[#allocation9 + $0xe8] sm:$0xff] }
 0x395   :  { %v1652_v53 = vrot.slane %v1651_v30, 4  ;;  %v1716_v6 = vadd.f32 %v1715_v28, %v1712_v31  ;;  %v1660_v32 = vadd.f32 %v1659_v2, %v3702_v29  ;;  %v1713_v38 = vmul.f32 %v3702_v29, %v3702_v29  ;;  %2837 = vmatprep.subr.mxu0 %v1954_v58  ;;  %v1970_v56 = vld [vmem:[#allocation9 + $0x178] sm:$0xff] }
 0x396   :  { %v1705_v31 = vadd.f32 %v1704_v61, %v1703_v1  ;;  %v1938_v1 = vld [vmem:[#allocation9 + $0x78] sm:$0xff]  ;;  %v1951_v61 = vld [vmem:[#allocation9 + $0xe0] sm:$0xff] }
 0x397   :  { %v1653_v40 = vadd.f32 %v1652_v53, %v1651_v30  ;;  %v1717_v36 = vrot.slane %v1716_v6, 4  ;;  %v1661_v47 = vrot.slane %v1660_v32, 4  ;;  %v1725_v35 = vadd.f32 %v1724_v34, %v1713_v38  ;;  %2838 = vmatpush3.msra.mxu0 %v1938_v1  ;;  %v1962_v58 = vld [vmem:[#allocation9 + $0x138] sm:$0xff]  ;;  %v1928_v1 = vld [vmem:[#allocation9 + $0x28] sm:$0xff] }
 0x399   :  { %v1654_v62 = vrot.slane %v1653_v40, 2  ;;  %v1718_v25 = vadd.f32 %v1717_v36, %v1716_v6  ;;  %v1662_v24 = vadd.f32 %v1661_v47, %v1660_v32  ;;  %v1726_v19 = vrot.slane %v1725_v35, 4 }
 0x39b   :  { %v1663_v54 = vrot.slane %v1662_v24, 2  ;;  %v1727_v18 = vadd.f32 %v1726_v19, %v1725_v35  ;;  %v1655_v52 = vadd.f32 %v1654_v62, %v1653_v40  ;;  %v1719_v60 = vrot.slane %v1718_v25, 2 }
 0x39d   :  { %v1656_v11 = vrot.slane %v1655_v52, 1  ;;  %v1664_v57 = vadd.f32 %v1663_v54, %v1662_v24  ;;  %v1720_v15 = vadd.f32 %v1719_v60, %v1718_v25  ;;  %v1728_v16 = vrot.slane %v1727_v18, 2  ;;  %v1953_v54 = vld [vmem:[#allocation9 + $0xf0] sm:$0xff]  ;;  %v1986_v60 = vld [vmem:[#allocation9 + $0x1f8] sm:$0xff] }
 0x39e   :  { %2893 = vmatprep.subr.mxu1 %v1986_v60  ;;  %2839 = vmatprep.subr.mxu0 %v1953_v54  ;;  %v1977_v54 = vld [vmem:[#allocation9 + $0x1b0] sm:$0xff]  ;;  %v1927_v60 = vld [vmem:[#allocation9 + $0x20] sm:$0xff] }
 0x39f   :  { %v1657_v59 = vadd.f32 %v1656_v11, %v1655_v52  ;;  %v1665_v12 = vrot.slane %v1664_v57, 1  ;;  %v1721_v21 = vrot.slane %v1720_v15, 1  ;;  %v1729_v45 = vadd.f32 %v1728_v16, %v1727_v18  ;;  %v1751_v18 = vld [vmem:[%s4049_s8] sm:$0x1]  ;;  %v1937_v52 = vld [vmem:[#allocation9 + $0x70] sm:$0xff]  ;;  %2894 = vmatpush3.msra.mxu1 %v1970_v56  ;;  %v1976_v56 = vld [vmem:[#allocation9 + $0x1a8] sm:$0xff] }
 0x3a0   :  { %v1969_v16 = vld [vmem:[#allocation9 + $0x170] sm:$0xff]  ;;  %2840 = vmatpush3.msra.mxu0 %v1937_v52 }
 0x3a1   :  { %v1666_v23 = vadd.f32 %v1665_v12, %v1664_v57  ;;  %v1722_v26 = vadd.f32 %v1721_v21, %v1720_v15  ;;  %v1730_v28 = vrot.slane %v1729_v45, 1  ;;  %v1667_v2 = vadd.f32 %v1657_v59, %v1639_v22  ;;  %v1936_v57 = vld [vmem:[#allocation9 + $0x68] sm:$0xff]  ;;  %v1985_v15 = vld [vmem:[#allocation9 + $0x1f0] sm:$0xff]  ;;  %v1755_v12 = vld [vmem:[%s4050_s9] sm:$0x1]  ;;  %2841 = vmatprep.subr.mxu0 %v1952_v43 }
 0x3a2   :  { %2895 = vmatprep.subr.mxu1 %v1985_v15  ;;  %v1984_v59 = vld [vmem:[#allocation9 + $0x1e8] sm:$0xff]  ;;  %v1935_v21 = vld [vmem:[#allocation9 + $0x60] sm:$0xff]  ;;  %2842 = vmatpush3.msra.mxu0 %v1936_v57  ;;  %v1961_v52 = vld [vmem:[#allocation9 + $0x130] sm:$0xff] }
 0x3a3   :  { %v1668_v30 = vadd.f32 %v1666_v23, %v1648_v27  ;;  %v1731_v42 = vadd.f32 %v1730_v28, %v1729_v45  ;;  %v1732_v34 = vadd.f32 %v1722_v26, %v1696_v17  ;;  %2896 = vmatpush3.msra.mxu1 %v1969_v16  ;;  %v1968_v45 = vld [vmem:[#allocation9 + $0x168] sm:$0xff]  ;;  %v1950_v23 = vld [vmem:[#allocation9 + $0xd8] sm:$0xff]  ;;  %v1983_v26 = vld [vmem:[#allocation9 + $0x1e0] sm:$0xff]  ;;  %2843 = vmatprep.subr.mxu0 %v1951_v61 }
 0x3a4   :  { %2897 = vmatprep.subr.mxu1 %v1984_v59  ;;  %v1934_v28 = vld [vmem:[#allocation9 + $0x58] sm:$0xff]  ;;  %v1967_v17 = vld [vmem:[#allocation9 + $0x160] sm:$0xff]  ;;  %2844 = vmatpush3.msra.mxu0 %v1935_v21  ;;  %v1960_v57 = vld [vmem:[#allocation9 + $0x128] sm:$0xff] }
 0x3a5   :  { %v1669_v33 = vadd.f32 %v1668_v30, %v1667_v2  ;;  %v1733_v53 = vadd.f32 %v1731_v42, %v1705_v31  ;;  %2898 = vmatpush3.msra.mxu1 %v1968_v45  ;;  %v1949_v30 = vld [vmem:[#allocation9 + $0xd0] sm:$0xff]  ;;  %v1982_v31 = vld [vmem:[#allocation9 + $0x1d8] sm:$0xff]  ;;  %2845 = vmatprep.subr.mxu0 %v1950_v23  ;;  %v1975_v16 = vld [vmem:[#allocation9 + $0x1a0] sm:$0xff] }
 0x3a6   :  { %2899 = vmatprep.subr.mxu1 %v1983_v26  ;;  %v1933_v42 = vld [vmem:[#allocation9 + $0x50] sm:$0xff]  ;;  %2846 = vmatpush3.msra.mxu0 %v1934_v28  ;;  %v1942_v43 = vld [vmem:[#allocation9 + $0x98] sm:$0xff]  ;;  %v1959_v59 = vld [vmem:[#allocation9 + $0x120] sm:$0xff] }
 0x3a7   :  { %1671 = vrot.lane.b32.xlu0 %v1669_v33, %s3337_s30  ;;  %v1734_v6 = vadd.f32 %v1733_v53, %v1732_v34  ;;  %2900 = vmatpush3.msra.mxu1 %v1967_v17  ;;  %v1948_v34 = vld [vmem:[#allocation9 + $0xc8] sm:$0xff]  ;;  %v1966_v53 = vld [vmem:[#allocation9 + $0x158] sm:$0xff]  ;;  %v1941_v15 = vld [vmem:[#allocation9 + $0x90] sm:$0xff] }
 0x3a8   :  { %2847 = vmatprep.subr.mxu0 %v1949_v30  ;;  %2901 = vmatprep.subr.mxu1 %v1982_v31  ;;  %v1925_v61 = vld [vmem:[#allocation9 + $0x10] sm:$0xff]  ;;  %v1974_v21 = vld [vmem:[#allocation9 + $0x198] sm:$0xff]  ;;  %v1924_v45 = vld [vmem:[#allocation9 + $0x8] sm:$0xff] }
 0x3a9   :  { %1736 = vrot.lane.b32.xlu1 %v1734_v6, %s3337_s30  ;;  %2848 = vmatpush3.msra.mxu0 %v1933_v42  ;;  %v1973_v23 = vld [vmem:[#allocation9 + $0x190] sm:$0xff]  ;;  %v1923_v26 = vld [vmem:[#allocation9] sm:$0xff]  ;;  %v1972_v17 = vld [vmem:[#allocation9 + $0x188] sm:$0xff] }
 0x3aa   :  { %2849 = vmatprep.subr.mxu0 %v1948_v34  ;;  %2902 = vmatpush3.msra.mxu1 %v1966_v53  ;;  %v1957_v28 = vld [vmem:[#allocation9 + $0x110] sm:$0xff]  ;;  %v2018_v30 = vld [vmem:[#allocation9 + $0x2f8] sm:$0xff]  ;;  %v1956_v31 = vld [vmem:[#allocation9 + $0x108] sm:$0xff] }
 0x3ab   :  { %v2002_v42 = vld [vmem:[#allocation9 + $0x278] sm:$0xff]  ;;  %v2017_v34 = vld [vmem:[#allocation9 + $0x2f0] sm:$0xff]  ;;  %v1955_v53 = vld [vmem:[#allocation9 + $0x100] sm:$0xff] }
 0x419   :  { %v1672_v32 = vpop.permute.xlu0 %1671 }
 0x41a   :  { %v1674_v38 = vadd.f32 %v1672_v32, %v1669_v33  ;;  %v1981_v32 = vld [vmem:[#allocation9 + $0x1d0] sm:$0xff] }
 0x41b   :  { %v1737_v39 = vpop.permute.xlu1 %1736  ;;  %2903 = vmatprep.subr.mxu1 %v1981_v32 }
 0x41c   :  { %v1739_v46 = vadd.f32 %v1737_v39, %v1734_v6  ;;  %1676 = vrot.lane.b32.xlu0 %v1674_v38, %s3341_s7  ;;  %v1932_v6 = vld [vmem:[#allocation9 + $0x48] sm:$0xff]  ;;  %v1965_v39 = vld [vmem:[#allocation9 + $0x150] sm:$0xff] }
 0x41d   :  { %2850 = vmatpush3.msra.mxu0 %v1932_v6  ;;  %2904 = vmatpush3.msra.mxu1 %v1965_v39  ;;  %v2001_v6 = vld [vmem:[#allocation9 + $0x270] sm:$0xff]  ;;  %v2429_v39 = vld [vmem:[#allocation11 + $0xf8] sm:$0xff] }
 0x41e   :  { %1741 = vrot.lane.b32.xlu1 %v1739_v46, %s3341_s7 }
 0x48e   :  { %v1677_v40 = vpop.permute.xlu0 %1676 }
 0x48f   :  { %v1679_v36 = vadd.f32 %v1677_v40, %v1674_v38  ;;  %v1947_v38 = vld [vmem:[#allocation9 + $0xc0] sm:$0xff]  ;;  %v1980_v40 = vld [vmem:[#allocation9 + $0x1c8] sm:$0xff] }
 0x490   :  { %v1742_v47 = vpop.permute.xlu1 %1741  ;;  %2851 = vmatprep.subr.mxu0 %v1947_v38  ;;  %2905 = vmatprep.subr.mxu1 %v1980_v40  ;;  %v2016_v38 = vld [vmem:[#allocation9 + $0x2e8] sm:$0xff] }
 0x491   :  { %v1746_v35 = vmul.f32 0.0078125, %v1679_v36  ;;  %v1744_v48 = vadd.f32 %v1742_v47, %v1739_v46  ;;  %v1931_v46 = vld [vmem:[#allocation9 + $0x40] sm:$0xff]  ;;  %v1946_v36 = vld [vmem:[#allocation9 + $0xb8] sm:$0xff]  ;;  %v1964_v47 = vld [vmem:[#allocation9 + $0x148] sm:$0xff] }
 0x492   :  { %2852 = vmatpush3.msra.mxu0 %v1931_v46  ;;  %2906 = vmatpush3.msra.mxu1 %v1964_v47  ;;  %v2000_v40 = vld [vmem:[#allocation9 + $0x268] sm:$0xff] }
 0x493   :  { %v1748_v50 = vmul.f32 %v1746_v35, %v1746_v35  ;;  %v1747_v62 = vmul.f32 0.0078125, %v1744_v48  ;;  %v1979_v48 = vld [vmem:[#allocation9 + $0x1c0] sm:$0xff]  ;;  %2853 = vmatprep.subr.mxu0 %v1946_v36 }
 0x494   :  { %2907 = vmatprep.subr.mxu1 %v1979_v48  ;;  %v2015_v36 = vld [vmem:[#allocation9 + $0x2e0] sm:$0xff] }
 0x495   :  { %v1749_v25 = vsub.f32 %v1747_v62, %v1748_v50  ;;  %v1945_v50 = vld [vmem:[#allocation9 + $0xb0] sm:$0xff]  ;;  %v1963_v62 = vld [vmem:[#allocation9 + $0x140] sm:$0xff] }
 0x496   :  { %2908 = vmatpush3.msra.mxu1 %v1963_v62  ;;  %v2013_v62 = vld [vmem:[#allocation9 + $0x2d0] sm:$0xff] }
 0x497   :  { %v1750_v24 = vmax.f32 %v1749_v25, 0.0  ;;  %v1929_v25 = vld [vmem:[#allocation9 + $0x30] sm:$0xff] }
 0x499   :  { %v1752_v19 = vadd.f32 1e-05, %v1750_v24  ;;  %v1978_v24 = vld [vmem:[#allocation9 + $0x1b8] sm:$0xff] }
 0x49a   :  { %2909 = vmatprep.subr.mxu1 %v1978_v24  ;;  %v2012_v24 = vld [vmem:[#allocation9 + $0x2c8] sm:$0xff] }
 0x49b   :  { %3189 = vrsqrt.f32 %v1752_v19  ;;  %v1944_v19 = vld [vmem:[#allocation9 + $0xa8] sm:$0xff]  ;;  %2910 = vmatpush3.msra.mxu1 %v1962_v58  ;;  %v2011_v58 = vld [vmem:[#allocation9 + $0x2c0] sm:$0xff] }
 0x49c   :  { %2911 = vmatprep.subr.mxu1 %v1977_v54  ;;  %v1994_v54 = vld [vmem:[#allocation9 + $0x238] sm:$0xff] }
 0x49d   :  { %2912 = vmatpush3.msra.mxu1 %v1961_v52  ;;  %v1993_v52 = vld [vmem:[#allocation9 + $0x230] sm:$0xff] }
 0x49e   :  { %2913 = vmatprep.subr.mxu1 %v1976_v56  ;;  %v2007_v56 = vld [vmem:[#allocation9 + $0x2a0] sm:$0xff] }
 0x49f   :  { %2914 = vmatpush3.msra.mxu1 %v1960_v57  ;;  %v2006_v57 = vld [vmem:[#allocation9 + $0x298] sm:$0xff] }
 0x4a0   :  { %2915 = vmatprep.subr.mxu1 %v1975_v16  ;;  %v2005_v16 = vld [vmem:[#allocation9 + $0x290] sm:$0xff] }
 0x4a1   :  { %2916 = vmatpush3.msra.mxu1 %v1959_v59  ;;  %v2004_v59 = vld [vmem:[#allocation9 + $0x288] sm:$0xff] }
 0x4a2   :  { %2917 = vmatprep.subr.mxu1 %v1974_v21  ;;  %v2003_v21 = vld [vmem:[#allocation9 + $0x280] sm:$0xff] }
 0x4a8   :  { %v3190_v11 = vpop.eup %3189 }
 0x4a9   :  { %v3712_v20 = vmul.f32 %v3190_v11, %v1751_v18  ;;  %v1943_v18 = vld [vmem:[#allocation9 + $0xa0] sm:$0xff]  ;;  %v1926_v11 = vld [vmem:[#allocation9 + $0x18] sm:$0xff] }
 0x4ab   :  { %v1762_v22 = vrot.slane %v3712_v20, %v3515_v63  ;;  %v1756_v27 = vmul.f32 %v3712_v20, %v1746_v35  ;;  %v1930_v35 = vld [vmem:[#allocation9 + $0x38] sm:$0xff] }
 0x4ac   :  { %2854 = vmatpush3.msra.mxu0 %v1930_v35  ;;  %v1999_v35 = vld [vmem:[#allocation9 + $0x260] sm:$0xff] }
 0x4ad   :  { %1763 = vrot.lane.b32.xlu0 %v1762_v22, %s3342_s26  ;;  %v3720_v2 = vsub.f32 %v1755_v12, %v1756_v27  ;;  %2855 = vmatprep.subr.mxu0 %v1945_v50  ;;  %v1940_v12 = vld [vmem:[#allocation9 + $0x88] sm:$0xff]  ;;  %v1958_v22 = vld [vmem:[#allocation9 + $0x118] sm:$0xff]  ;;  %v1939_v27 = vld [vmem:[#allocation9 + $0x80] sm:$0xff] }
 0x4ae   :  { %2856 = vmatpush3.msra.mxu0 %v1929_v25  ;;  %2918 = vmatpush3.msra.mxu1 %v1958_v22  ;;  %v2014_v50 = vld [vmem:[#allocation9 + $0x2d8] sm:$0xff]  ;;  %v1997_v25 = vld [vmem:[#allocation9 + $0x250] sm:$0xff] }
 0x4af   :  { %v1777_v33 = vrot.slane %v3720_v2, %v3515_v63  ;;  %2857 = vmatprep.subr.mxu0 %v1944_v19  ;;  %2919 = vmatprep.subr.mxu1 %v1973_v23  ;;  %v1996_v19 = vld [vmem:[#allocation9 + $0x248] sm:$0xff]  ;;  %v2461_v22 = vld [vmem:[#allocation11 + $0x1f8] sm:$0xff] }
 0x4b0   :  { %2858 = vmatpush3.msra.mxu0 %v1928_v1  ;;  %2920 = vmatpush3.msra.mxu1 %v1957_v28  ;;  %v1995_v1 = vld [vmem:[#allocation9 + $0x240] sm:$0xff] }
 0x4b1   :  { %1778 = vrot.lane.b32.xlu1 %v1777_v33, %s3342_s26  ;;  %2859 = vmatprep.subr.mxu0 %v1943_v18  ;;  %v1971_v33 = vld [vmem:[#allocation9 + $0x180] sm:$0xff]  ;;  %v2009_v18 = vld [vmem:[#allocation9 + $0x2b0] sm:$0xff] }
 0x4b2   :  { %2860 = vmatpush3.msra.mxu0 %v1927_v60  ;;  %2921 = vmatprep.subr.mxu1 %v1972_v17  ;;  %v2008_v60 = vld [vmem:[#allocation9 + $0x2a8] sm:$0xff] }
 0x4b3   :  { %2861 = vmatprep.subr.mxu0 %v1942_v43  ;;  %2922 = vmatpush3.msra.mxu1 %v1956_v31  ;;  %v1992_v43 = vld [vmem:[#allocation9 + $0x228] sm:$0xff] }
 0x4b4   :  { %2862 = vmatpush3.msra.mxu0 %v1926_v11  ;;  %2923 = vmatprep.subr.mxu1 %v1971_v33  ;;  %v1991_v11 = vld [vmem:[#allocation9 + $0x220] sm:$0xff] }
 0x4b5   :  { %2863 = vmatprep.subr.mxu0 %v1941_v15  ;;  %2924 = vmatpush3.msra.mxu1 %v1955_v53  ;;  %v1990_v15 = vld [vmem:[#allocation9 + $0x218] sm:$0xff] }
 0x4b6   :  { %2864 = vmatpush3.msra.mxu0 %v1925_v61  ;;  %3005 = vmatprep.subr.mxu1 %v2429_v39  ;;  %v1989_v61 = vld [vmem:[#allocation9 + $0x210] sm:$0xff] }
 0x4b7   :  { %2865 = vmatprep.subr.mxu0 %v1940_v12  ;;  %v1988_v12 = vld [vmem:[#allocation9 + $0x208] sm:$0xff] }
 0x4b8   :  { %2866 = vmatpush3.msra.mxu0 %v1924_v45  ;;  %v1987_v45 = vld [vmem:[#allocation9 + $0x200] sm:$0xff] }
 0x4b9   :  { %2867 = vmatprep.subr.mxu0 %v1939_v27 }
 0x4ba   :  { %2868 = vmatpush3.msra.mxu0 %v1923_v26 }
 0x4bb   :  { %2084 = vmatmul.mubr.f32.vlgmr.msra.gmra.mxu0 %v3340_v0  ;;  %2949 = vmatprep.subr.mxu0 %v2018_v30 }
 0x4bc   :  { %2950 = vmatpush3.msra.mxu0 %v2002_v42 }
 0x4bd   :  { %2951 = vmatprep.subr.mxu0 %v2017_v34 }
 0x4be   :  { %2952 = vmatpush3.msra.mxu0 %v2001_v6 }
 0x4bf   :  { %2953 = vmatprep.subr.mxu0 %v2016_v38 }
 0x4c0   :  { %2954 = vmatpush3.msra.mxu0 %v2000_v40  ;;  %v2428_v40 = vld [vmem:[#allocation11 + $0xf0] sm:$0xff] }
 0x4c1   :  { %2955 = vmatprep.subr.mxu0 %v2015_v36 }
 0x4c2   :  { %2956 = vmatpush3.msra.mxu0 %v1999_v35  ;;  %v2427_v35 = vld [vmem:[#allocation11 + $0xe8] sm:$0xff] }
 0x4c3   :  { %2957 = vmatprep.subr.mxu0 %v2014_v50 }
 0x51f   :  { %v1764_v32 = vpop.permute.xlu0 %1763 }
 0x520   :  { %v3727_v46 = vsel %vm1766_vm3, %v3712_v20, %v1764_v32  ;;  %v1998_v20 = vld [vmem:[#allocation9 + $0x258] sm:$0xff] }
 0x521   :  { %1769 = vrot.lane.b32.xlu0 %v3727_v46, %s3337_s30  ;;  %2958 = vmatpush3.msra.mxu0 %v1998_v20 }
 0x522   :  { %2959 = vmatprep.subr.mxu0 %v2013_v62 }
 0x523   :  { %v1779_v47 = vpop.permute.xlu1 %1778  ;;  %2960 = vmatpush3.msra.mxu0 %v1997_v25 }
 0x524   :  { %v1781_v48 = vsel %vm1766_vm3, %v3720_v2, %v1779_v47  ;;  %2961 = vmatprep.subr.mxu0 %v2012_v24  ;;  %v2010_v2 = vld [vmem:[#allocation9 + $0x2b8] sm:$0xff]  ;;  %v2411_v24 = vld [vmem:[#allocation11 + $0x68] sm:$0xff] }
 0x525   :  { %1783 = vrot.lane.b32.xlu1 %v1781_v48, %s3337_s30  ;;  %2962 = vmatpush3.msra.mxu0 %v1996_v19 }
 0x526   :  { %2963 = vmatprep.subr.mxu0 %v2011_v58  ;;  %v2410_v58 = vld [vmem:[#allocation11 + $0x60] sm:$0xff] }
 0x527   :  { %2964 = vmatpush3.msra.mxu0 %v1995_v1  ;;  %v2425_v1 = vld [vmem:[#allocation11 + $0xd8] sm:$0xff] }
 0x528   :  { %2965 = vmatprep.subr.mxu0 %v2010_v2 }
 0x529   :  { %2966 = vmatpush3.msra.mxu0 %v1994_v54 }
 0x52a   :  { %2967 = vmatprep.subr.mxu0 %v2009_v18 }
 0x52b   :  { %2968 = vmatpush3.msra.mxu0 %v1993_v52  ;;  %v2409_v52 = vld [vmem:[#allocation11 + $0x58] sm:$0xff] }
 0x52c   :  { %2969 = vmatprep.subr.mxu0 %v2008_v60  ;;  %v2424_v60 = vld [vmem:[#allocation11 + $0xd0] sm:$0xff] }
 0x52d   :  { %2970 = vmatpush3.msra.mxu0 %v1992_v43 }
 0x52e   :  { %2971 = vmatprep.subr.mxu0 %v2007_v56 }
 0x52f   :  { %2972 = vmatpush3.msra.mxu0 %v1991_v11  ;;  %v2408_v11 = vld [vmem:[#allocation11 + $0x50] sm:$0xff] }
 0x530   :  { %2973 = vmatprep.subr.mxu0 %v2006_v57 }
 0x531   :  { %2974 = vmatpush3.msra.mxu0 %v1990_v15 }
 0x532   :  { %2975 = vmatprep.subr.mxu0 %v2005_v16 }
 0x533   :  { %2976 = vmatpush3.msra.mxu0 %v1989_v61  ;;  %v2407_v61 = vld [vmem:[#allocation11 + $0x48] sm:$0xff] }
 0x534   :  { %2977 = vmatprep.subr.mxu0 %v2004_v59  ;;  %v2422_v59 = vld [vmem:[#allocation11 + $0xc0] sm:$0xff] }
 0x535   :  { %2978 = vmatpush3.msra.mxu0 %v1988_v12 }
 0x536   :  { %2979 = vmatprep.subr.mxu0 %v2003_v21 }
 0x537   :  { %2980 = vmatpush3.msra.mxu0 %v1987_v45  ;;  %v2406_v45 = vld [vmem:[#allocation11 + $0x40] sm:$0xff] }
 0x538   :  { %3061 = vmatprep.subr.mxu0 %v2461_v22 }
 0x593   :  { %v1770_v27 = vpop.permute.xlu0 %1769 }
 0x594   :  { %v1772_v23 = vsel %vm593_vm1, %v3727_v46, %v1770_v27  ;;  %v2413_v46 = vld [vmem:[#allocation11 + $0x78] sm:$0xff] }
 0x595   :  { %v3737_v26 = vrot.slane %v1772_v23, %v3515_v63 }
 0x597   :  { %v1784_v28 = vpop.permute.xlu1 %1783  ;;  %v1792_v30 = vmul.f32 %v3737_v26, %v3635_v37  ;;  %v1791_v42 = vmul.f32 %v3737_v26, %v3631_v8  ;;  %v1836_v33 = vmul.f32 %v3737_v26, %v3673_v49  ;;  %v1835_v34 = vmul.f32 %v3737_v26, %v3669_v13 }
 0x598   :  { %v1786_v17 = vsel %vm593_vm1, %v1781_v48, %v1784_v28  ;;  %v1794_v8 = vmul.f32 %v3737_v26, %v3629_v3  ;;  %v1793_v49 = vmul.f32 %v3737_v26, %v3627_v4  ;;  %v2412_v4 = vld [vmem:[#allocation11 + $0x70] sm:$0xff]  ;;  %v1838_v47 = vmul.f32 %v3737_v26, %v3671_v44  ;;  %v2405_v28 = vld [vmem:[#allocation11 + $0x38] sm:$0xff] }
 0x599   :  { %v3743_v31 = vrot.slane %v1786_v17, %v3515_v63  ;;  %v1842_v48 = vmul.f32 %v3737_v26, %v3702_v29  ;;  %v1837_v20 = vmul.f32 %v3737_v26, %v3667_v41  ;;  %v2426_v29 = vld [vmem:[#allocation11 + $0xe0] sm:$0xff]  ;;  %v1796_v41 = vmul.f32 %v3737_v26, %v3637_v55  ;;  %v2420_v17 = vld [vmem:[#allocation11 + $0xb0] sm:$0xff] }
 0x59a   :  { %v1795_v18 = vmul.f32 %v3737_v26, %v3633_v9  ;;  %v1840_v56 = vmul.f32 %v3737_v26, %v3687_v51  ;;  %v2423_v9 = vld [vmem:[#allocation11 + $0xc8] sm:$0xff]  ;;  %v1839_v16 = vmul.f32 %v3737_v26, %v3677_v5  ;;  %v1798_v21 = vmul.f32 %v3737_v26, %v3647_v7  ;;  %v2421_v5 = vld [vmem:[#allocation11 + $0xb8] sm:$0xff] }
 0x59b   :  { %v1804_v53 = vadd.f32 %v3743_v31, %v1792_v30  ;;  %v1803_v6 = vadd.f32 %v3743_v31, %v1791_v42  ;;  %v1844_v32 = vadd.f32 %v1836_v33, %v3743_v31  ;;  %v1843_v37 = vadd.f32 %v1835_v34, %v3743_v31  ;;  %v2404_v42 = vld [vmem:[#allocation11 + $0x30] sm:$0xff] }
 0x59c   :  { %v1806_v36 = vadd.f32 %v3743_v31, %v1794_v8  ;;  %v1805_v3 = vadd.f32 %v3743_v31, %v1793_v49  ;;  %v1846_v50 = vadd.f32 %v1838_v47, %v3743_v31  ;;  %v3788_v44 = vadd.f32 %v1842_v48, %v3743_v31  ;;  %v2402_v8 = vld [vmem:[#allocation11 + $0x20] sm:$0xff]  ;;  %v2460_v47 = vld [vmem:[#allocation11 + $0x1f0] sm:$0xff] }
 0x59d   :  { %v3755_v38 = vmax.f32 %v1804_v53, 0.0  ;;  %v3757_v63 = vmax.f32 %v1803_v6, 0.0  ;;  %v3765_v13 = vmax.f32 %v1844_v32, 0.0  ;;  %v3767_v39 = vmax.f32 %v1843_v37, 0.0  ;;  %v2403_v53 = vld [vmem:[#allocation11 + $0x28] sm:$0xff]  ;;  %v2418_v32 = vld [vmem:[#allocation11 + $0xa0] sm:$0xff] }
 0x59e   :  { %v3783_v62 = vmax.f32 %v1806_v36, 0.0  ;;  %v3785_v25 = vmax.f32 %v1805_v3, 0.0  ;;  %v1845_v19 = vadd.f32 %v1837_v20, %v3743_v31  ;;  %v3796_v2 = vmax.f32 %v1846_v50, 0.0  ;;  %v2415_v36 = vld [vmem:[#allocation11 + $0x88] sm:$0xff]  ;;  %v2444_v48 = vld [vmem:[#allocation11 + $0x170] sm:$0xff]  ;;  %v2493_v20 = vld [vmem:[#allocation11 + $0x2f8] sm:$0xff] }
 0x59f   :  { %2088 = vmatprep.mubr.f32.mxu0 %v3755_v38  ;;  %2188 = vmatprep.mubr.f32.mxu1 %v3757_v63  ;;  %v1808_v54 = vadd.f32 %v3743_v31, %v1796_v41  ;;  %v1807_v43 = vadd.f32 %v3743_v31, %v1795_v18  ;;  %v1848_v15 = vadd.f32 %v1840_v56, %v3743_v31  ;;  %v2399_v3 = vld [vmem:[#allocation11 + $0x8] sm:$0xff]  ;;  %v2492_v41 = vld [vmem:[#allocation11 + $0x2f0] sm:$0xff]  ;;  %v2474_v56 = vld [vmem:[#allocation11 + $0x260] sm:$0xff] }
 0x5a0   :  { %2089 = vmatmul.mubr.f32.gmra.mxu0 %v3757_v63  ;;  %2189 = vmatmul.mubr.f32.vlgmr.msra.gmra.mxu1 %v3340_v0  ;;  %v3803_v55 = vmax.f32 %v1845_v19, 0.0  ;;  %v1847_v12 = vadd.f32 %v1839_v16, %v3743_v31  ;;  %v1810_v27 = vadd.f32 %v3743_v31, %v1798_v21  ;;  %v1797_v23 = vmul.f32 %v3737_v26, %v3643_v14  ;;  %v2419_v14 = vld [vmem:[#allocation11 + $0xa8] sm:$0xff]  ;;  %v2458_v19 = vld [vmem:[#allocation11 + $0x1e0] sm:$0xff]  ;;  %v2473_v16 = vld [vmem:[#allocation11 + $0x258] sm:$0xff] }
 0x5a1   :  { %2093 = vmatprep.mubr.f32.mxu0 %v3765_v13  ;;  %2193 = vmatprep.mubr.f32.mxu1 %v3767_v39  ;;  %v3810_v57 = vmax.f32 %v1808_v54, 0.0  ;;  %v3817_v51 = vmax.f32 %v1807_v43, 0.0  ;;  %v3824_v22 = vmax.f32 %v1848_v15, 0.0  ;;  %v1841_v34 = vmul.f32 %v3737_v26, %v3696_v10  ;;  %v2417_v10 = vld [vmem:[#allocation11 + $0x98] sm:$0xff]  ;;  %v2459_v50 = vld [vmem:[#allocation11 + $0x1e8] sm:$0xff]  ;;  %v2440_v43 = vld [vmem:[#allocation11 + $0x150] sm:$0xff] }
 0x5a2   :  { %3006 = vmatpush3.msra.mxu1 %v2413_v46  ;;  %v3831_v7 = vmax.f32 %v1847_v12, 0.0  ;;  %v1809_v30 = vadd.f32 %v3743_v31, %v1797_v23  ;;  %v3836_v33 = vmax.f32 %v1810_v27, 0.0  ;;  %v2401_v26 = vld [vmem:[#allocation11 + $0x18] sm:$0xff]  ;;  %v2416_v46 = vld [vmem:[#allocation11 + $0x90] sm:$0xff]  ;;  %v2475_v18 = vld [vmem:[#allocation11 + $0x268] sm:$0xff] }
 0x5a3   :  { %3007 = vmatprep.subr.mxu1 %v2428_v40  ;;  %v1849_v37 = vadd.f32 %v1841_v34, %v3743_v31  ;;  %v2400_v31 = vld [vmem:[#allocation11 + $0x10] sm:$0xff]  ;;  %v2445_v40 = vld [vmem:[#allocation11 + $0x178] sm:$0xff]  ;;  %v2439_v15 = vld [vmem:[#allocation11 + $0x148] sm:$0xff] }
 0x5a4   :  { %3008 = vmatpush3.msra.mxu1 %v2412_v4  ;;  %2094 = vmatmul.mubr.f32.gmra.mxu0 %v3767_v39  ;;  %v3842_v6 = vmax.f32 %v1809_v30, 0.0  ;;  %v2414_v4 = vld [vmem:[#allocation11 + $0x80] sm:$0xff]  ;;  %v2441_v54 = vld [vmem:[#allocation11 + $0x158] sm:$0xff]  ;;  %v2472_v21 = vld [vmem:[#allocation11 + $0x250] sm:$0xff] }
 0x5a5   :  { %2194 = vmatmul.mubr.f32.gmra.mxu1 %v3340_v0  ;;  %3009 = vmatprep.subr.mxu1 %v2427_v35  ;;  %v3848_v49 = vmax.f32 %v1849_v37, 0.0  ;;  %v2398_v35 = vld [vmem:[#allocation11] sm:$0xff]  ;;  %v2437_v27 = vld [vmem:[#allocation11 + $0x138] sm:$0xff]  ;;  %v2471_v23 = vld [vmem:[#allocation11 + $0x248] sm:$0xff] }
 0x5a6   :  { %2098 = vmatprep.mubr.f32.mxu0 %v3783_v62  ;;  %2198 = vmatprep.mubr.f32.mxu1 %v3785_v25  ;;  %v2438_v12 = vld [vmem:[#allocation11 + $0x140] sm:$0xff]  ;;  %v2436_v30 = vld [vmem:[#allocation11 + $0x130] sm:$0xff]  ;;  %v2485_v34 = vld [vmem:[#allocation11 + $0x2b8] sm:$0xff] }
 0x5a7   :  { %3010 = vmatpush3.msra.mxu1 %v2411_v24  ;;  %v2443_v24 = vld [vmem:[#allocation11 + $0x168] sm:$0xff]  ;;  %v2450_v37 = vld [vmem:[#allocation11 + $0x1a0] sm:$0xff] }
 0x5a8   :  { %3011 = vmatprep.subr.mxu1 %v2426_v29  ;;  %2099 = vmatmul.mubr.f32.gmra.mxu0 %v3785_v25  ;;  %v2477_v29 = vld [vmem:[#allocation11 + $0x278] sm:$0xff] }
 0x5a9   :  { %3012 = vmatpush3.msra.mxu1 %v2410_v58  ;;  %2103 = vmatprep.mubr.f32.mxu0 %v3796_v2  ;;  %v2476_v58 = vld [vmem:[#allocation11 + $0x270] sm:$0xff] }
 0x5aa   :  { %2199 = vmatmul.mubr.f32.gmra.mxu1 %v3340_v0  ;;  %3013 = vmatprep.subr.mxu1 %v2425_v1  ;;  %v2457_v1 = vld [vmem:[#allocation11 + $0x1d8] sm:$0xff] }
 0x5ab   :  { %2203 = vmatprep.mubr.f32.mxu1 %v3803_v55  ;;  %3014 = vmatpush3.msra.mxu1 %v2409_v52  ;;  %v2456_v52 = vld [vmem:[#allocation11 + $0x1d0] sm:$0xff] }
 0x5ac   :  { %3015 = vmatprep.subr.mxu1 %v2424_v60  ;;  %2104 = vmatmul.mubr.f32.gmra.mxu0 %v3803_v55  ;;  %v2490_v60 = vld [vmem:[#allocation11 + $0x2e0] sm:$0xff] }
 0x5ad   :  { %3016 = vmatpush3.msra.mxu1 %v2408_v11  ;;  %2108 = vmatprep.mubr.f32.mxu0 %v3810_v57  ;;  %v2455_v11 = vld [vmem:[#allocation11 + $0x1c8] sm:$0xff] }
 0x5ae   :  { %2204 = vmatmul.mubr.f32.gmra.mxu1 %v3340_v0  ;;  %3017 = vmatprep.subr.mxu1 %v2423_v9  ;;  %v2489_v9 = vld [vmem:[#allocation11 + $0x2d8] sm:$0xff] }
 0x5af   :  { %2208 = vmatprep.mubr.f32.mxu1 %v3817_v51  ;;  %3018 = vmatpush3.msra.mxu1 %v2407_v61  ;;  %v2454_v61 = vld [vmem:[#allocation11 + $0x1c0] sm:$0xff] }
 0x5b0   :  { %3019 = vmatprep.subr.mxu1 %v2422_v59  ;;  %2109 = vmatmul.mubr.f32.gmra.mxu0 %v3817_v51  ;;  %v2488_v59 = vld [vmem:[#allocation11 + $0x2d0] sm:$0xff] }
 0x5b1   :  { %3020 = vmatpush3.msra.mxu1 %v2406_v45  ;;  %2113 = vmatprep.mubr.f32.mxu0 %v3824_v22  ;;  %v2453_v45 = vld [vmem:[#allocation11 + $0x1b8] sm:$0xff] }
 0x5b2   :  { %2209 = vmatmul.mubr.f32.gmra.mxu1 %v3340_v0  ;;  %3021 = vmatprep.subr.mxu1 %v2421_v5  ;;  %v2487_v5 = vld [vmem:[#allocation11 + $0x2c8] sm:$0xff] }
 0x5b3   :  { %2213 = vmatprep.mubr.f32.mxu1 %v3831_v7  ;;  %3022 = vmatpush3.msra.mxu1 %v2405_v28  ;;  %v2452_v28 = vld [vmem:[#allocation11 + $0x1b0] sm:$0xff] }
 0x5b4   :  { %3023 = vmatprep.subr.mxu1 %v2420_v17  ;;  %2114 = vmatmul.mubr.f32.gmra.mxu0 %v3831_v7  ;;  %v2486_v17 = vld [vmem:[#allocation11 + $0x2c0] sm:$0xff] }
 0x5b5   :  { %3024 = vmatpush3.msra.mxu1 %v2404_v42  ;;  %2118 = vmatprep.mubr.f32.mxu0 %v3836_v33  ;;  %v2470_v42 = vld [vmem:[#allocation11 + $0x240] sm:$0xff] }
 0x5b6   :  { %2214 = vmatmul.mubr.f32.gmra.mxu1 %v3340_v0  ;;  %3025 = vmatprep.subr.mxu1 %v2419_v14  ;;  %v2451_v14 = vld [vmem:[#allocation11 + $0x1a8] sm:$0xff] }
 0x5b7   :  { %2218 = vmatprep.mubr.f32.mxu1 %v3842_v6  ;;  %3026 = vmatpush3.msra.mxu1 %v2403_v53  ;;  %v2435_v53 = vld [vmem:[#allocation11 + $0x128] sm:$0xff] }
 0x5b8   :  { %3027 = vmatprep.subr.mxu1 %v2418_v32  ;;  %2119 = vmatmul.mubr.f32.gmra.mxu0 %v3842_v6  ;;  %v2469_v32 = vld [vmem:[#allocation11 + $0x238] sm:$0xff] }
 0x5b9   :  { %3028 = vmatpush3.msra.mxu1 %v2402_v8  ;;  %2293 = vmatprep.mubr.f32.mxu0 %v3340_v0  ;;  %v2484_v8 = vld [vmem:[#allocation11 + $0x2b0] sm:$0xff] }
 0x5ba   :  { %2219 = vmatmul.mubr.f32.gmra.mxu1 %v3340_v0  ;;  %3029 = vmatprep.subr.mxu1 %v2417_v10  ;;  %v2434_v10 = vld [vmem:[#allocation11 + $0x120] sm:$0xff] }
 0x5bb   :  { %2223 = vmatprep.mubr.f32.mxu1 %v3848_v49  ;;  %3030 = vmatpush3.msra.mxu1 %v2401_v26  ;;  %v2468_v26 = vld [vmem:[#allocation11 + $0x230] sm:$0xff] }
 0x5bc   :  { %3031 = vmatprep.subr.mxu1 %v2416_v46  ;;  %2294 = vmatmul.mubr.f32.vlgmr.msra.gmra.mxu0 %v3755_v38  ;;  %v2449_v46 = vld [vmem:[#allocation11 + $0x198] sm:$0xff] }
 0x5bd   :  { %3032 = vmatpush3.msra.mxu1 %v2400_v31  ;;  %3062 = vmatpush3.msra.mxu0 %v2445_v40  ;;  %v2483_v31 = vld [vmem:[#allocation11 + $0x2a8] sm:$0xff]  ;;  %v2433_v40 = vld [vmem:[#allocation11 + $0x118] sm:$0xff] }
 0x5be   :  { %2224 = vmatmul.mubr.f32.gmra.mxu1 %v3340_v0  ;;  %3033 = vmatprep.subr.mxu1 %v2415_v36  ;;  %v2467_v36 = vld [vmem:[#allocation11 + $0x228] sm:$0xff] }
 0x5bf   :  { %3034 = vmatpush3.msra.mxu1 %v2399_v3  ;;  %2558 = vmatprep.mubr.f32.mxu1 %v3755_v38  ;;  %v2442_v38 = vld [vmem:[#allocation11 + $0x160] sm:$0xff]  ;;  %v2448_v3 = vld [vmem:[#allocation11 + $0x190] sm:$0xff] }
 0x5c0   :  { %3035 = vmatprep.subr.mxu1 %v2414_v4  ;;  %3063 = vmatprep.subr.mxu0 %v2460_v47  ;;  %v2482_v4 = vld [vmem:[#allocation11 + $0x2a0] sm:$0xff]  ;;  %v2432_v47 = vld [vmem:[#allocation11 + $0x110] sm:$0xff] }
 0x5c1   :  { %2298 = vmatprep.mubr.f32.mxu0 %v3340_v0  ;;  %3036 = vmatpush3.msra.mxu1 %v2398_v35  ;;  %v2466_v35 = vld [vmem:[#allocation11 + $0x220] sm:$0xff] }
 0x5c2   :  { %3064 = vmatpush3.msra.mxu0 %v2444_v48  ;;  %2559 = vmatmul.mubr.f32.vlgmr.msra.gmra.mxu1 %v3757_v63  ;;  %v2491_v63 = vld [vmem:[#allocation11 + $0x2e8] sm:$0xff]  ;;  %v1858_v48 = vmax.f32 %v3788_v44, 0.0  ;;  %v2464_v44 = vld [vmem:[#allocation11 + $0x210] sm:$0xff] }
 0x5c3   :  { %2299 = vmatmul.mubr.f32.gmra.mxu0 %v3765_v13  ;;  %3065 = vmatprep.subr.mxu0 %v2459_v50  ;;  %v2447_v50 = vld [vmem:[#allocation11 + $0x188] sm:$0xff] }
 0x5c4   :  { %3117 = vmatprep.subr.mxu1 %v2493_v20  ;;  %2563 = vmatprep.mubr.f32.mxu1 %v3765_v13  ;;  %v2481_v20 = vld [vmem:[#allocation11 + $0x298] sm:$0xff] }
 0x5c5   :  { %3066 = vmatpush3.msra.mxu0 %v2443_v24  ;;  %3118 = vmatpush3.msra.mxu1 %v2477_v29  ;;  %v2431_v24 = vld [vmem:[#allocation11 + $0x108] sm:$0xff]  ;;  %v2465_v29 = vld [vmem:[#allocation11 + $0x218] sm:$0xff] }
 0x5c6   :  { %3067 = vmatprep.subr.mxu0 %v2458_v19  ;;  %3119 = vmatprep.subr.mxu1 %v2492_v41  ;;  %v2446_v19 = vld [vmem:[#allocation11 + $0x180] sm:$0xff]  ;;  %v2480_v41 = vld [vmem:[#allocation11 + $0x290] sm:$0xff] }
 0x5c7   :  { %2303 = vmatprep.mubr.f32.mxu0 %v3340_v0  ;;  %3068 = vmatpush3.msra.mxu0 %v2442_v38  ;;  %v2430_v38 = vld [vmem:[#allocation11 + $0x100] sm:$0xff] }
 0x5c8   :  { %3120 = vmatpush3.msra.mxu1 %v2476_v58  ;;  %2304 = vmatmul.mubr.f32.gmra.mxu0 %v3783_v62  ;;  %v2479_v58 = vld [vmem:[#allocation11 + $0x288] sm:$0xff] }
 0x5c9   :  { %2564 = vmatmul.mubr.f32.gmra.mxu1 %v3767_v39  ;;  %3069 = vmatprep.subr.mxu0 %v2457_v1  ;;  %v2463_v1 = vld [vmem:[#allocation11 + $0x208] sm:$0xff] }
 0x5ca   :  { %3121 = vmatprep.subr.mxu1 %v2491_v63  ;;  %2568 = vmatprep.mubr.f32.mxu1 %v3783_v62  ;;  %v2478_v63 = vld [vmem:[#allocation11 + $0x280] sm:$0xff] }
 0x5cb   :  { %3070 = vmatpush3.msra.mxu0 %v2441_v54  ;;  %3122 = vmatpush3.msra.mxu1 %v2475_v18  ;;  %v2462_v54 = vld [vmem:[#allocation11 + $0x200] sm:$0xff] }
 0x5cc   :  { %3071 = vmatprep.subr.mxu0 %v2456_v52  ;;  %3123 = vmatprep.subr.mxu1 %v2490_v60 }
 0x5cd   :  { %2308 = vmatprep.mubr.f32.mxu0 %v3340_v0  ;;  %3072 = vmatpush3.msra.mxu0 %v2440_v43 }
 0x5ce   :  { %3124 = vmatpush3.msra.mxu1 %v2474_v56  ;;  %2309 = vmatmul.mubr.f32.gmra.mxu0 %v3796_v2 }
 0x5cf   :  { %2569 = vmatmul.mubr.f32.gmra.mxu1 %v3785_v25  ;;  %3073 = vmatprep.subr.mxu0 %v2455_v11 }
 0x5d0   :  { %3125 = vmatprep.subr.mxu1 %v2489_v9  ;;  %2573 = vmatprep.mubr.f32.mxu1 %v3796_v2 }
 0x5d1   :  { %3074 = vmatpush3.msra.mxu0 %v2439_v15  ;;  %3126 = vmatpush3.msra.mxu1 %v2473_v16 }
 0x5d2   :  { %3075 = vmatprep.subr.mxu0 %v2454_v61  ;;  %3127 = vmatprep.subr.mxu1 %v2488_v59 }
 0x5d3   :  { %2313 = vmatprep.mubr.f32.mxu0 %v3340_v0  ;;  %3076 = vmatpush3.msra.mxu0 %v2438_v12 }
 0x5d4   :  { %3128 = vmatpush3.msra.mxu1 %v2472_v21  ;;  %2314 = vmatmul.mubr.f32.gmra.mxu0 %v3810_v57 }
 0x5d5   :  { %2574 = vmatmul.mubr.f32.gmra.mxu1 %v3803_v55  ;;  %3077 = vmatprep.subr.mxu0 %v2453_v45 }
 0x5d6   :  { %3129 = vmatprep.subr.mxu1 %v2487_v5  ;;  %2578 = vmatprep.mubr.f32.mxu1 %v3810_v57 }
 0x5d7   :  { %3078 = vmatpush3.msra.mxu0 %v2437_v27  ;;  %3130 = vmatpush3.msra.mxu1 %v2471_v23 }
 0x5d8   :  { %3079 = vmatprep.subr.mxu0 %v2452_v28  ;;  %3131 = vmatprep.subr.mxu1 %v2486_v17 }
 0x5d9   :  { %2318 = vmatprep.mubr.f32.mxu0 %v3340_v0  ;;  %3080 = vmatpush3.msra.mxu0 %v2436_v30 }
 0x5da   :  { %3132 = vmatpush3.msra.mxu1 %v2470_v42  ;;  %2319 = vmatmul.mubr.f32.gmra.mxu0 %v3824_v22 }
 0x5db   :  { %2579 = vmatmul.mubr.f32.gmra.mxu1 %v3817_v51  ;;  %3081 = vmatprep.subr.mxu0 %v2451_v14 }
 0x5dc   :  { %3133 = vmatprep.subr.mxu1 %v2485_v34  ;;  %2583 = vmatprep.mubr.f32.mxu1 %v3824_v22 }
 0x5dd   :  { %3082 = vmatpush3.msra.mxu0 %v2435_v53  ;;  %3134 = vmatpush3.msra.mxu1 %v2469_v32 }
 0x5de   :  { %3083 = vmatprep.subr.mxu0 %v2450_v37  ;;  %3135 = vmatprep.subr.mxu1 %v2484_v8 }
 0x5df   :  { %2323 = vmatprep.mubr.f32.mxu0 %v3340_v0  ;;  %3084 = vmatpush3.msra.mxu0 %v2434_v10 }
 0x5e0   :  { %3136 = vmatpush3.msra.mxu1 %v2468_v26  ;;  %2324 = vmatmul.mubr.f32.gmra.mxu0 %v3836_v33 }
 0x5e1   :  { %2584 = vmatmul.mubr.f32.gmra.mxu1 %v3831_v7  ;;  %3085 = vmatprep.subr.mxu0 %v2449_v46 }
 0x5e2   :  { %3137 = vmatprep.subr.mxu1 %v2483_v31  ;;  %2588 = vmatprep.mubr.f32.mxu1 %v3836_v33 }
 0x5e3   :  { %3086 = vmatpush3.msra.mxu0 %v2433_v40  ;;  %3138 = vmatpush3.msra.mxu1 %v2467_v36 }
 0x5e4   :  { %3087 = vmatprep.subr.mxu0 %v2448_v3  ;;  %3139 = vmatprep.subr.mxu1 %v2482_v4 }
 0x5e5   :  { %2328 = vmatprep.mubr.f32.mxu0 %v3340_v0  ;;  %3088 = vmatpush3.msra.mxu0 %v2432_v47 }
 0x5e6   :  { %3140 = vmatpush3.msra.mxu1 %v2466_v35  ;;  %2329 = vmatmul.mubr.f32.gmra.mxu0 %v1858_v48 }
 0x5e7   :  { %2589 = vmatmul.mubr.f32.gmra.mxu1 %v3842_v6  ;;  %3089 = vmatprep.subr.mxu0 %v2447_v50 }
 0x5e8   :  { %3141 = vmatprep.subr.mxu1 %v2481_v20  ;;  %2593 = vmatprep.mubr.f32.mxu1 %v1858_v48 }
 0x5e9   :  { %3090 = vmatpush3.msra.mxu0 %v2431_v24  ;;  %2663 = vmatprep.mubr.f32.mxu0 %v3767_v39 }
 0x5ea   :  { %3142 = vmatpush3.msra.mxu1 %v2465_v29  ;;  %3091 = vmatprep.subr.mxu0 %v2446_v19 }
 0x5eb   :  { %3143 = vmatprep.subr.mxu1 %v2480_v41  ;;  %3092 = vmatpush3.msra.mxu0 %v2430_v38 }
 0x5ec   :  { %3144 = vmatpush3.msra.mxu1 %v2464_v44  ;;  %2664 = vmatmul.mubr.f32.vlgmr.msra.gmra.mxu0 %v3340_v0 }
 0x5ed   :  { %2594 = vmatmul.mubr.f32.gmra.mxu1 %v3848_v49  ;;  %3145 = vmatprep.subr.mxu1 %v2479_v58 }
 0x5ee   :  { %2668 = vmatprep.mubr.f32.mxu0 %v3785_v25  ;;  %3146 = vmatpush3.msra.mxu1 %v2463_v1 }
 0x5ef   :  { %3147 = vmatprep.subr.mxu1 %v2478_v63  ;;  %2768 = vmatprep.mubr.f32.mxu1 %v3340_v0 }
 0x5f0   :  { %3148 = vmatpush3.msra.mxu1 %v2462_v54  ;;  %2669 = vmatmul.mubr.f32.gmra.mxu0 %v3340_v0 }
 0x5f1   :  { %2769 = vmatmul.mubr.f32.vlgmr.msra.gmra.mxu1 %v3765_v13  ;;  %2673 = vmatprep.mubr.f32.mxu0 %v3803_v55  ;;  %v2869_v13 = vpop.f32.mrf.mxu0 }
 0x5f2   :  { %2773 = vmatprep.mubr.f32.mxu1 %v3340_v0 }
 0x5f3   :  { %v2870_v39 = vpop.f32.mrf.mxu0 }
 0x5f4   :  { %2674 = vmatmul.mubr.f32.gmra.mxu0 %v3340_v0  ;;  %v2871_v17 = vadd.f32 %v2870_v39, %v2869_v13 }
 0x5f5   :  { %2774 = vmatmul.mubr.f32.gmra.mxu1 %v3783_v62  ;;  %2678 = vmatprep.mubr.f32.mxu0 %v3817_v51 }
 0x5f6   :  { %2778 = vmatprep.mubr.f32.mxu1 %v3340_v0 }
 0x5f8   :  { %2679 = vmatmul.mubr.f32.gmra.mxu0 %v3340_v0 }
 0x5f9   :  { %2779 = vmatmul.mubr.f32.gmra.mxu1 %v3796_v2  ;;  %2683 = vmatprep.mubr.f32.mxu0 %v3831_v7 }
 0x5fa   :  { %2783 = vmatprep.mubr.f32.mxu1 %v3340_v0 }
 0x5fc   :  { %2684 = vmatmul.mubr.f32.gmra.mxu0 %v3340_v0 }
 0x5fd   :  { %2784 = vmatmul.mubr.f32.gmra.mxu1 %v3810_v57  ;;  %2688 = vmatprep.mubr.f32.mxu0 %v3842_v6 }
 0x5fe   :  { %2788 = vmatprep.mubr.f32.mxu1 %v3340_v0 }
 0x600   :  { %2689 = vmatmul.mubr.f32.gmra.mxu0 %v3340_v0 }
 0x601   :  { %2789 = vmatmul.mubr.f32.gmra.mxu1 %v3824_v22  ;;  %2693 = vmatprep.mubr.f32.mxu0 %v3848_v49 }
 0x602   :  { %2793 = vmatprep.mubr.f32.mxu1 %v3340_v0 }
 0x604   :  { %2694 = vmatmul.mubr.f32.gmra.mxu0 %v3340_v0 }
 0x605   :  { %2794 = vmatmul.mubr.f32.gmra.mxu1 %v3836_v33  ;;  %2698 = vmatprep.mubr.f32.mxu0 %v3340_v0 }
 0x606   :  { %2798 = vmatprep.mubr.f32.mxu1 %v3340_v0 }
 0x608   :  { %2699 = vmatmul.mubr.f32.gmra.mxu0 %v3340_v0 }
 0x609   :  { %2799 = vmatmul.mubr.f32.gmra.mxu1 %v1858_v48 }
 0x60a   :  { %2803 = vmatprep.mubr.f32.mxu1 %v3340_v0 }
 0x60d   :  { %2804 = vmatmul.mubr.f32.gmra.mxu1 %v3340_v0 }
 0x660   :  { %v2872_v62 = vpop.f32.mrf.mxu0  ;;  %v2925_v25 = vpop.f32.mrf.mxu1 }
 0x662   :  { %v2873_v2 = vpop.f32.mrf.mxu0  ;;  %v2926_v55 = vpop.f32.mrf.mxu1 }
 0x663   :  { %v2927_v27 = vadd.f32 %v2926_v55, %v2925_v25  ;;  %v2874_v26 = vadd.f32 %v2873_v2, %v2872_v62 }
 0x664   :  { %v2875_v57 = vpop.f32.mrf.mxu0 }
 0x665   :  { %v2928_v51 = vpop.f32.mrf.mxu1  ;;  %v2191_v14 = vadd.f32 %v2927_v27, %v2871_v17 }
 0x666   :  { %v2876_v22 = vpop.f32.mrf.mxu0 }
 0x667   :  { %v2929_v7 = vpop.f32.mrf.mxu1  ;;  %v2877_v35 = vadd.f32 %v2876_v22, %v2875_v57 }
 0x668   :  { %v2878_v33 = vpop.f32.mrf.mxu0  ;;  %v2930_v37 = vadd.f32 %v2929_v7, %v2928_v51 }
 0x66a   :  { %v2931_v6 = vpop.f32.mrf.mxu1  ;;  %v2879_v49 = vpop.f32.mrf.mxu0  ;;  %v2196_v40 = vadd.f32 %v2930_v37, %v2874_v26 }
 0x66b   :  { %v2880_v44 = vadd.f32 %v2879_v49, %v2878_v33 }
 0x66c   :  { %v2932_v18 = vpop.f32.mrf.mxu1  ;;  %v2881_v52 = vpop.f32.mrf.mxu0 }
 0x66d   :  { %v2933_v3 = vadd.f32 %v2932_v18, %v2931_v6 }
 0x66e   :  { %v2934_v60 = vpop.f32.mrf.mxu1  ;;  %v2882_v43 = vpop.f32.mrf.mxu0 }
 0x66f   :  { %v2201_v20 = vadd.f32 %v2933_v3, %v2877_v35  ;;  %v2883_v55 = vadd.f32 %v2882_v43, %v2881_v52 }
 0x670   :  { %v2935_v56 = vpop.f32.mrf.mxu1  ;;  %v3915_v11 = vpop.f32.mrf.mxu0 }
 0x671   :  { %v2936_v19 = vadd.f32 %v2935_v56, %v2934_v60 }
 0x672   :  { %v2937_v0 = vpop.f32.mrf.mxu1  ;;  %v3917_v9 = vpop.f32.mrf.mxu0 }
 0x673   :  { %v2206_v54 = vadd.f32 %v2936_v19, %v2880_v44  ;;  %v2886_v56 = vadd.f32 %v3917_v9, %v3915_v11 }
 0x674   :  { %v2938_v15 = vpop.f32.mrf.mxu1  ;;  %v3919_v16 = vpop.f32.mrf.mxu0 }
 0x675   :  { %v2939_v62 = vadd.f32 %v2938_v15, %v2937_v0 }
 0x676   :  { %v2940_v61 = vpop.f32.mrf.mxu1  ;;  %v3921_v59 = vpop.f32.mrf.mxu0 }
 0x677   :  { %v2211_v7 = vadd.f32 %v2939_v62, %v2883_v55  ;;  %v2889_v11 = vadd.f32 %v3921_v59, %v3919_v16 }
 0x678   :  { %v2941_v12 = vpop.f32.mrf.mxu1  ;;  %v3923_v21 = vpop.f32.mrf.mxu0 }
 0x679   :  { %v2942_v49 = vadd.f32 %v2941_v12, %v2940_v61 }
 0x67a   :  { %v3925_v45 = vpop.f32.mrf.mxu1  ;;  %v3927_v5 = vpop.f32.mrf.mxu0 }
 0x67b   :  { %v2216_v15 = vadd.f32 %v2942_v49, %v2886_v56  ;;  %v2892_v16 = vadd.f32 %v3927_v5, %v3923_v21 }
 0x67c   :  { %v3929_v23 = vpop.f32.mrf.mxu1  ;;  %v2981_v28 = vpop.f32.mrf.mxu0 }
 0x67d   :  { %v2945_v61 = vadd.f32 %v3929_v23, %v3925_v45 }
 0x67e   :  { %v3931_v30 = vpop.f32.mrf.mxu1  ;;  %v2982_v42 = vpop.f32.mrf.mxu0 }
 0x67f   :  { %v2983_v34 = vadd.f32 %v2982_v42, %v2981_v28 }
 0x680   :  { %v3933_v53 = vpop.f32.mrf.mxu1 }
 0x681   :  { %v2296_v32 = vadd.f32 %v2983_v34, %v2191_v14  ;;  %v2221_v34 = vadd.f32 %v2945_v61, %v2889_v11  ;;  %v2948_v45 = vadd.f32 %v3933_v53, %v3931_v30 }
 0x682   :  { %v3935_v8 = vpop.f32.mrf.mxu1 }
 0x683   :  { %3191 = vtanh.f32 %v2296_v32  ;;  %v2984_v10 = vpop.f32.mrf.mxu0 }
 0x684   :  { %v3937_v31 = vpop.f32.mrf.mxu1 }
 0x685   :  { %v2985_v46 = vpop.f32.mrf.mxu0 }
 0x686   :  { %v2986_v36 = vadd.f32 %v2985_v46, %v2984_v10 }
 0x688   :  { %v2301_v4 = vadd.f32 %v2986_v36, %v2196_v40  ;;  %v2987_v47 = vpop.f32.mrf.mxu0  ;;  %v2226_v40 = vadd.f32 %v2948_v45, %v2892_v16 }
 0x689   :  { %v3939_v48 = vpop.f32.mrf.mxu1 }
 0x68a   :  { %3193 = vtanh.f32 %v2301_v4  ;;  %v2988_v50 = vpop.f32.mrf.mxu0 }
 0x68b   :  { %v2989_v24 = vadd.f32 %v2988_v50, %v2987_v47  ;;  %v3941_v29 = vpop.f32.mrf.mxu1 }
 0x68c   :  { %v3042_v62 = vadd.f32 %v3941_v29, %v3939_v48 }
 0x68d   :  { %v2306_v41 = vadd.f32 %v2989_v24, %v2201_v20  ;;  %v3039_v24 = vadd.f32 %v3937_v31, %v3935_v8 }
 0x68e   :  { %v2990_v38 = vpop.f32.mrf.mxu0 }
 0x68f   :  { %3195 = vtanh.f32 %v2306_v41  ;;  %v3943_v58 = vpop.f32.mrf.mxu1 }
 0x690   :  { %v3192_v1 = vpop.eup %3191  ;;  %v2991_v63 = vpop.f32.mrf.mxu0 }
 0x691   :  { %2342 = vst [vmem:[%s4051_s10] sm:$0xff] %v3192_v1  ;;  %v2992_v13 = vadd.f32 %v2991_v63, %v2990_v38  ;;  %v3948_v39 = vpop.f32.mrf.mxu1 }
 0x692   :  { %v3045_v49 = vadd.f32 %v3948_v39, %v3943_v58 }
 0x693   :  { %v2311_v25 = vadd.f32 %v2992_v13, %v2206_v54 }
 0x694   :  { %v2993_v2 = vpop.f32.mrf.mxu0 }
 0x695   :  { %3197 = vtanh.f32 %v2311_v25  ;;  %v3950_v57 = vpop.f32.mrf.mxu1 }
 0x696   :  { %v2994_v51 = vpop.f32.mrf.mxu0 }
 0x697   :  { %v3194_v22 = vpop.eup %3193  ;;  %v2995_v33 = vadd.f32 %v2994_v51, %v2993_v2  ;;  %v3952_v6 = vpop.f32.mrf.mxu1 }
 0x698   :  { %2343 = vst [vmem:[%s4051_s10 + $0x8] sm:$0xff] %v3194_v22 }
 0x699   :  { %v2316_v18 = vadd.f32 %v2995_v33, %v2211_v7 }
 0x69a   :  { %v2996_v60 = vpop.f32.mrf.mxu0 }
 0x69b   :  { %3199 = vtanh.f32 %v2316_v18  ;;  %v3959_v52 = vpop.f32.mrf.mxu1 }
 0x69c   :  { %v3196_v43 = vpop.eup %3195  ;;  %v2997_v0 = vpop.f32.mrf.mxu0 }
 0x69d   :  { %2344 = vst [vmem:[%s4051_s10 + $0x10] sm:$0xff] %v3196_v43  ;;  %v2998_v27 = vadd.f32 %v2997_v0, %v2996_v60  ;;  %v3964_v28 = vpop.f32.mrf.mxu1 }
 0x69f   :  { %v2321_v12 = vadd.f32 %v2998_v27, %v2216_v15  ;;  %v3048_v27 = vadd.f32 %v3952_v6, %v3950_v57 }
 0x6a0   :  { %v2999_v17 = vpop.f32.mrf.mxu0 }
 0x6a1   :  { %3201 = vtanh.f32 %v2321_v12  ;;  %v3970_v9 = vpop.f32.mrf.mxu1 }
 0x6a2   :  { %v3198_v42 = vpop.eup %3197  ;;  %v3000_v14 = vpop.f32.mrf.mxu0 }
 0x6a3   :  { %2345 = vst [vmem:[%s4051_s10 + $0x18] sm:$0xff] %v3198_v42  ;;  %v3001_v32 = vadd.f32 %v3000_v14, %v2999_v17  ;;  %v3975_v37 = vpop.f32.mrf.mxu1 }
 0x6a5   :  { %v2326_v23 = vadd.f32 %v3001_v32, %v2221_v34  ;;  %v3051_v34 = vadd.f32 %v3964_v28, %v3959_v52 }
 0x6a6   :  { %v3002_v10 = vpop.f32.mrf.mxu0 }
 0x6a7   :  { %3203 = vtanh.f32 %v2326_v23  ;;  %v3981_v59 = vpop.f32.mrf.mxu1 }
 0x6a8   :  { %v3200_v26 = vpop.eup %3199  ;;  %v3003_v46 = vpop.f32.mrf.mxu0 }
 0x6a9   :  { %2346 = vst [vmem:[%s4051_s10 + $0x20] sm:$0xff] %v3200_v26  ;;  %v3004_v36 = vadd.f32 %v3003_v46, %v3002_v10  ;;  %v3986_v3 = vpop.f32.mrf.mxu1 }
 0x6ab   :  { %v2331_v4 = vadd.f32 %v3004_v36, %v2226_v40  ;;  %v3054_v40 = vadd.f32 %v3975_v37, %v3970_v9 }
 0x6ac   :  { %v3093_v30 = vpop.f32.mrf.mxu0 }
 0x6ad   :  { %3205 = vtanh.f32 %v2331_v4  ;;  %v3988_v53 = vpop.f32.mrf.mxu1 }
 0x6ae   :  { %v3202_v47 = vpop.eup %3201  ;;  %v3094_v21 = vpop.f32.mrf.mxu0 }
 0x6af   :  { %2347 = vst [vmem:[%s4051_s10 + $0x28] sm:$0xff] %v3202_v47  ;;  %v3993_v5 = vpop.f32.mrf.mxu1  ;;  %v3095_v35 = vadd.f32 %v3094_v21, %v3093_v30 }
 0x6b0   :  { %v3096_v50 = vpop.f32.mrf.mxu0 }
 0x6b1   :  { %v3149_v20 = vpop.f32.mrf.mxu1  ;;  %v2666_v44 = vadd.f32 %v3095_v35, %v3039_v24 }
 0x6b2   :  { %v3097_v19 = vpop.f32.mrf.mxu0 }
 0x6b3   :  { %v3150_v41 = vpop.f32.mrf.mxu1  ;;  %v3098_v1 = vadd.f32 %v3097_v19, %v3096_v50 }
 0x6b4   :  { %v3204_v38 = vpop.eup %3203  ;;  %v3151_v63 = vadd.f32 %v3150_v41, %v3149_v20  ;;  %v3099_v54 = vpop.f32.mrf.mxu0  ;;  %v3057_v20 = vadd.f32 %v3986_v3, %v3981_v59 }
 0x6b5   :  { %2348 = vst [vmem:[%s4051_s10 + $0x30] sm:$0xff] %v3204_v38  ;;  %v3152_v13 = vpop.f32.mrf.mxu1  ;;  %v2671_v51 = vadd.f32 %v3098_v1, %v3042_v62 }
 0x6b6   :  { %v2771_v25 = vadd.f32 %v3151_v63, %v2666_v44  ;;  %v3100_v2 = vpop.f32.mrf.mxu0  ;;  %v3060_v63 = vadd.f32 %v3993_v5, %v3988_v53 }
 0x6b7   :  { %v3153_v55 = vpop.f32.mrf.mxu1  ;;  %v3101_v8 = vadd.f32 %v3100_v2, %v3099_v54 }
 0x6b8   :  { %3207 = vtanh.f32 %v2771_v25  ;;  %v3154_v31 = vadd.f32 %v3153_v55, %v3152_v13  ;;  %v3102_v22 = vpop.f32.mrf.mxu0 }
 0x6b9   :  { %v3155_v7 = vpop.f32.mrf.mxu1  ;;  %v2676_v29 = vadd.f32 %v3101_v8, %v3045_v49 }
 0x6ba   :  { %v3206_v33 = vpop.eup %3205  ;;  %v2776_v18 = vadd.f32 %v3154_v31, %v2671_v51  ;;  %v3103_v60 = vpop.f32.mrf.mxu0 }
 0x6bb   :  { %2349 = vst [vmem:[%s4051_s10 + $0x38] sm:$0xff] %v3206_v33  ;;  %v3156_v48 = vpop.f32.mrf.mxu1  ;;  %v3104_v56 = vadd.f32 %v3103_v60, %v3102_v22 }
 0x6bc   :  { %3209 = vtanh.f32 %v2776_v18  ;;  %v3157_v43 = vadd.f32 %v3156_v48, %v3155_v7  ;;  %v3105_v0 = vpop.f32.mrf.mxu0 }
 0x6bd   :  { %v3158_v15 = vpop.f32.mrf.mxu1  ;;  %v2681_v58 = vadd.f32 %v3104_v56, %v3048_v27 }
 0x6be   :  { %v2781_v61 = vadd.f32 %v3157_v43, %v2676_v29  ;;  %v3106_v12 = vpop.f32.mrf.mxu0 }
 0x6bf   :  { %v3159_v17 = vpop.f32.mrf.mxu1  ;;  %v3107_v39 = vadd.f32 %v3106_v12, %v3105_v0 }
 0x6c0   :  { %3211 = vtanh.f32 %v2781_v61  ;;  %v3160_v11 = vadd.f32 %v3159_v17, %v3158_v15  ;;  %v3108_v42 = vpop.f32.mrf.mxu0 }
 0x6c1   :  { %v3161_v14 = vpop.f32.mrf.mxu1  ;;  %v2686_v10 = vadd.f32 %v3107_v39, %v3051_v34 }
 0x6c2   :  { %v2786_v32 = vadd.f32 %v3160_v11, %v2681_v58  ;;  %v3109_v45 = vpop.f32.mrf.mxu0 }
 0x6c3   :  { %v3162_v23 = vpop.f32.mrf.mxu1  ;;  %v3110_v16 = vadd.f32 %v3109_v45, %v3108_v42 }
 0x6c4   :  { %3213 = vtanh.f32 %v2786_v32  ;;  %v3163_v26 = vadd.f32 %v3162_v23, %v3161_v14  ;;  %v3111_v57 = vpop.f32.mrf.mxu0 }
 0x6c5   :  { %v3208_v6 = vpop.eup %3207  ;;  %v3164_v46 = vpop.f32.mrf.mxu1  ;;  %v2691_v28 = vadd.f32 %v3110_v16, %v3054_v40 }
 0x6c6   :  { %2817 = vst [vmem:[%s4051_s10 + $0x40] sm:$0xff] %v3208_v6  ;;  %v2791_v36 = vadd.f32 %v3163_v26, %v2686_v10  ;;  %v3112_v4 = vpop.f32.mrf.mxu0 }
 0x6c7   :  { %v3165_v52 = vpop.f32.mrf.mxu1  ;;  %v3113_v30 = vadd.f32 %v3112_v4, %v3111_v57 }
 0x6c8   :  { %3215 = vtanh.f32 %v2791_v36  ;;  %v3166_v47 = vadd.f32 %v3165_v52, %v3164_v46  ;;  %v3114_v21 = vpop.f32.mrf.mxu0 }
 0x6c9   :  { %v3210_v35 = vpop.eup %3209  ;;  %v3167_v50 = vpop.f32.mrf.mxu1  ;;  %v2696_v19 = vadd.f32 %v3113_v30, %v3057_v20 }
 0x6ca   :  { %2818 = vst [vmem:[%s4051_s10 + $0x48] sm:$0xff] %v3210_v35  ;;  %v2796_v9 = vadd.f32 %v3166_v47, %v2691_v28  ;;  %v3115_v37 = vpop.f32.mrf.mxu0 }
 0x6cb   :  { %v3168_v24 = vpop.f32.mrf.mxu1  ;;  %v3116_v41 = vadd.f32 %v3115_v37, %v3114_v21 }
 0x6cc   :  { %3217 = vtanh.f32 %v2796_v9  ;;  %v3169_v38 = vadd.f32 %v3168_v24, %v3167_v50 }
 0x6cd   :  { %v3212_v44 = vpop.eup %3211  ;;  %v3170_v1 = vpop.f32.mrf.mxu1  ;;  %v2701_v54 = vadd.f32 %v3116_v41, %v3060_v63 }
 0x6ce   :  { %2819 = vst [vmem:[%s4051_s10 + $0x50] sm:$0xff] %v3212_v44  ;;  %v2801_v59 = vadd.f32 %v3169_v38, %v2696_v19 }
 0x6cf   :  { %v3171_v3 = vpop.f32.mrf.mxu1 }
 0x6d0   :  { %3219 = vtanh.f32 %v2801_v59  ;;  %v3172_v13 = vadd.f32 %v3171_v3, %v3170_v1 }
 0x6d1   :  { %v3214_v62 = vpop.eup %3213 }
 0x6d2   :  { %2820 = vst [vmem:[%s4051_s10 + $0x58] sm:$0xff] %v3214_v62  ;;  %v2806_v25 = vadd.f32 %v3172_v13, %v2701_v54 }
 0x6d4   :  { %3221 = vtanh.f32 %v2806_v25 }
 0x6d5   :  { %v3216_v2 = vpop.eup %3215 }
 0x6d6   :  { %2821 = vst [vmem:[%s4051_s10 + $0x60] sm:$0xff] %v3216_v2 }
 0x6d9   :  { %v3218_v53 = vpop.eup %3217 }
 0x6da   :  { %2822 = vst [vmem:[%s4051_s10 + $0x68] sm:$0xff] %v3218_v53 }
 0x6dd   :  { %v3220_v5 = vpop.eup %3219 }
 0x6de   :  { %2823 = vst [vmem:[%s4051_s10 + $0x70] sm:$0xff] %v3220_v5 }
 0x6e1   :  { %v3222_v55 = vpop.eup %3221 }
 0x6e2   :  { %2824 = vst [vmem:[%s4051_s10 + $0x78] sm:$0xff] %v3222_v55 }
 0x6e3   :  { %2829 = vsyncpa [#allocation5], 1 }
 0x6e4   :  { %2830 = vsyncpa [#allocation7], 1 }
 0x6e5   :  { %2831 = vsyncpa [#allocation10], 1 }

</bundles_post_ra>
